<compile_context>
chip_gen: v6e
topology: v6e:2x2x1
jax: 0.10.0
libtpu: 0.0.40
codegen_flags: <defaults>
</compile_context>

<pallas_src>
import functools

import jax
import jax.numpy as jnp
import numpy as np
from jax import lax
from jax.experimental import pallas as pl
from jax.experimental.pallas import tpu as pltpu

BN_EPS = 1e-5


def _round_up(x, m):
    return ((x + m - 1) // m) * m


# ----------------------------------------------------------------------------
# Fused Pallas kernel: AvgPool(5,3) + Conv1x1(+folded BN)+ReLU + FC1+ReLU + FC2
# ----------------------------------------------------------------------------
def _aux_head_kernel(x_ref, poolT_ref, wc_ref, bc_ref, w1_ref, b1_ref,
                     w2_ref, b2_ref, o_ref):
    # x_ref:     (TB, Cin, HW)  f32   channel-major activations (cast to bf16 here)
    # poolT_ref: (HW, P)        bf16  transposed avg-pool matrix (1/25 per window)
    # wc_ref:    (Cin, Cout)    bf16  1x1 conv weights with BN scale folded in
    # bc_ref:    (1, Cout)      f32   folded conv bias + BN bias
    # w1_ref:    (P*Cout, 1024) bf16  FC1 weights, input axis permuted to (p, c) order
    # b1_ref:    (1, 1024)      f32
    # w2_ref:    (1024, NCpad)  bf16  FC2 weights, classifier lanes padded to 128
    # b2_ref:    (1, NCpad)     f32
    # o_ref:     (TB, NCpad)    f32
    TB, Cin, HW = x_ref.shape
    P = poolT_ref.shape[1]
    Cout = wc_ref.shape[1]

    # AvgPool(5, stride 3) as one batched matmul, channel-major.
    xb = x_ref[...].reshape(TB * Cin, HW).astype(jnp.bfloat16)
    pooled_c = jnp.dot(xb, poolT_ref[...],
                       preferred_element_type=jnp.float32)           # (TB*Cin, P)

    # Tiny per-sample (Cin, P) -> (P, Cin) transpose (XLU; lanes otherwise idle)
    # so the 1x1 conv contracts over channels with channels on the lane axis.
    pooled = jnp.transpose(pooled_c.reshape(TB, Cin, P), (0, 2, 1))
    pooled = pooled.reshape(TB * P, Cin).astype(jnp.bfloat16)

    # 1x1 conv (BN scale pre-folded) + folded bias + ReLU, one 256-row matmul.
    y = jnp.dot(pooled, wc_ref[...],
                preferred_element_type=jnp.float32)                  # (TB*P, Cout)
    y = jnp.maximum(y + bc_ref[...], 0.0)

    # Flatten per-sample (p, c) -> (TB, 2048); W1 was pre-permuted to this order.
    feat = y.reshape(TB, P * Cout).astype(jnp.bfloat16)

    h = jnp.dot(feat, w1_ref[...],
                preferred_element_type=jnp.float32)                  # (TB, 1024)
    h = jnp.maximum(h + b1_ref[...], 0.0)
    # TODO(synk): Dropout(0.7) is identity here (inference mode).

    o_ref[...] = jnp.dot(h.astype(jnp.bfloat16), w2_ref[...],
                         preferred_element_type=jnp.float32) + b2_ref[...]


# ----------------------------------------------------------------------------
# pallas_call wrapper
# ----------------------------------------------------------------------------
def _pick_batch_tile(n):
    """Rows per grid step. TB=16 gives 256-row conv matmuls (fills the MXU on
    v6e/v7x, 2x the v5e MXU height); small N uses a single full-extent block;
    otherwise pick the tile (16 or 8) that minimizes batch padding."""
    if n <= 16:
        return n, n
    tb, npad = 16, _round_up(n, 16)
    if _round_up(n, 8) < npad:
        tb, npad = 8, _round_up(n, 8)
    return tb, npad


def auxiliary_head(x_cm, prep):
    """x_cm: (N, Cin, H*W) channel-major activations (any float dtype)."""
    N, Cin, HW = x_cm.shape
    poolT, wc, bc = prep["poolT"], prep["w_conv"], prep["b_conv"]
    w1, b1, w2, b2 = prep["w1"], prep["b1"], prep["w2"], prep["b2"]
    P = poolT.shape[1]
    Cout = wc.shape[1]
    Hdim = w1.shape[1]
    NCpad = w2.shape[1]

    TB, Npad = _pick_batch_tile(N)
    if Npad != N:
        x_cm = jnp.pad(x_cm, ((0, Npad - N), (0, 0), (0, 0)))

    out = pl.pallas_call(
        _aux_head_kernel,
        out_shape=jax.ShapeDtypeStruct((Npad, NCpad), jnp.float32),
        grid=(Npad // TB,),
        in_specs=[
            pl.BlockSpec((TB, Cin, HW), lambda i: (i, 0, 0)),
            # Constant index maps -> weights loaded once, resident across steps.
            pl.BlockSpec((HW, P), lambda i: (0, 0)),
            pl.BlockSpec((Cin, Cout), lambda i: (0, 0)),
            pl.BlockSpec((1, Cout), lambda i: (0, 0)),
            pl.BlockSpec((P * Cout, Hdim), lambda i: (0, 0)),
            pl.BlockSpec((1, Hdim), lambda i: (0, 0)),
            pl.BlockSpec((Hdim, NCpad), lambda i: (0, 0)),
            pl.BlockSpec((1, NCpad), lambda i: (0, 0)),
        ],
        out_specs=pl.BlockSpec((TB, NCpad), lambda i: (i, 0)),
        compiler_params=pltpu.CompilerParams(
            dimension_semantics=("parallel",),      # v7x: batch tiles shard over 2 TCs
            vmem_limit_bytes=48 * 1024 * 1024,       # headroom for resident weights
        ),
    )(x_cm, poolT, wc, bc, w1, b1, w2, b2)
    return out[:N]


# ----------------------------------------------------------------------------
# One-time parameter preparation (BN fold, flatten permutation, padding, bf16)
# ----------------------------------------------------------------------------
def _make_pool_matrix(H, W, k=5, s=3):
    oh = (H - k) // s + 1
    ow = (W - k) // s + 1
    m = np.zeros((oh * ow, H * W), np.float32)
    for i in range(oh):
        for j in range(ow):
            for dh in range(k):
                for dw in range(k):
                    m[i * ow + j, (i * s + dh) * W + (j * s + dw)] = 1.0 / (k * k)
    return jnp.asarray(m), oh * ow


def prepare_aux_params(params, H, W):
    conv = params["conv"]
    w2d = conv["w"][:, :, 0, 0]                                   # (Cout, Cin)
    scale = conv["gamma"] / jnp.sqrt(conv["var"] + BN_EPS)        # (Cout,)
    w_fold = w2d.T * scale[None, :]                               # BN scale folded into weights
    b_fold = ((conv["b"] - conv["mean"]) * scale + conv["beta"]).reshape(1, -1)

    pool_mat, P = _make_pool_matrix(H, W)                         # (P, HW)
    Cout = w2d.shape[0]

    # PyTorch flattens the conv output in (C, H, W) order; the kernel emits
    # (H*W, C) order.  Permute W1's input axis once here (not per forward call).
    w1 = params["fc1"]["w"]                                       # (1024, Cout*P)
    assert w1.shape[1] == Cout * P, (w1.shape, Cout, P)
    w1_mat = (w1.reshape(-1, Cout, P).transpose(0, 2, 1)
                .reshape(-1, P * Cout).T)                         # (P*Cout, 1024)
    b1 = params["fc1"]["b"].reshape(1, -1)

    w2 = params["fc2"]["w"]                                       # (NC, 1024)
    nc = w2.shape[0]
    ncpad = _round_up(nc, 128)                                    # lane-dense classifier store
    w2_mat = jnp.zeros((w2.shape[1], ncpad), jnp.float32).at[:, :nc].set(w2.T)
    b2 = jnp.zeros((1, ncpad), jnp.float32).at[:, :nc].set(params["fc2"]["b"])

    return {
        "poolT": jnp.asarray(pool_mat).T.astype(jnp.bfloat16),    # (HW, P)
        "w_conv": w_fold.astype(jnp.bfloat16),
        "b_conv": b_fold.astype(jnp.float32),
        "w1": w1_mat.astype(jnp.bfloat16),
        "b1": b1.astype(jnp.float32),
        "w2": w2_mat.astype(jnp.bfloat16),
        "b2": b2.astype(jnp.float32),
    }


# ----------------------------------------------------------------------------
# Forward
# ----------------------------------------------------------------------------
@functools.partial(jax.jit, static_argnames=("num_classes",))
def auxiliary_forward(x_nchw, prep, *, num_classes):
    N, C, H, W = x_nchw.shape
    # NCHW -> (N, C, H*W): a free reshape (no transpose pass, no separate cast pass);
    # the kernel consumes channel-major f32 directly and casts to bf16 in VMEM.
    x_cm = x_nchw.reshape(N, C, H * W)
    out = auxiliary_head(x_cm, prep)                              # (N, NCpad) f32
    return out[:, :num_classes]


# ----------------------------------------------------------------------------
# Deterministic parameter init (matches the PyTorch module's parameter shapes)
# ----------------------------------------------------------------------------
def init_aux_params(key, in_channels, num_classes, feat_hw):
    kcw, kcb, kg, kbe, km, kv, k1w, k1b, k2w, k2b = jax.random.split(key, 10)
    cout = 128
    fc1_in = cout * feat_hw * feat_hw
    return {
        "conv": {
            "w": jax.random.normal(kcw, (cout, in_channels, 1, 1), jnp.float32)
                 / jnp.sqrt(float(in_channels)),
            "b": 0.05 * jax.random.normal(kcb, (cout,), jnp.float32),
            "gamma": 1.0 + 0.1 * jax.random.normal(kg, (cout,), jnp.float32),
            "beta": 0.1 * jax.random.normal(kbe, (cout,), jnp.float32),
            "mean": 0.05 * jax.random.normal(km, (cout,), jnp.float32),
            "var": jax.random.uniform(kv, (cout,), jnp.float32, 0.5, 1.5),
        },
        "fc1": {
            "w": jax.random.normal(k1w, (1024, fc1_in), jnp.float32)
                 * (2.0 / jnp.sqrt(float(fc1_in))),
            "b": 0.05 * jax.random.normal(k1b, (1024,), jnp.float32),
        },
        "fc2": {
            "w": jax.random.normal(k2w, (num_classes, 1024), jnp.float32)
                 * (2.0 / jnp.sqrt(1024.0)),
            "b": 0.05 * jax.random.normal(k2b, (num_classes,), jnp.float32),
        },
    }


# ----------------------------------------------------------------------------
# Pure-JAX reference (f32) mirroring the PyTorch module in eval mode
# ----------------------------------------------------------------------------
def auxiliary_ref(x_nchw, params):
    pooled = lax.reduce_window(x_nchw, 0.0, lax.add, (1, 1, 5, 5), (1, 1, 3, 3),
                               padding="VALID") / 25.0
    conv = params["conv"]
    w2d = conv["w"][:, :, 0, 0]                                   # (Cout, Cin)
    y = jnp.einsum("nchw,kc->nkhw", pooled, w2d)
    scale = conv["gamma"] / jnp.sqrt(conv["var"] + BN_EPS)
    bias = (conv["b"] - conv["mean"]) * scale + conv["beta"]
    y = jnp.maximum(y * scale[None, :, None, None] + bias[None, :, None, None], 0.0)
    feat = y.reshape(y.shape[0], -1)                              # PyTorch (C,H,W) flatten
    h = jnp.maximum(feat @ params["fc1"]["w"].T + params["fc1"]["b"], 0.0)
    return h @ params["fc2"]["w"].T + params["fc2"]["b"]


# ----------------------------------------------------------------------------
if __name__ == "__main__":
    key = jax.random.PRNGKey(0)
    k_x, k_p = jax.random.split(key)

    # GoogLeNet aux-head geometry: 14x14 -> AvgPool(5, stride 3) -> 4x4, so the
    # Linear(128*4*4, 1024) in the module definition matches.
    N, Cin, H, W = 2, 4, 14, 14
    num_classes = 10
    feat_hw = (H - 5) // 3 + 1

    x = jax.random.normal(k_x, (N, Cin, H, W), dtype=jnp.float32)
    params = init_aux_params(k_p, Cin, num_classes, feat_hw)

    prep = prepare_aux_params(params, H, W)          # one-time weight preprocessing
    out = auxiliary_forward(x, prep, num_classes=num_classes)
    out = jax.block_until_ready(out)
    assert out.shape == (N, num_classes), out.shape

    ref = jax.block_until_ready(auxiliary_ref(x, params))
    np.testing.assert_allclose(np.asarray(out), np.asarray(ref), rtol=5e-2, atol=5e-2)

    print("KERNEL_OK")
</pallas_src>

<mosaic_0001>
module attributes {stable_mosaic.version = 11 : i64} {
  func.func @_aux_head_kernel(%arg0: i32, %arg1: memref<2x4x196xf32, #tpu.memory_space<vmem>>, %arg2: memref<196x16xbf16, #tpu.memory_space<vmem>>, %arg3: memref<4x128xbf16, #tpu.memory_space<vmem>>, %arg4: memref<1x128xf32, #tpu.memory_space<vmem>>, %arg5: memref<2048x1024xbf16, #tpu.memory_space<vmem>>, %arg6: memref<1x1024xf32, #tpu.memory_space<vmem>>, %arg7: memref<1024x128xbf16, #tpu.memory_space<vmem>>, %arg8: memref<1x128xf32, #tpu.memory_space<vmem>>, %arg9: memref<2x128xf32, #tpu.memory_space<vmem>>) attributes {dimension_semantics = [#tpu.dimension_semantics<parallel>], iteration_bounds = array<i64: 1>, scalar_prefetch = 0 : i64, scratch_operands = 0 : i64, tpu.core_type = #tpu.core_type<tc>, window_params = [{transform_indices = @transform_0, window_bounds = array<i64: 2, 4, 196>}, {pipeline_mode = #tpu.pipeline_mode<synchronous>, transform_indices = @transform_1, window_bounds = array<i64: 196, 16>}, {pipeline_mode = #tpu.pipeline_mode<synchronous>, transform_indices = @transform_2, window_bounds = array<i64: 4, 128>}, {pipeline_mode = #tpu.pipeline_mode<synchronous>, transform_indices = @transform_3, window_bounds = array<i64: 1, 128>}, {pipeline_mode = #tpu.pipeline_mode<synchronous>, transform_indices = @transform_4, window_bounds = array<i64: 2048, 1024>}, {pipeline_mode = #tpu.pipeline_mode<synchronous>, transform_indices = @transform_5, window_bounds = array<i64: 1, 1024>}, {pipeline_mode = #tpu.pipeline_mode<synchronous>, transform_indices = @transform_6, window_bounds = array<i64: 1024, 128>}, {pipeline_mode = #tpu.pipeline_mode<synchronous>, transform_indices = @transform_7, window_bounds = array<i64: 1, 128>}, {transform_indices = @transform_8, window_bounds = array<i64: 2, 128>}]} {
    %c0 = arith.constant 0 : index
    %c0_0 = arith.constant 0 : index
    %c0_1 = arith.constant 0 : index
    %0 = vector.load %arg1[%c0, %c0_0, %c0_1] : memref<2x4x196xf32, #tpu.memory_space<vmem>>, vector<2x4x196xf32>
    %1 = vector.shape_cast %0 : vector<2x4x196xf32> to vector<8x196xf32>
    %2 = arith.truncf %1 : vector<8x196xf32> to vector<8x196xbf16>
    %c0_2 = arith.constant 0 : index
    %c0_3 = arith.constant 0 : index
    %3 = vector.load %arg2[%c0_2, %c0_3] : memref<196x16xbf16, #tpu.memory_space<vmem>>, vector<196x16xbf16>
    %cst = arith.constant dense<0.000000e+00> : vector<8x16xf32>
    %4 = tpu.matmul %2, %3, %cst {dimension_numbers = #tpu.dot_dimension_numbers<[1], [0], [0], [1], [0, 0, 1, 1], [], []>} : vector<8x196xbf16>, vector<196x16xbf16>, vector<8x16xf32> -> vector<8x16xf32>
    %5 = vector.shape_cast %4 : vector<8x16xf32> to vector<2x4x16xf32>
    %6 = tpu.transpose %5, [0, 2, 1] : vector<2x4x16xf32> -> vector<2x16x4xf32>
    %7 = vector.shape_cast %6 : vector<2x16x4xf32> to vector<32x4xf32>
    %8 = arith.truncf %7 : vector<32x4xf32> to vector<32x4xbf16>
    %c0_4 = arith.constant 0 : index
    %c0_5 = arith.constant 0 : index
    %9 = vector.load %arg3[%c0_4, %c0_5] : memref<4x128xbf16, #tpu.memory_space<vmem>>, vector<4x128xbf16>
    %cst_6 = arith.constant dense<0.000000e+00> : vector<32x128xf32>
    %10 = tpu.matmul %8, %9, %cst_6 {dimension_numbers = #tpu.dot_dimension_numbers<[1], [0], [0], [1], [0, 0, 1, 1], [], []>} : vector<32x4xbf16>, vector<4x128xbf16>, vector<32x128xf32> -> vector<32x128xf32>
    %c0_7 = arith.constant 0 : index
    %c0_8 = arith.constant 0 : index
    %11 = vector.load %arg4[%c0_7, %c0_8] : memref<1x128xf32, #tpu.memory_space<vmem>>, vector<1x128xf32>
    %12 = vector.broadcast %11 : vector<1x128xf32> to vector<32x128xf32>
    %13 = arith.addf %10, %12 : vector<32x128xf32>
    %cst_9 = arith.constant 0.000000e+00 : f32
    %14 = vector.broadcast %cst_9 : f32 to vector<32x128xf32>
    %15 = arith.maximumf %13, %14 : vector<32x128xf32>
    %16 = vector.shape_cast %15 : vector<32x128xf32> to vector<2x2048xf32>
    %17 = arith.truncf %16 : vector<2x2048xf32> to vector<2x2048xbf16>
    %c0_10 = arith.constant 0 : index
    %c0_11 = arith.constant 0 : index
    %18 = vector.load %arg5[%c0_10, %c0_11] : memref<2048x1024xbf16, #tpu.memory_space<vmem>>, vector<2048x1024xbf16>
    %cst_12 = arith.constant dense<0.000000e+00> : vector<2x1024xf32>
    %19 = tpu.matmul %17, %18, %cst_12 {dimension_numbers = #tpu.dot_dimension_numbers<[1], [0], [0], [1], [0, 0, 1, 1], [], []>} : vector<2x2048xbf16>, vector<2048x1024xbf16>, vector<2x1024xf32> -> vector<2x1024xf32>
    %c0_13 = arith.constant 0 : index
    %c0_14 = arith.constant 0 : index
    %20 = vector.load %arg6[%c0_13, %c0_14] : memref<1x1024xf32, #tpu.memory_space<vmem>>, vector<1x1024xf32>
    %21 = vector.broadcast %20 : vector<1x1024xf32> to vector<2x1024xf32>
    %22 = arith.addf %19, %21 : vector<2x1024xf32>
    %cst_15 = arith.constant 0.000000e+00 : f32
    %23 = vector.broadcast %cst_15 : f32 to vector<2x1024xf32>
    %24 = arith.maximumf %22, %23 : vector<2x1024xf32>
    %25 = arith.truncf %24 : vector<2x1024xf32> to vector<2x1024xbf16>
    %c0_16 = arith.constant 0 : index
    %c0_17 = arith.constant 0 : index
    %26 = vector.load %arg7[%c0_16, %c0_17] : memref<1024x128xbf16, #tpu.memory_space<vmem>>, vector<1024x128xbf16>
    %cst_18 = arith.constant dense<0.000000e+00> : vector<2x128xf32>
    %27 = tpu.matmul %25, %26, %cst_18 {dimension_numbers = #tpu.dot_dimension_numbers<[1], [0], [0], [1], [0, 0, 1, 1], [], []>} : vector<2x1024xbf16>, vector<1024x128xbf16>, vector<2x128xf32> -> vector<2x128xf32>
    %c0_19 = arith.constant 0 : index
    %c0_20 = arith.constant 0 : index
    %28 = vector.load %arg8[%c0_19, %c0_20] : memref<1x128xf32, #tpu.memory_space<vmem>>, vector<1x128xf32>
    %29 = vector.broadcast %28 : vector<1x128xf32> to vector<2x128xf32>
    %30 = arith.addf %27, %29 : vector<2x128xf32>
    %c0_21 = arith.constant 0 : index
    %c0_22 = arith.constant 0 : index
    %31 = vector.load %arg9[%c0_21, %c0_22] : memref<2x128xf32, #tpu.memory_space<vmem>>, vector<2x128xf32>
    tpu.vector_store %arg9[%c0_21, %c0_22], %30 {strides = array<i32>} : memref<2x128xf32, #tpu.memory_space<vmem>>, vector<2x128xf32>,
    return
  }
  func.func @transform_0(%arg0: i32) -> (i32, i32, i32) {
    %c0_i32 = arith.constant 0 : i32
    %c0_i32_0 = arith.constant 0 : i32
    %c0_i32_1 = arith.constant 0 : i32
    return %arg0, %c0_i32, %c0_i32_0 : i32, i32, i32
  }
  func.func @transform_1(%arg0: i32) -> (i32, i32) {
    %c0_i32 = arith.constant 0 : i32
    %c0_i32_0 = arith.constant 0 : i32
    %c0_i32_1 = arith.constant 0 : i32
    return %c0_i32, %c0_i32_0 : i32, i32
  }
  func.func @transform_2(%arg0: i32) -> (i32, i32) {
    %c0_i32 = arith.constant 0 : i32
    %c0_i32_0 = arith.constant 0 : i32
    %c0_i32_1 = arith.constant 0 : i32
    return %c0_i32, %c0_i32_0 : i32, i32
  }
  func.func @transform_3(%arg0: i32) -> (i32, i32) {
    %c0_i32 = arith.constant 0 : i32
    %c0_i32_0 = arith.constant 0 : i32
    %c0_i32_1 = arith.constant 0 : i32
    return %c0_i32, %c0_i32_0 : i32, i32
  }
  func.func @transform_4(%arg0: i32) -> (i32, i32) {
    %c0_i32 = arith.constant 0 : i32
    %c0_i32_0 = arith.constant 0 : i32
    %c0_i32_1 = arith.constant 0 : i32
    return %c0_i32, %c0_i32_0 : i32, i32
  }
  func.func @transform_5(%arg0: i32) -> (i32, i32) {
    %c0_i32 = arith.constant 0 : i32
    %c0_i32_0 = arith.constant 0 : i32
    %c0_i32_1 = arith.constant 0 : i32
    return %c0_i32, %c0_i32_0 : i32, i32
  }
  func.func @transform_6(%arg0: i32) -> (i32, i32) {
    %c0_i32 = arith.constant 0 : i32
    %c0_i32_0 = arith.constant 0 : i32
    %c0_i32_1 = arith.constant 0 : i32
    return %c0_i32, %c0_i32_0 : i32, i32
  }
  func.func @transform_7(%arg0: i32) -> (i32, i32) {
    %c0_i32 = arith.constant 0 : i32
    %c0_i32_0 = arith.constant 0 : i32
    %c0_i32_1 = arith.constant 0 : i32
    return %c0_i32, %c0_i32_0 : i32, i32
  }
  func.func @transform_8(%arg0: i32) -> (i32, i32) {
    %c0_i32 = arith.constant 0 : i32
    %c0_i32_0 = arith.constant 0 : i32
    return %arg0, %c0_i32 : i32, i32
  }
}

</mosaic_0001>

<bundles_post_ra>
// kernel: auxiliary_forward.1
= control target key start
LH: loop header
LB: loop body
LE: loop exit
PB: predicated region body
PF: predicated region fallthrough
CT: control target
= control target key end

     0   :  { %13 = vsyncpa [#allocation3], 0  ;;  %s10592_s0 = inlined_call_operand.vmem [shape: f32[2,4,196], index: 0, kind: input, shape index: {}]   ;;  %s10593_s1 = inlined_call_operand.vmem [shape: bf16[196,16], index: 1, kind: input, shape index: {}]   ;;  %s10594_s2 = inlined_call_operand.hbm [shape: bf16[4,128], index: 2, kind: input, shape index: {}]   ;;  %s10595_s3 = inlined_call_operand.hbm [shape: f32[1,128], index: 3, kind: input, shape index: {}]   ;;  %s10596_s4 = inlined_call_operand.hbm [shape: bf16[2048,1024], index: 4, kind: input, shape index: {}]   ;;  %s10597_s5 = inlined_call_operand.hbm [shape: f32[1,1024], index: 5, kind: input, shape index: {}]   ;;  %s10598_s6 = inlined_call_operand.hbm [shape: bf16[1024,128], index: 6, kind: input, shape index: {}]   ;;  %s10599_s7 = inlined_call_operand.hbm [shape: f32[1,128], index: 7, kind: input, shape index: {}]   ;;  %s10600_s8 = inlined_call_operand.hbm [shape: f32[2,128], index: 8, kind: output, shape index: {}]  }
   0x1   :  { %14 = vsyncpa [#allocation6], 0 }
   0x2   :  { %15 = vsyncpa [#allocation9], 0 }
   0x3   :  { %16 = vsyncpa [#allocation12], 0 }
   0x4   :  { %17 = vsyncpa [#allocation4], 0  ;;  %s10214_s27 = smov [#allocation5]   ;;  %s10215_s29 = smov [#allocation8]  }
   0x5   :  { %s38_s28 = sshll.u32 %s10214_s27, 4  ;;  %s60_s30 = sshll.u32 %s10215_s29, 4  ;;  %s39_s28 = int_to_ptr.vmem [resolvable:$true] %s38_s28  ;;  %s61_s30 = int_to_ptr.vmem [resolvable:$true] %s60_s30 }
   0x6   :  { %s10072_s9 = scalar_lea.vmem %s39_s28, 16  ;;  %s10076_s10 = scalar_lea.vmem %s39_s28, 32 }
   0x7   :  { %p10073_p0 = scmp.ne.s32.totalorder %s39_s28, %s10072_s9  ;;  %p10077_p1 = scmp.lt.s32.totalorder %s39_s28, %s39_s28 }
   0x8   :  { %p10078_p2 = scmp.lt.s32.totalorder %s10076_s10, %s10072_s9 }
   0xa   :  { %p10079_p3 = por %p10078_p2, %p10077_p1 }
   0xc   :  { %p10080_p4 = pnand %p10079_p3, %p10073_p0 }
   0xe   :  { %10083 = shalt.err (!%p10080_p4)
}
   0xf   :  { %41 = dma.hbm_to_vmem [thread:$0]  %s10595_s3, 16, %s39_s28, [#allocation6]  }
  0x10   :  { %s10092_s13 = scalar_lea.vmem %s61_s30, 128  ;;  %p10097_p6 = scmp.lt.s32.totalorder %s61_s30, %s61_s30 }
  0x11   :  { %p10093_p5 = scmp.ne.s32.totalorder %s61_s30, %s10092_s13  ;;  %p10098_p7 = scmp.lt.s32.totalorder %s10092_s13, %s10092_s13 }
  0x13   :  { %p10099_p8 = por %p10098_p7, %p10097_p6 }
  0x15   :  { %p10100_p9 = pnand %p10099_p8, %p10093_p5 }
  0x17   :  { %10103 = shalt.err (!%p10100_p9)
}
  0x18   :  { %63 = dma.hbm_to_vmem [thread:$0]  %s10597_s5, 128, %s61_s30, [#allocation9]  }
  0x19   :  { %s10216_s16 = smov [#allocation2]   ;;  %s10217_s18 = smov [#allocation7]  }
  0x1a   :  { %s28_s17 = sshll.u32 %s10216_s16, 4  ;;  %s47_s19 = sshll.u32 %s10217_s18, 4  ;;  %s29_s17 = int_to_ptr.vmem [resolvable:$true] %s28_s17  ;;  %s48_s19 = int_to_ptr.vmem [resolvable:$true] %s47_s19 }
  0x1b   :  { %s10112_s20 = scalar_lea.vmem %s29_s17, 32  ;;  %p10117_p11 = scmp.lt.s32.totalorder %s29_s17, %s29_s17 }
  0x1c   :  { %p10113_p10 = scmp.ne.s32.totalorder %s29_s17, %s10112_s20  ;;  %p10118_p12 = scmp.lt.s32.totalorder %s10112_s20, %s10112_s20 }
  0x1e   :  { %p10119_p13 = por %p10118_p12, %p10117_p11 }
  0x20   :  { %p10120_p0 = pnand %p10119_p13, %p10113_p10 }
  0x22   :  { %10123 = shalt.err (!%p10120_p0)
}
  0x23   :  { %31 = dma.hbm_to_vmem [thread:$0]  %s10594_s2, 32, %s29_s17, [#allocation3]  }
  0x24   :  { %s10132_s22 = scalar_lea.vmem %s48_s19, 131072  ;;  %p10137_p2 = scmp.lt.s32.totalorder %s48_s19, %s48_s19 }
  0x25   :  { %p10133_p1 = scmp.ne.s32.totalorder %s48_s19, %s10132_s22  ;;  %p10138_p3 = scmp.lt.s32.totalorder %s10132_s22, %s10132_s22 }
  0x27   :  { %p10139_p4 = por %p10138_p3, %p10137_p2 }
  0x29   :  { %p10140_p5 = pnand %p10139_p4, %p10133_p1 }
  0x2b   :  { %10143 = shalt.err (!%p10140_p5)
}
  0x2c   :  { %s10218_s5 = smov 512   ;;  %s10219_s23 = smov 32  }
  0x2d   :  { %53 = dma.hbm_to_vmem [thread:$0]  %s10596_s4, 131072, %s48_s19, [#allocation6], %s10218_s5, %s10218_s5, %s10219_s23  }
  0x2e   :  { %s10220_s26 = smov [#allocation10]  }
  0x2f   :  { %s69_s27 = sshll.u32 %s10220_s26, 4  ;;  %s70_s27 = int_to_ptr.vmem [resolvable:$true] %s69_s27 }
  0x30   :  { %s10152_s28 = scalar_lea.vmem %s70_s27, 8192  ;;  %p10157_p7 = scmp.lt.s32.totalorder %s70_s27, %s70_s27 }
  0x31   :  { %p10153_p6 = scmp.ne.s32.totalorder %s70_s27, %s10152_s28  ;;  %p10158_p8 = scmp.lt.s32.totalorder %s10152_s28, %s10152_s28 }
  0x33   :  { %p10159_p9 = por %p10158_p8, %p10157_p7 }
  0x35   :  { %p10160_p10 = pnand %p10159_p9, %p10153_p6 }
  0x37   :  { %10163 = shalt.err (!%p10160_p10)
}
  0x38   :  { %s10221_s2 = smov 64   ;;  %s10222_s29 = smov 4  }
  0x39   :  { %75 = dma.hbm_to_vmem [thread:$0]  %s10598_s6, 8192, %s70_s27, [#allocation9], %s10221_s2, %s10221_s2, %s10222_s29  }
  0x3a   :  { %s10223_s10 = smov [#allocation11]  }
  0x3b   :  { %s82_s11 = sshll.u32 %s10223_s10, 4  ;;  %s83_s11 = int_to_ptr.vmem [resolvable:$true] %s82_s11 }
  0x3c   :  { %s10172_s4 = scalar_lea.vmem %s83_s11, 16  ;;  %s10176_s12 = scalar_lea.vmem %s83_s11, 32 }
  0x3d   :  { %p10173_p11 = scmp.ne.s32.totalorder %s83_s11, %s10172_s4  ;;  %p10177_p12 = scmp.lt.s32.totalorder %s83_s11, %s83_s11 }
  0x3e   :  { %p10178_p13 = scmp.lt.s32.totalorder %s10176_s12, %s10172_s4 }
  0x40   :  { %p10179_p0 = por %p10178_p13, %p10177_p12 }
  0x42   :  { %p10180_p1 = pnand %p10179_p0, %p10173_p11 }
  0x44   :  { %10183 = shalt.err (!%p10180_p1)
}
  0x45   :  { %85 = dma.hbm_to_vmem [thread:$0]  %s10599_s7, 16, %s83_s11, [#allocation12]  }
  0x46   :  { %10204 = dma.done.wait [#allocation3], 32  }
  0x47   :  { %10205 = vsyncadd [#allocation3], 4294967264 }
  0x48   :  { %10206 = dma.done.wait [#allocation6], 131088  }
  0x49   :  { %10207 = vsyncadd [#allocation6], 4294836208 }
  0x4a   :  { %10208 = dma.done.wait [#allocation9], 8320  }
  0x4b   :  { %10209 = vsyncadd [#allocation9], 4294958976 }
  0x4c   :  { %10210 = dma.done.wait [#allocation12], 16  }
  0x4d   :  { %10211 = vsyncadd [#allocation12], 4294967280  ;;  %v10224_v0 = vmov 0   ;;  %v9981_v1 = vld [vmem:[%s10593_s1 + $0x38] sm:$0xff]   ;;  %v9982_v2 = vld [vmem:[%s10593_s1 + $0x30] sm:$0xff]   ;;  %vm219_vm0 = vcmask 1041408  }
  0x4e   :  { %223 = vmatprep.subr.bf16.mxu0 %v10224_v0  ;;  %v9983_v3 = vld [vmem:[%s10593_s1 + $0x28] sm:$0xff]   ;;  %v9989_v4 = vld [vmem:[%s10593_s1 + $0x60] ss:$0 sps:$4 sm:$0x33]   ;;  %v9985_v6 = vld [vmem:[%s10593_s1 + $0x18] sm:$0xff]   ;;  %vm215_vm1 = vcmask 556032  }
  0x4f   :  { %224 = vmatpush1.bf16.msra.mxu0 %v9981_v1  ;;  %v9984_v5 = vld [vmem:[%s10593_s1 + $0x20] sm:$0xff]   ;;  %v221_v7 = vsel %vm219_vm0, %v9989_v4, 0  ;;  %v9986_v10 = vld [vmem:[%s10593_s1 + $0x10] sm:$0xff]   ;;  %v9987_v11 = vld [vmem:[%s10593_s1 + $0x8] sm:$0xff]   ;;  %vm340_vm2 = vcmask 31744  }
  0x50   :  { %225 = vmatprep.subr.bf16.mxu0 %v10224_v0  ;;  %v9996_v8 = vld [vmem:[%s10592_s0 + $0x4] ss:$8 sps:$4 sm:$0xff]   ;;  %v9990_v13 = vld [vmem:[%s10593_s1 + $0x58] sm:$0xff]   ;;  %v9991_v14 = vld [vmem:[%s10593_s1 + $0x50] sm:$0xff]  }
  0x51   :  { %v114_v9 = vpack.c.bf16 %v9996_v8, %v9996_v8  ;;  %v9988_v12 = vld [vmem:[%s10593_s1] sm:$0xff]   ;;  %v9992_v15 = vld [vmem:[%s10593_s1 + $0x48] sm:$0xff]  }
  0x52   :  { %v9994_v16 = vld [vmem:[%s10592_s0] ss:$8 sps:$4 sm:$0xff]   ;;  %s10226_s0 = smov [#allocation13]  }
  0x53   :  { %226 = vmatpush1.bf16.msra.mxu0 %v9982_v2  ;;  %8764 = vmatprep.mubr.msk.bf16.mxu0 %vm215_vm1, %v114_v9  ;;  %v9993_v17 = vld [vmem:[%s10593_s1 + $0x40] sm:$0xff]   ;;  %v113_v18 = vpack.c.bf16 %v9994_v16, %v9994_v16  ;;  %s8739_s1 = sshll.u32 %s10226_s0, 4  ;;  %s8740_s1 = int_to_ptr.vmem [resolvable:$true] %s8739_s1 }
  0x54   :  { %227 = vmatprep.subr.bf16.mxu0 %v10224_v0  ;;  %v332_v22 = vld [vmem:[#allocation2] sm:$0x3]  ;;  %v595_v27 = vld [vmem:[#allocation7 + $0x1c0] sm:$0xff]  ;;  %s10184_s16 = scalar_lea.vmem %s8740_s1, 32  ;;  %p10189_p3 = scmp.lt.s32.totalorder %s8740_s1, %s8740_s1 }
  0x55   :  { %v348_v24 = vsel %vm219_vm0, %v332_v22, 0  ;;  %v599_v28 = vld [vmem:[#allocation7 + $0x1e0] sm:$0xff]  ;;  %p10185_p2 = scmp.ne.s32.totalorder %s8740_s1, %s10184_s16  ;;  %p10190_p4 = scmp.lt.s32.totalorder %s10184_s16, %s10184_s16 }
  0x56   :  { %v10338_v29 = vld [vmem:[#allocation7 + $0x5c0] sm:$0xff]  ;;  %v8825_v30 = vcombine.high %v595_v27, %v599_v28  ;;  %v8824_v31 = vcombine.low %v595_v27, %v599_v28 }
  0x57   :  { %228 = vmatpush1.bf16.msra.mxu0 %v9983_v3  ;;  %v10340_v32 = vld [vmem:[#allocation7 + $0x5e0] sm:$0xff]  ;;  %p10191_p5 = por %p10190_p4, %p10189_p3 }
  0x58   :  { %229 = vmatprep.subr.bf16.mxu0 %v10224_v0  ;;  %v587_v33 = vld [vmem:[#allocation7 + $0x180] sm:$0xff]  ;;  %v8952_v35 = vcombine.low %v10338_v29, %v10340_v32  ;;  %v8953_v36 = vcombine.high %v10338_v29, %v10340_v32  ;;  %6725 = vmatprep.subr.bf16.mxu1 %v8825_v30 }
  0x59   :  { %v591_v34 = vld [vmem:[#allocation7 + $0x1a0] sm:$0xff]  ;;  %6726 = vmatpush1.bf16.msra.mxu1 %v8824_v31  ;;  %p10192_p6 = pnand %p10191_p5, %p10185_p2 }
  0x5a   :  { %v8817_v37 = vcombine.high %v587_v33, %v591_v34  ;;  %v8816_v38 = vcombine.low %v587_v33, %v591_v34  ;;  %v579_v39 = vld [vmem:[#allocation7 + $0x140] sm:$0xff] }
  0x5b   :  { %230 = vmatpush1.bf16.msra.mxu0 %v9984_v5  ;;  %v583_v40 = vld [vmem:[#allocation7 + $0x160] sm:$0xff] }
  0x5c   :  { %231 = vmatprep.subr.bf16.mxu0 %v10224_v0  ;;  %6727 = vmatprep.subr.bf16.mxu1 %v8817_v37  ;;  %v8809_v41 = vcombine.high %v579_v39, %v583_v40  ;;  %v8808_v42 = vcombine.low %v579_v39, %v583_v40  ;;  %v571_v43 = vld [vmem:[#allocation7 + $0x100] sm:$0xff] }
  0x5d   :  { %6728 = vmatpush1.bf16.msra.mxu1 %v8816_v38  ;;  %v575_v44 = vld [vmem:[#allocation7 + $0x120] sm:$0xff] }
  0x5e   :  { %6729 = vmatprep.subr.bf16.mxu1 %v8809_v41  ;;  %v8801_v45 = vcombine.high %v571_v43, %v575_v44  ;;  %v8800_v46 = vcombine.low %v571_v43, %v575_v44  ;;  %v563_v47 = vld [vmem:[#allocation7 + $0xc0] sm:$0xff] }
  0x5f   :  { %232 = vmatpush1.bf16.msra.mxu0 %v9985_v6  ;;  %v567_v48 = vld [vmem:[#allocation7 + $0xe0] sm:$0xff] }
  0x60   :  { %233 = vmatprep.subr.bf16.mxu0 %v10224_v0  ;;  %v8793_v49 = vcombine.high %v563_v47, %v567_v48  ;;  %v8792_v50 = vcombine.low %v563_v47, %v567_v48  ;;  %v555_v51 = vld [vmem:[#allocation7 + $0x80] sm:$0xff] }
  0x61   :  { %6730 = vmatpush1.bf16.msra.mxu1 %v8808_v42  ;;  %v559_v52 = vld [vmem:[#allocation7 + $0xa0] sm:$0xff] }
  0x62   :  { %6731 = vmatprep.subr.bf16.mxu1 %v8801_v45  ;;  %v8785_v53 = vcombine.high %v555_v51, %v559_v52  ;;  %v8784_v54 = vcombine.low %v555_v51, %v559_v52  ;;  %v547_v55 = vld [vmem:[#allocation7 + $0x40] sm:$0xff] }
  0x63   :  { %234 = vmatpush1.bf16.msra.mxu0 %v9986_v10  ;;  %v551_v56 = vld [vmem:[#allocation7 + $0x60] sm:$0xff] }
  0x64   :  { %235 = vmatprep.subr.bf16.mxu0 %v10224_v0  ;;  %v8777_v57 = vcombine.high %v547_v55, %v551_v56  ;;  %v8776_v58 = vcombine.low %v547_v55, %v551_v56  ;;  %v539_v59 = vld [vmem:[#allocation7] sm:$0xff] }
  0x65   :  { %6732 = vmatpush1.bf16.msra.mxu1 %v8800_v46  ;;  %v543_v60 = vld [vmem:[#allocation7 + $0x20] sm:$0xff] }
  0x66   :  { %6733 = vmatprep.subr.bf16.mxu1 %v8793_v49  ;;  %v8769_v61 = vcombine.high %v539_v59, %v543_v60  ;;  %v8768_v62 = vcombine.low %v539_v59, %v543_v60  ;;  %v659_v63 = vld [vmem:[#allocation7 + $0x3c0] sm:$0xff] }
  0x67   :  { %236 = vmatpush1.bf16.msra.mxu0 %v9987_v11  ;;  %v651_v3 = vld [vmem:[#allocation7 + $0x380] sm:$0xff] }
  0x68   :  { %237 = vmatprep.subr.bf16.mxu0 %v10224_v0  ;;  %v655_v4 = vld [vmem:[#allocation7 + $0x3a0] sm:$0xff] }
  0x69   :  { %6734 = vmatpush1.bf16.msra.mxu1 %v8792_v50  ;;  %v8881_v5 = vcombine.high %v651_v3, %v655_v4  ;;  %v8880_v6 = vcombine.low %v651_v3, %v655_v4  ;;  %v647_v8 = vld [vmem:[#allocation7 + $0x360] sm:$0xff] }
  0x6a   :  { %6735 = vmatprep.subr.bf16.mxu1 %v8785_v53  ;;  %v635_v11 = vld [vmem:[#allocation7 + $0x300] sm:$0xff] }
  0x6b   :  { %238 = vmatpush1.bf16.msra.mxu0 %v9988_v12  ;;  %v639_v12 = vld [vmem:[#allocation7 + $0x320] sm:$0xff] }
  0x6c   :  { %245 = vmatprep.subr.bf16.mxu0 %v10224_v0  ;;  %v711_v27 = vld [vmem:[#allocation7 + $0x560] sm:$0xff] }
  0x6d   :  { %6736 = vmatpush1.bf16.msra.mxu1 %v8784_v54  ;;  %v699_v31 = vld [vmem:[#allocation7 + $0x500] sm:$0xff] }
  0x6e   :  { %6737 = vmatprep.subr.bf16.mxu1 %v8777_v57  ;;  %v703_v33 = vld [vmem:[#allocation7 + $0x520] sm:$0xff] }
  0x6f   :  { %246 = vmatpush2.bf16.msra.mxu0 %v221_v7  ;;  %v643_v7 = vld [vmem:[#allocation7 + $0x340] sm:$0xff]  ;;  %v8928_v39 = vcombine.low %v699_v31, %v703_v33 }
  0x70   :  { %247 = vmatprep.subr.bf16.mxu0 %v10224_v0  ;;  %v8873_v9 = vcombine.high %v643_v7, %v647_v8  ;;  %v8872_v10 = vcombine.low %v643_v7, %v647_v8  ;;  %v691_v37 = vld [vmem:[#allocation7 + $0x4c0] sm:$0xff] }
  0x71   :  { %6738 = vmatpush1.bf16.msra.mxu1 %v8776_v58  ;;  %v695_v38 = vld [vmem:[#allocation7 + $0x4e0] sm:$0xff] }
  0x72   :  { %6739 = vmatprep.subr.bf16.mxu1 %v8769_v61  ;;  %v8921_v40 = vcombine.high %v691_v37, %v695_v38  ;;  %v683_v41 = vld [vmem:[#allocation7 + $0x480] sm:$0xff]  ;;  %v8920_v29 = vcombine.low %v691_v37, %v695_v38 }
  0x73   :  { %248 = vmatpush2.bf16.msra.mxu0 %v9990_v13  ;;  %v8865_v13 = vcombine.high %v635_v11, %v639_v12  ;;  %v687_v42 = vld [vmem:[#allocation7 + $0x4a0] sm:$0xff] }
  0x74   :  { %249 = vmatprep.subr.bf16.mxu0 %v10224_v0  ;;  %v8913_v32 = vcombine.high %v683_v41, %v687_v42  ;;  %v679_v43 = vld [vmem:[#allocation7 + $0x460] sm:$0xff]  ;;  %v8912_v44 = vcombine.low %v683_v41, %v687_v42 }
  0x75   :  { %6740 = vmatpush1.bf16.msra.mxu1 %v8768_v62  ;;  %v667_v46 = vld [vmem:[#allocation7 + $0x400] sm:$0xff] }
  0x76   :  { %v671_v47 = vld [vmem:[#allocation7 + $0x420] sm:$0xff] }
  0x77   :  { %250 = vmatpush2.bf16.msra.mxu0 %v9991_v14  ;;  %v8864_v14 = vcombine.low %v635_v11, %v639_v12  ;;  %v8897_v49 = vcombine.high %v667_v46, %v671_v47  ;;  %v787_v50 = vld [vmem:[#allocation7 + $0x7c0] sm:$0xff]  ;;  %v8896_v52 = vcombine.low %v667_v46, %v671_v47  ;;  %v8765_v46 = vld [vmem:[#allocation5] ss:$0 sm:$0xff] }
  0x78   :  { %251 = vmatprep.subr.bf16.mxu0 %v10224_v0  ;;  %v791_v51 = vld [vmem:[#allocation7 + $0x7e0] sm:$0xff] }
  0x79   :  { %v9017_v53 = vcombine.high %v787_v50, %v791_v51  ;;  %v779_v54 = vld [vmem:[#allocation7 + $0x780] sm:$0xff]  ;;  %v9016_v56 = vcombine.low %v787_v50, %v791_v51 }
  0x7a   :  { %v783_v55 = vld [vmem:[#allocation7 + $0x7a0] sm:$0xff] }
  0x7b   :  { %252 = vmatpush2.bf16.msra.mxu0 %v9992_v15  ;;  %v9009_v57 = vcombine.high %v779_v54, %v783_v55  ;;  %v771_v58 = vld [vmem:[#allocation7 + $0x740] sm:$0xff]  ;;  %v9008_v60 = vcombine.low %v779_v54, %v783_v55 }
  0x7c   :  { %253 = vmatprep.subr.bf16.mxu0 %v10224_v0  ;;  %v663_v0 = vld [vmem:[#allocation7 + $0x3e0] sm:$0xff] }
  0x7d   :  { %v8889_v1 = vcombine.high %v659_v63, %v663_v0  ;;  %v8888_v2 = vcombine.low %v659_v63, %v663_v0  ;;  %v775_v59 = vld [vmem:[#allocation7 + $0x760] sm:$0xff] }
  0x7e   :  { %v9001_v61 = vcombine.high %v771_v58, %v775_v59  ;;  %v763_v62 = vld [vmem:[#allocation7 + $0x700] sm:$0xff]  ;;  %v9000_v0 = vcombine.low %v771_v58, %v775_v59 }
  0x7f   :  { %254 = vmatpush2.bf16.msra.mxu0 %v9993_v17  ;;  %6741 = vmatprep.subr.bf16.mxu1 %v8889_v1  ;;  %v767_v63 = vld [vmem:[#allocation7 + $0x720] sm:$0xff] }
  0x80   :  { %9954 = vmatprep.subr.msk.bf16.mxu0 %vm219_vm0, %v332_v22  ;;  %6742 = vmatpush2.bf16.msra.mxu1 %v8888_v2  ;;  %v719_v22 = vld [vmem:[#allocation7 + $0x5a0] sm:$0xff]  ;;  %v8993_v1 = vcombine.high %v763_v62, %v767_v63  ;;  %v8992_v2 = vcombine.low %v763_v62, %v767_v63 }
  0x81   :  { %6743 = vmatprep.subr.bf16.mxu1 %v8881_v5  ;;  %v627_v3 = vld [vmem:[#allocation7 + $0x2c0] sm:$0xff] }
  0x82   :  { %256 = vmatmul.mubr.bf16.vlgmr.msra.gmra.mxu0 %v113_v18  ;;  %v631_v4 = vld [vmem:[#allocation7 + $0x2e0] sm:$0xff] }
  0x83   :  { %9949 = vmatpush3.bf16.msra.mxu0 %v348_v24  ;;  %v8857_v5 = vcombine.high %v627_v3, %v631_v4  ;;  %v755_v7 = vld [vmem:[#allocation7 + $0x6c0] sm:$0xff] }
  0x84   :  { %6766 = vmatprep.subr.bf16.mxu0 %v8953_v36  ;;  %6744 = vmatpush2.bf16.msra.mxu1 %v8880_v6  ;;  %v8929_v36 = vcombine.high %v699_v31, %v703_v33  ;;  %v8856_v6 = vcombine.low %v627_v3, %v631_v4  ;;  %v759_v8 = vld [vmem:[#allocation7 + $0x6e0] sm:$0xff] }
  0x85   :  { %6745 = vmatprep.subr.bf16.mxu1 %v8873_v9  ;;  %v8985_v9 = vcombine.high %v755_v7, %v759_v8  ;;  %v619_v11 = vld [vmem:[#allocation7 + $0x280] sm:$0xff] }
  0x86   :  { %v623_v12 = vld [vmem:[#allocation7 + $0x2a0] sm:$0xff] }
  0x87   :  { %v731_v33 = vld [vmem:[#allocation7 + $0x600] sm:$0xff] }
  0x88   :  { %6746 = vmatpush2.bf16.msra.mxu1 %v8872_v10  ;;  %v8984_v10 = vcombine.low %v755_v7, %v759_v8  ;;  %v10349_v38 = vld [vmem:[#allocation7 + $0x9c0] sm:$0xff] }
  0x89   :  { %6747 = vmatprep.subr.bf16.mxu1 %v8865_v13  ;;  %v8849_v13 = vcombine.high %v619_v11, %v623_v12  ;;  %v10357_v42 = vld [vmem:[#allocation7 + $0xdc0] sm:$0xff] }
  0x8c   :  { %6748 = vmatpush2.bf16.msra.mxu1 %v8864_v14  ;;  %v8848_v14 = vcombine.low %v619_v11, %v623_v12 }
  0x8d   :  { %6749 = vmatprep.subr.bf16.mxu1 %v8857_v5 }
  0x90   :  { %6750 = vmatpush2.bf16.msra.mxu1 %v8856_v6 }
  0x91   :  { %6751 = vmatprep.subr.bf16.mxu1 %v8849_v13 }
  0x94   :  { %6752 = vmatpush2.bf16.msra.mxu1 %v8848_v14  ;;  %v847_v14 = vld [vmem:[#allocation7 + $0x9a0] sm:$0xff] }
 0x142   :  { %v257_v19 = vpop.f32.mrf.mxu0 }
 0x143   :  { %v264_v20 = vcombine.high %v257_v19, %v257_v19 }
 0x144   :  { %v259_v21 = vpop.f32.mrf.mxu0 }
 0x145   :  { %v9969_v23 = vpack.i.bf16 %v264_v20, %v257_v19  ;;  %v715_v21 = vld [vmem:[#allocation7 + $0x580] sm:$0xff] }
 0x146   :  { %v260_v25 = vpop.f32.mrf.mxu0  ;;  %v8944_v28 = vcombine.low %v715_v21, %v719_v22 }
 0x147   :  { %9970 = vxpose.xlu0.b32.start.end [1/1] (short) (narrow) %v9969_v23, 16  ;;  %v8945_v25 = vcombine.high %v715_v21, %v719_v22 }
 0x148   :  { %v261_v26 = vpop.f32.mrf.mxu0 }
 0x149   :  { %v707_v26 = vld [vmem:[#allocation7 + $0x540] sm:$0xff] }
 0x14a   :  { %v8937_v30 = vcombine.high %v707_v26, %v711_v27  ;;  %v8936_v34 = vcombine.low %v707_v26, %v711_v27  ;;  %v603_v27 = vld [vmem:[#allocation7 + $0x200] sm:$0xff] }
 0x1c3   :  { %v9971_v15 = vpop.trf.xlu0 }
 0x1c4   :  { %v9975_v16 = vunpack.i.h.bf16 %v9971_v15  ;;  %v9972_v17 = vunpack.i.l.bf16 %v9971_v15  ;;  %v747_v15 = vld [vmem:[#allocation7 + $0x680] sm:$0xff] }
 0x1c7   :  { %v9976_v18 = vpop.trf.xlu0 }
 0x1c8   :  { %v9980_v19 = vunpack.i.h.bf16 %v9976_v18  ;;  %v9977_v20 = vunpack.i.l.bf16 %v9976_v18 }
 0x1ca   :  { %v330_v23 = vpack.c.bf16 %v9977_v20, %v9972_v17  ;;  %v331_v24 = vpack.c.bf16 %v9980_v19, %v9975_v16  ;;  %v751_v16 = vld [vmem:[#allocation7 + $0x6a0] sm:$0xff] }
 0x1cb   :  { %v8977_v17 = vcombine.high %v747_v15, %v751_v16  ;;  %v8976_v18 = vcombine.low %v747_v15, %v751_v16  ;;  %v611_v19 = vld [vmem:[#allocation7 + $0x240] sm:$0xff] }
 0x1cc   :  { %9950 = vmatprep.mubr.msk.bf16.mxu0 %vm340_vm2, %v330_v23  ;;  %v615_v20 = vld [vmem:[#allocation7 + $0x260] sm:$0xff] }
 0x1cd   :  { %9951 = vmatmul.mubr.msk.bf16.vlgmr.msra.gmra.mxu0 %vm340_vm2, %v331_v24  ;;  %v8841_v21 = vcombine.high %v611_v19, %v615_v20  ;;  %v8840_v22 = vcombine.low %v611_v19, %v615_v20  ;;  %v739_v23 = vld [vmem:[#allocation7 + $0x640] sm:$0xff] }
 0x1ce   :  { %6767 = vmatpush1.bf16.msra.mxu0 %v8952_v35  ;;  %v675_v35 = vld [vmem:[#allocation7 + $0x440] sm:$0xff] }
 0x1cf   :  { %6768 = vmatprep.subr.bf16.mxu0 %v8945_v25  ;;  %v8905_v45 = vcombine.high %v675_v35, %v679_v43  ;;  %v8904_v48 = vcombine.low %v675_v35, %v679_v43  ;;  %v743_v24 = vld [vmem:[#allocation7 + $0x660] sm:$0xff]  ;;  %6753 = vmatprep.subr.bf16.mxu1 %v8841_v21  ;;  %v10225_v43 = vmov 1966171168  }
 0x1d0   :  { %v8969_v25 = vcombine.high %v739_v23, %v743_v24  ;;  %6754 = vmatpush2.bf16.msra.mxu1 %v8840_v22  ;;  %v8968_v26 = vcombine.low %v739_v23, %v743_v24  ;;  %v971_v15 = vld [vmem:[#allocation7 + $0xd80] sm:$0xff] }
 0x1d1   :  { %v975_v16 = vld [vmem:[#allocation7 + $0xda0] sm:$0xff] }
 0x1d2   :  { %6769 = vmatpush1.bf16.msra.mxu0 %v8944_v28  ;;  %v607_v28 = vld [vmem:[#allocation7 + $0x220] sm:$0xff] }
 0x1d3   :  { %6770 = vmatprep.subr.bf16.mxu0 %v8937_v30  ;;  %v8833_v30 = vcombine.high %v603_v27, %v607_v28  ;;  %v8832_v31 = vcombine.low %v603_v27, %v607_v28  ;;  %v9201_v27 = vcombine.high %v971_v15, %v975_v16  ;;  %v835_v28 = vld [vmem:[#allocation7 + $0x940] sm:$0xff] }
 0x1d5   :  { %6755 = vmatprep.subr.bf16.mxu1 %v8833_v30  ;;  %v839_v30 = vld [vmem:[#allocation7 + $0x960] sm:$0xff] }
 0x1d6   :  { %6771 = vmatpush1.bf16.msra.mxu0 %v8936_v34  ;;  %v735_v34 = vld [vmem:[#allocation7 + $0x620] sm:$0xff]  ;;  %6756 = vmatpush2.bf16.msra.mxu1 %v8832_v31 }
 0x1d7   :  { %6772 = vmatprep.subr.bf16.mxu0 %v8929_v36  ;;  %v8961_v36 = vcombine.high %v731_v33, %v735_v34  ;;  %v8960_v37 = vcombine.low %v731_v33, %v735_v34 }
 0x1da   :  { %6773 = vmatpush1.bf16.msra.mxu0 %v8928_v39  ;;  %v10351_v39 = vld [vmem:[#allocation7 + $0x9e0] sm:$0xff] }
 0x1db   :  { %6774 = vmatprep.subr.bf16.mxu0 %v8921_v40  ;;  %v9081_v40 = vcombine.high %v10349_v38, %v10351_v39  ;;  %v9080_v41 = vcombine.low %v10349_v38, %v10351_v39  ;;  %v827_v38 = vld [vmem:[#allocation7 + $0x900] sm:$0xff] }
 0x1dc   :  { %v831_v39 = vld [vmem:[#allocation7 + $0x920] sm:$0xff] }
 0x1dd   :  { %6807 = vmatprep.subr.bf16.mxu1 %v9081_v40  ;;  %v963_v40 = vld [vmem:[#allocation7 + $0xd40] sm:$0xff] }
 0x1de   :  { %6775 = vmatpush1.bf16.msra.mxu0 %v8920_v29  ;;  %v10359_v29 = vld [vmem:[#allocation7 + $0xde0] sm:$0xff] }
 0x1df   :  { %6776 = vmatprep.subr.bf16.mxu0 %v8913_v32  ;;  %v9209_v32 = vcombine.high %v10357_v42, %v10359_v29  ;;  %v9208_v35 = vcombine.low %v10357_v42, %v10359_v29  ;;  %v9056_v29 = vcombine.low %v827_v38, %v831_v39 }
 0x1e2   :  { %6777 = vmatpush1.bf16.msra.mxu0 %v8912_v44  ;;  %v410_v44 = vunpack.c.l.s4 %v10225_v43 }
 0x1e3   :  { %6778 = vmatprep.subr.bf16.mxu0 %v8905_v45  ;;  %v412_v45 = vlaneseq }
 0x1e5   :  { %v10365_v50 = vshrl.u32 %v412_v45, 7  ;;  %v9200_v45 = vcombine.low %v971_v15, %v975_v16  ;;  %v927_v15 = vld [vmem:[#allocation7 + $0xc20] sm:$0xff] }
 0x1e6   :  { %6779 = vmatpush1.bf16.msra.mxu0 %v8904_v48 }
 0x1e7   :  { %6780 = vmatprep.subr.bf16.mxu0 %v8897_v49  ;;  %v411_v49 = vunpack.c.0.s8 %v410_v44  ;;  %v9065_v44 = vcombine.high %v835_v28, %v839_v30 }
 0x1ea   :  { %6781 = vmatpush1.bf16.msra.mxu0 %v8896_v52 }
 0x1eb   :  { %6782 = vmatprep.subr.bf16.mxu0 %v9017_v53 }
 0x1ee   :  { %6783 = vmatpush2.bf16.msra.mxu0 %v9016_v56  ;;  %v414_v56 = vsub.s32 %v411_v49, %v10365_v50  ;;  %v9057_v49 = vcombine.high %v827_v38, %v831_v39  ;;  %v1035_v38 = vld [vmem:[#allocation7 + $0xf80] sm:$0xff] }
 0x1ef   :  { %6784 = vmatprep.subr.bf16.mxu0 %v9009_v57  ;;  %v1039_v39 = vld [vmem:[#allocation7 + $0xfa0] sm:$0xff] }
 0x1f2   :  { %6785 = vmatpush2.bf16.msra.mxu0 %v9008_v60 }
 0x1f3   :  { %6786 = vmatprep.subr.bf16.mxu0 %v9001_v61 }
 0x1f6   :  { %6787 = vmatpush2.bf16.msra.mxu0 %v9000_v0 }
 0x1f7   :  { %6788 = vmatprep.subr.bf16.mxu0 %v8993_v1 }
 0x1fa   :  { %6789 = vmatpush2.bf16.msra.mxu0 %v8992_v2 }
 0x1fb   :  { %6790 = vmatprep.subr.bf16.mxu0 %v8985_v9 }
 0x1fe   :  { %6791 = vmatpush2.bf16.msra.mxu0 %v8984_v10  ;;  %v843_v10 = vld [vmem:[#allocation7 + $0x980] sm:$0xff] }
 0x1ff   :  { %6792 = vmatprep.subr.bf16.mxu0 %v8977_v17 }
 0x202   :  { %6793 = vmatpush2.bf16.msra.mxu0 %v8976_v18 }
 0x203   :  { %6794 = vmatprep.subr.bf16.mxu0 %v8969_v25  ;;  %v9073_v25 = vcombine.high %v843_v10, %v847_v14 }
 0x206   :  { %6795 = vmatpush2.bf16.msra.mxu0 %v8968_v26 }
 0x207   :  { %6796 = vmatprep.subr.bf16.mxu0 %v8961_v36 }
 0x20a   :  { %6797 = vmatpush2.bf16.msra.mxu0 %v8960_v37  ;;  %v9072_v37 = vcombine.low %v843_v10, %v847_v14  ;;  %v795_v10 = vld [vmem:[#allocation7 + $0x800] sm:$0xff] }
 0x20b   :  { %6848 = vmatprep.subr.bf16.mxu0 %v9209_v32  ;;  %v967_v32 = vld [vmem:[#allocation7 + $0xd60] sm:$0xff] }
 0x20c   :  { %v923_v14 = vld [vmem:[#allocation7 + $0xc00] sm:$0xff] }
 0x28d   :  { %v9952_v47 = vpop.f32.mrf.mxu0 }
 0x28e   :  { %v393_v48 = vadd.f32 %v9952_v47, %v8765_v46  ;;  %v955_v47 = vld [vmem:[#allocation7 + $0xd00] sm:$0xff] }
 0x28f   :  { %v384_v51 = vpop.f32.mrf.mxu0 }
 0x290   :  { %v385_v52 = vadd.f32 %v8765_v46, %v384_v51  ;;  %v401_v54 = vmax.f32 %v393_v48, 0.0  ;;  %v959_v48 = vld [vmem:[#allocation7 + $0xd20] sm:$0xff]  ;;  %v9192_v51 = vcombine.low %v963_v40, %v967_v32 }
 0x291   :  { %v9953_v53 = vpop.f32.mrf.mxu0  ;;  %v9185_v42 = vcombine.high %v955_v47, %v959_v48 }
 0x292   :  { %v399_v55 = vmax.f32 %v385_v52, 0.0  ;;  %v396_v57 = vadd.f32 %v9953_v53, %v8765_v46  ;;  %v819_v52 = vld [vmem:[#allocation7 + $0x8c0] sm:$0xff] }
 0x293   :  { %v387_v58 = vpop.f32.mrf.mxu0  ;;  %v823_v53 = vld [vmem:[#allocation7 + $0x8e0] sm:$0xff] }
 0x294   :  { %v407_v59 = vcombine.low %v399_v55, %v401_v54  ;;  %v408_v60 = vcombine.high %v399_v55, %v401_v54  ;;  %v388_v61 = vadd.f32 %v8765_v46, %v387_v58  ;;  %v402_v1 = vmax.f32 %v396_v57, 0.0  ;;  %v951_v54 = vld [vmem:[#allocation7 + $0xce0] sm:$0xff] }
 0x295   :  { %v9064_v46 = vcombine.low %v835_v28, %v839_v30  ;;  %v9049_v55 = vcombine.high %v819_v52, %v823_v53  ;;  %v811_v57 = vld [vmem:[#allocation7 + $0x880] sm:$0xff] }
 0x296   :  { %v415_v62 = vrot.slane %v407_v59, %v414_v56  ;;  %v422_v63 = vrot.slane %v408_v60, %v414_v56  ;;  %v400_v0 = vmax.f32 %v388_v61, 0.0  ;;  %v815_v58 = vld [vmem:[#allocation7 + $0x8a0] sm:$0xff]  ;;  %v9048_v60 = vcombine.low %v819_v52, %v823_v53 }
 0x297   :  { %v939_v61 = vld [vmem:[#allocation7 + $0xc80] sm:$0xff] }
 0x298   :  { %v423_v2 = vcombine.high %v415_v62, %v415_v62  ;;  %v424_v3 = vcombine.high %v422_v63, %v422_v63  ;;  %v431_v4 = vrot.slane %v415_v62, %v414_v56  ;;  %v10368_v5 = vrot.slane %v422_v63, %v414_v56  ;;  %v943_v62 = vld [vmem:[#allocation7 + $0xca0] sm:$0xff] }
 0x299   :  { %v457_v6 = vcombine.low %v400_v0, %v402_v1  ;;  %v458_v7 = vcombine.high %v400_v0, %v402_v1  ;;  %v9041_v63 = vcombine.high %v811_v57, %v815_v58  ;;  %v803_v1 = vld [vmem:[#allocation7 + $0x840] sm:$0xff] }
 0x29a   :  { %v445_v8 = vrot.slane %v423_v2, %v414_v56  ;;  %v452_v9 = vrot.slane %v424_v3, %v414_v56  ;;  %v453_v13 = vcombine.high %v431_v4, %v431_v4  ;;  %v10372_v18 = vpack.c.bf16 %v431_v4, %v431_v4  ;;  %v807_v2 = vld [vmem:[#allocation7 + $0x860] sm:$0xff] }
 0x29b   :  { %v465_v11 = vrot.slane %v457_v6, %v414_v56  ;;  %v472_v12 = vrot.slane %v458_v7, %v414_v56  ;;  %v9169_v3 = vcombine.high %v939_v61, %v943_v62  ;;  %v9040_v4 = vcombine.low %v811_v57, %v815_v58  ;;  %v931_v6 = vld [vmem:[#allocation7 + $0xc40] sm:$0xff] }
 0x29c   :  { %v10370_v17 = vpack.c.bf16 %v445_v8, %v445_v8  ;;  %v455_v19 = vcombine.high %v445_v8, %v445_v8  ;;  %v456_v26 = vcombine.high %v452_v9, %v452_v9  ;;  %v10386_v34 = vpack.c.bf16 %v452_v9, %v452_v9  ;;  %v935_v7 = vld [vmem:[#allocation7 + $0xc60] sm:$0xff] }
 0x29d   :  { %v473_v20 = vcombine.high %v465_v11, %v465_v11  ;;  %v474_v21 = vcombine.high %v472_v12, %v472_v12  ;;  %v10374_v22 = vrot.slane %v465_v11, %v414_v56  ;;  %v10376_v23 = vrot.slane %v472_v12, %v414_v56  ;;  %v799_v11 = vld [vmem:[#allocation7 + $0x820] sm:$0xff] }
 0x29e   :  { %6757 = vmatprep.mubr.bf16.mxu1 %v10370_v17  ;;  %v10379_v24 = vpack.c.bf16 %v455_v19, %v455_v19  ;;  %v10388_v36 = vpack.c.bf16 %v453_v13, %v453_v13  ;;  %v10396_v43 = vpack.c.bf16 %v456_v26, %v456_v26  ;;  %v9033_v8 = vcombine.high %v803_v1, %v807_v2  ;;  %v1047_v28 = vld [vmem:[#allocation7 + $0xfe0] sm:$0xff] }
 0x29f   :  { %v10381_v31 = vrot.slane %v473_v20, %v414_v56  ;;  %v10383_v33 = vrot.slane %v474_v21, %v414_v56  ;;  %6758 = vmatmul.mubr.bf16.vlgmr.msra.gmra.mxu1 %v10372_v18  ;;  %v9184_v56 = vcombine.low %v955_v47, %v959_v48  ;;  %v9168_v9 = vcombine.low %v939_v61, %v943_v62  ;;  %v915_v20 = vld [vmem:[#allocation7 + $0xbc0] sm:$0xff] }
 0x2a0   :  { %6808 = vmatpush1.bf16.msra.mxu1 %v9080_v41  ;;  %6798 = vmatprep.mubr.bf16.mxu0 %v10379_v24  ;;  %v9193_v41 = vcombine.high %v963_v40, %v967_v32  ;;  %v9161_v12 = vcombine.high %v931_v6, %v935_v7  ;;  %v9032_v13 = vcombine.low %v803_v1, %v807_v2  ;;  %v919_v21 = vld [vmem:[#allocation7 + $0xbe0] sm:$0xff] }
 0x2a1   :  { %6839 = vmatprep.mubr.bf16.mxu1 %v10386_v34  ;;  %6799 = vmatmul.mubr.bf16.vlgmr.msra.gmra.mxu0 %v10388_v36  ;;  %v9025_v16 = vcombine.high %v795_v10, %v799_v11  ;;  %v9160_v19 = vcombine.low %v931_v6, %v935_v7  ;;  %v9024_v26 = vcombine.low %v795_v10, %v799_v11  ;;  %v907_v40 = vld [vmem:[#allocation7 + $0xb80] sm:$0xff] }
 0x2a2   :  { %6849 = vmatpush1.bf16.msra.mxu0 %v9208_v35  ;;  %6809 = vmatprep.subr.bf16.mxu1 %v9073_v25  ;;  %v947_v35 = vld [vmem:[#allocation7 + $0xcc0] sm:$0xff]  ;;  %v9153_v25 = vcombine.high %v923_v14, %v927_v15  ;;  %v9145_v30 = vcombine.high %v915_v20, %v919_v21 }
 0x2a3   :  { %6880 = vmatprep.mubr.bf16.mxu0 %v10396_v43  ;;  %6850 = vmatprep.subr.bf16.mxu0 %v9201_v27  ;;  %v9177_v59 = vcombine.high %v947_v35, %v951_v54  ;;  %v9176_v0 = vcombine.low %v947_v35, %v951_v54  ;;  %v1043_v27 = vld [vmem:[#allocation7 + $0xfc0] sm:$0xff] }
 0x2a4   :  { %6810 = vmatpush1.bf16.msra.mxu1 %v9072_v37  ;;  %v9152_v37 = vcombine.low %v923_v14, %v927_v15  ;;  %v911_v32 = vld [vmem:[#allocation7 + $0xba0] sm:$0xff] }
 0x2a5   :  { %6811 = vmatprep.subr.bf16.mxu1 %v9065_v44  ;;  %v9273_v44 = vcombine.high %v1043_v27, %v1047_v28  ;;  %v899_v47 = vld [vmem:[#allocation7 + $0xb40] sm:$0xff] }
 0x2a6   :  { %6851 = vmatpush1.bf16.msra.mxu0 %v9200_v45  ;;  %v9144_v45 = vcombine.low %v915_v20, %v919_v21  ;;  %v903_v48 = vld [vmem:[#allocation7 + $0xb60] sm:$0xff] }
 0x2a7   :  { %6852 = vmatprep.subr.bf16.mxu0 %v9193_v41  ;;  %v9137_v41 = vcombine.high %v907_v40, %v911_v32  ;;  %v1027_v52 = vld [vmem:[#allocation7 + $0xf40] sm:$0xff] }
 0x2a8   :  { %6812 = vmatpush1.bf16.msra.mxu1 %v9064_v46  ;;  %v9272_v46 = vcombine.low %v1043_v27, %v1047_v28  ;;  %v1031_v53 = vld [vmem:[#allocation7 + $0xf60] sm:$0xff] }
 0x2a9   :  { %6813 = vmatprep.subr.bf16.mxu1 %v9057_v49  ;;  %v9265_v49 = vcombine.high %v1035_v38, %v1039_v39  ;;  %v891_v35 = vld [vmem:[#allocation7 + $0xb00] sm:$0xff] }
 0x2aa   :  { %6853 = vmatpush1.bf16.msra.mxu0 %v9192_v51  ;;  %v9136_v51 = vcombine.low %v907_v40, %v911_v32  ;;  %v895_v54 = vld [vmem:[#allocation7 + $0xb20] sm:$0xff] }
 0x2ab   :  { %6854 = vmatprep.subr.bf16.mxu0 %v9185_v42  ;;  %v9129_v42 = vcombine.high %v899_v47, %v903_v48  ;;  %v1019_v57 = vld [vmem:[#allocation7 + $0xf00] sm:$0xff] }
 0x2ac   :  { %6814 = vmatpush1.bf16.msra.mxu1 %v9056_v29  ;;  %v9264_v29 = vcombine.low %v1035_v38, %v1039_v39  ;;  %v1023_v58 = vld [vmem:[#allocation7 + $0xf20] sm:$0xff] }
 0x2ad   :  { %6815 = vmatprep.subr.bf16.mxu1 %v9049_v55  ;;  %v9257_v55 = vcombine.high %v1027_v52, %v1031_v53  ;;  %v883_v61 = vld [vmem:[#allocation7 + $0xac0] sm:$0xff] }
 0x2ae   :  { %6855 = vmatpush1.bf16.msra.mxu0 %v9184_v56  ;;  %v9128_v56 = vcombine.low %v899_v47, %v903_v48  ;;  %v887_v62 = vld [vmem:[#allocation7 + $0xae0] sm:$0xff] }
 0x2af   :  { %6856 = vmatprep.subr.bf16.mxu0 %v9177_v59  ;;  %v9121_v59 = vcombine.high %v891_v35, %v895_v54  ;;  %v1011_v1 = vld [vmem:[#allocation7 + $0xec0] sm:$0xff] }
 0x2b0   :  { %6816 = vmatpush1.bf16.msra.mxu1 %v9048_v60  ;;  %v9256_v60 = vcombine.low %v1027_v52, %v1031_v53  ;;  %v1015_v2 = vld [vmem:[#allocation7 + $0xee0] sm:$0xff] }
 0x2b1   :  { %6817 = vmatprep.subr.bf16.mxu1 %v9041_v63  ;;  %v9249_v63 = vcombine.high %v1019_v57, %v1023_v58  ;;  %v875_v6 = vld [vmem:[#allocation7 + $0xa80] sm:$0xff] }
 0x2b2   :  { %6857 = vmatpush1.bf16.msra.mxu0 %v9176_v0  ;;  %v9120_v0 = vcombine.low %v891_v35, %v895_v54  ;;  %v879_v7 = vld [vmem:[#allocation7 + $0xaa0] sm:$0xff]  ;;  %v505_v54 = vcombine.high %v10381_v31, %v10381_v31 }
 0x2b3   :  { %6858 = vmatprep.subr.bf16.mxu0 %v9169_v3  ;;  %v9113_v3 = vcombine.high %v883_v61, %v887_v62  ;;  %v1003_v10 = vld [vmem:[#allocation7 + $0xe80] sm:$0xff] }
 0x2b4   :  { %6818 = vmatpush1.bf16.msra.mxu1 %v9040_v4  ;;  %v9248_v4 = vcombine.low %v1019_v57, %v1023_v58  ;;  %v1007_v11 = vld [vmem:[#allocation7 + $0xea0] sm:$0xff]  ;;  %v10408_v57 = vpack.c.bf16 %v10368_v5, %v10368_v5 }
 0x2b5   :  { %6819 = vmatprep.subr.bf16.mxu1 %v9033_v8  ;;  %v9241_v8 = vcombine.high %v1011_v1, %v1015_v2  ;;  %v867_v14 = vld [vmem:[#allocation7 + $0xa40] sm:$0xff] }
 0x2b6   :  { %6859 = vmatpush1.bf16.msra.mxu0 %v9168_v9  ;;  %v9112_v9 = vcombine.low %v883_v61, %v887_v62  ;;  %v871_v15 = vld [vmem:[#allocation7 + $0xa60] sm:$0xff] }
 0x2b7   :  { %6860 = vmatprep.subr.bf16.mxu0 %v9161_v12  ;;  %v9105_v12 = vcombine.high %v875_v6, %v879_v7  ;;  %v995_v20 = vld [vmem:[#allocation7 + $0xe40] sm:$0xff] }
 0x2b8   :  { %6820 = vmatpush1.bf16.msra.mxu1 %v9032_v13  ;;  %v9240_v13 = vcombine.low %v1011_v1, %v1015_v2  ;;  %v999_v21 = vld [vmem:[#allocation7 + $0xe60] sm:$0xff] }
 0x2b9   :  { %6821 = vmatprep.subr.bf16.mxu1 %v9025_v16  ;;  %v9233_v16 = vcombine.high %v1003_v10, %v1007_v11  ;;  %v859_v27 = vld [vmem:[#allocation7 + $0xa00] sm:$0xff] }
 0x2ba   :  { %6861 = vmatpush1.bf16.msra.mxu0 %v9160_v19  ;;  %v9104_v19 = vcombine.low %v875_v6, %v879_v7  ;;  %v863_v28 = vld [vmem:[#allocation7 + $0xa20] sm:$0xff] }
 0x2bb   :  { %6862 = vmatprep.subr.bf16.mxu0 %v9153_v25  ;;  %v9097_v25 = vcombine.high %v867_v14, %v871_v15  ;;  %v987_v40 = vld [vmem:[#allocation7 + $0xe00] sm:$0xff] }
 0x2bc   :  { %6822 = vmatpush1.bf16.msra.mxu1 %v9024_v26  ;;  %v9232_v26 = vcombine.low %v1003_v10, %v1007_v11  ;;  %v991_v32 = vld [vmem:[#allocation7 + $0xe20] sm:$0xff] }
 0x2bd   :  { %6823 = vmatprep.subr.bf16.mxu1 %v9145_v30  ;;  %v9225_v30 = vcombine.high %v995_v20, %v999_v21  ;;  %v1107_v38 = vld [vmem:[#allocation7 + $0x11c0] sm:$0xff] }
 0x2be   :  { %6863 = vmatpush1.bf16.msra.mxu0 %v9152_v37  ;;  %v9096_v37 = vcombine.low %v867_v14, %v871_v15  ;;  %v1111_v39 = vld [vmem:[#allocation7 + $0x11e0] sm:$0xff] }
 0x2bf   :  { %6864 = vmatprep.subr.bf16.mxu0 %v9273_v44  ;;  %v9089_v44 = vcombine.high %v859_v27, %v863_v28  ;;  %v1235_v47 = vld [vmem:[#allocation7 + $0x15c0] sm:$0xff]  ;;  %v9336_v35 = vcombine.low %v1107_v38, %v1111_v39 }
 0x2c0   :  { %6824 = vmatpush2.bf16.msra.mxu1 %v9144_v45  ;;  %v9224_v45 = vcombine.low %v995_v20, %v999_v21  ;;  %v1239_v48 = vld [vmem:[#allocation7 + $0x15e0] sm:$0xff] }
 0x2c1   :  { %6825 = vmatprep.subr.bf16.mxu1 %v9137_v41  ;;  %v9217_v41 = vcombine.high %v987_v40, %v991_v32  ;;  %v1099_v52 = vld [vmem:[#allocation7 + $0x1180] sm:$0xff] }
 0x2c2   :  { %6865 = vmatpush2.bf16.msra.mxu0 %v9272_v46  ;;  %v9088_v46 = vcombine.low %v859_v27, %v863_v28  ;;  %v1103_v53 = vld [vmem:[#allocation7 + $0x11a0] sm:$0xff] }
 0x2c3   :  { %6866 = vmatprep.subr.bf16.mxu0 %v9265_v49  ;;  %v9337_v49 = vcombine.high %v1107_v38, %v1111_v39  ;;  %v9329_v58 = vcombine.high %v1099_v52, %v1103_v53  ;;  %v1091_v61 = vld [vmem:[#allocation7 + $0x1140] sm:$0xff]  ;;  %v9328_v1 = vcombine.low %v1099_v52, %v1103_v53 }
 0x2c4   :  { %6826 = vmatpush2.bf16.msra.mxu1 %v9136_v51  ;;  %v9216_v51 = vcombine.low %v987_v40, %v991_v32  ;;  %v1095_v62 = vld [vmem:[#allocation7 + $0x1160] sm:$0xff] }
 0x2c5   :  { %6827 = vmatprep.subr.bf16.mxu1 %v9129_v42  ;;  %v454_v42 = vcombine.high %v10368_v5, %v10368_v5  ;;  %v10418_v5 = vpack.c.bf16 %v505_v54, %v505_v54  ;;  %v1219_v2 = vld [vmem:[#allocation7 + $0x1540] sm:$0xff] }
 0x2c6   :  { %6867 = vmatpush2.bf16.msra.mxu0 %v9264_v29  ;;  %v9465_v29 = vcombine.high %v1235_v47, %v1239_v48  ;;  %v1083_v6 = vld [vmem:[#allocation7 + $0x1100] sm:$0xff] }
 0x2c7   :  { %6868 = vmatprep.subr.bf16.mxu0 %v9257_v55  ;;  %v1227_v55 = vld [vmem:[#allocation7 + $0x1580] sm:$0xff] }
 0x2c8   :  { %6828 = vmatpush2.bf16.msra.mxu1 %v9128_v56  ;;  %v1231_v56 = vld [vmem:[#allocation7 + $0x15a0] sm:$0xff] }
 0x2c9   :  { %6829 = vmatprep.subr.bf16.mxu1 %v9121_v59  ;;  %v10412_v59 = vpack.c.bf16 %v10381_v31, %v10381_v31  ;;  %v9321_v31 = vcombine.high %v1091_v61, %v1095_v62  ;;  %v1087_v7 = vld [vmem:[#allocation7 + $0x1120] sm:$0xff] }
 0x2ca   :  { %6869 = vmatpush2.bf16.msra.mxu0 %v9256_v60  ;;  %v9464_v60 = vcombine.low %v1235_v47, %v1239_v48  ;;  %v1211_v10 = vld [vmem:[#allocation7 + $0x1500] sm:$0xff] }
 0x2cb   :  { %6870 = vmatprep.subr.bf16.mxu0 %v9249_v63  ;;  %v10415_v63 = vpack.c.bf16 %v454_v42, %v454_v42  ;;  %v1215_v11 = vld [vmem:[#allocation7 + $0x1520] sm:$0xff] }
 0x2cc   :  { %6830 = vmatpush2.bf16.msra.mxu1 %v9120_v0  ;;  %v9457_v0 = vcombine.high %v1227_v55, %v1231_v56  ;;  %v1075_v14 = vld [vmem:[#allocation7 + $0x10c0] sm:$0xff] }
 0x2cd   :  { %6831 = vmatprep.subr.bf16.mxu1 %v9113_v3  ;;  %v1223_v3 = vld [vmem:[#allocation7 + $0x1560] sm:$0xff] }
 0x2ce   :  { %6871 = vmatpush2.bf16.msra.mxu0 %v9248_v4  ;;  %v9456_v4 = vcombine.low %v1227_v55, %v1231_v56  ;;  %v1079_v15 = vld [vmem:[#allocation7 + $0x10e0] sm:$0xff] }
 0x2cf   :  { %6872 = vmatprep.subr.bf16.mxu0 %v9241_v8  ;;  %v9449_v8 = vcombine.high %v1219_v2, %v1223_v3  ;;  %v1203_v20 = vld [vmem:[#allocation7 + $0x14c0] sm:$0xff] }
 0x2d0   :  { %6832 = vmatpush2.bf16.msra.mxu1 %v9112_v9  ;;  %v9320_v9 = vcombine.low %v1091_v61, %v1095_v62  ;;  %v1207_v21 = vld [vmem:[#allocation7 + $0x14e0] sm:$0xff] }
 0x2d1   :  { %6833 = vmatprep.subr.bf16.mxu1 %v9105_v12  ;;  %v9313_v12 = vcombine.high %v1083_v6, %v1087_v7  ;;  %v1067_v27 = vld [vmem:[#allocation7 + $0x1080] sm:$0xff] }
 0x2d2   :  { %6873 = vmatpush2.bf16.msra.mxu0 %v9240_v13  ;;  %v9448_v13 = vcombine.low %v1219_v2, %v1223_v3  ;;  %v1071_v28 = vld [vmem:[#allocation7 + $0x10a0] sm:$0xff] }
 0x2d3   :  { %6874 = vmatprep.subr.bf16.mxu0 %v9233_v16  ;;  %v9441_v16 = vcombine.high %v1211_v10, %v1215_v11  ;;  %v1195_v40 = vld [vmem:[#allocation7 + $0x1480] sm:$0xff] }
 0x2d4   :  { %6834 = vmatpush2.bf16.msra.mxu1 %v9104_v19  ;;  %v9312_v19 = vcombine.low %v1083_v6, %v1087_v7  ;;  %v1199_v32 = vld [vmem:[#allocation7 + $0x14a0] sm:$0xff] }
 0x2d5   :  { %6835 = vmatprep.subr.bf16.mxu1 %v9097_v25  ;;  %v9305_v25 = vcombine.high %v1075_v14, %v1079_v15  ;;  %v1059_v38 = vld [vmem:[#allocation7 + $0x1040] sm:$0xff] }
 0x2d6   :  { %6875 = vmatpush2.bf16.msra.mxu0 %v9232_v26  ;;  %v9440_v26 = vcombine.low %v1211_v10, %v1215_v11  ;;  %v1063_v39 = vld [vmem:[#allocation7 + $0x1060] sm:$0xff] }
 0x2d7   :  { %6876 = vmatprep.subr.bf16.mxu0 %v9225_v30  ;;  %v9433_v30 = vcombine.high %v1203_v20, %v1207_v21  ;;  %v1187_v47 = vld [vmem:[#allocation7 + $0x1440] sm:$0xff] }
 0x2d8   :  { %6836 = vmatpush2.bf16.msra.mxu1 %v9096_v37  ;;  %v9304_v37 = vcombine.low %v1075_v14, %v1079_v15  ;;  %v1191_v48 = vld [vmem:[#allocation7 + $0x1460] sm:$0xff] }
 0x2d9   :  { %6837 = vmatprep.subr.bf16.mxu1 %v9089_v44  ;;  %v9297_v44 = vcombine.high %v1067_v27, %v1071_v28  ;;  %v1051_v52 = vld [vmem:[#allocation7 + $0x1000] sm:$0xff]  ;;  %v9417_v42 = vcombine.high %v1187_v47, %v1191_v48  ;;  %v9416_v56 = vcombine.low %v1187_v47, %v1191_v48 }
 0x2da   :  { %6877 = vmatpush2.bf16.msra.mxu0 %v9224_v45  ;;  %v9432_v45 = vcombine.low %v1203_v20, %v1207_v21  ;;  %v1055_v53 = vld [vmem:[#allocation7 + $0x1020] sm:$0xff] }
 0x2db   :  { %6878 = vmatprep.subr.bf16.mxu0 %v9217_v41  ;;  %v9425_v41 = vcombine.high %v1195_v40, %v1199_v32  ;;  %v1183_v54 = vld [vmem:[#allocation7 + $0x1420] sm:$0xff]  ;;  %v9281_v55 = vcombine.high %v1051_v52, %v1055_v53  ;;  %v9280_v62 = vcombine.low %v1051_v52, %v1055_v53 }
 0x2dc   :  { %6838 = vmatpush2.bf16.msra.mxu1 %v9088_v46  ;;  %v9296_v46 = vcombine.low %v1067_v27, %v1071_v28 }
 0x2dd   :  { %6889 = vmatprep.subr.bf16.mxu1 %v9337_v49  ;;  %v9289_v49 = vcombine.high %v1059_v38, %v1063_v39 }
 0x2de   :  { %6879 = vmatpush2.bf16.msra.mxu0 %v9216_v51  ;;  %v9424_v51 = vcombine.low %v1195_v40, %v1199_v32 }
 0x2df   :  { %6840 = vmatmul.mubr.bf16.vlgmr.msra.gmra.mxu1 %v10408_v57  ;;  %6930 = vmatprep.subr.bf16.mxu0 %v9465_v29  ;;  %v9288_v29 = vcombine.low %v1059_v38, %v1063_v39 }
 0x2e0   :  { %6890 = vmatpush1.bf16.msra.mxu1 %v9336_v35  ;;  %6921 = vmatprep.mubr.bf16.mxu1 %v10412_v59  ;;  %v1179_v35 = vld [vmem:[#allocation7 + $0x1400] sm:$0xff] }
 0x2e1   :  { %6881 = vmatmul.mubr.bf16.vlgmr.msra.gmra.mxu0 %v10415_v63  ;;  %6891 = vmatprep.subr.bf16.mxu1 %v9329_v58  ;;  %v1171_v58 = vld [vmem:[#allocation7 + $0x13c0] sm:$0xff]  ;;  %v9409_v61 = vcombine.high %v1179_v35, %v1183_v54  ;;  %v9408_v3 = vcombine.low %v1179_v35, %v1183_v54 }
 0x2e2   :  { %6931 = vmatpush1.bf16.msra.mxu0 %v9464_v60  ;;  %6962 = vmatprep.mubr.bf16.mxu0 %v10418_v5  ;;  %v1175_v60 = vld [vmem:[#allocation7 + $0x13e0] sm:$0xff] }
 0x2e3   :  { %6932 = vmatprep.subr.bf16.mxu0 %v9457_v0  ;;  %v1299_v0 = vld [vmem:[#allocation7 + $0x17c0] sm:$0xff]  ;;  %v9401_v2 = vcombine.high %v1171_v58, %v1175_v60  ;;  %v9400_v7 = vcombine.low %v1171_v58, %v1175_v60 }
 0x2e4   :  { %6892 = vmatpush1.bf16.msra.mxu1 %v9328_v1  ;;  %v1303_v1 = vld [vmem:[#allocation7 + $0x17e0] sm:$0xff] }
 0x2e5   :  { %6893 = vmatprep.subr.bf16.mxu1 %v9321_v31  ;;  %v1163_v31 = vld [vmem:[#allocation7 + $0x1380] sm:$0xff]  ;;  %v9529_v6 = vcombine.high %v1299_v0, %v1303_v1  ;;  %v9528_v11 = vcombine.low %v1299_v0, %v1303_v1 }
 0x2e6   :  { %6933 = vmatpush1.bf16.msra.mxu0 %v9456_v4  ;;  %v1167_v4 = vld [vmem:[#allocation7 + $0x13a0] sm:$0xff] }
 0x2e7   :  { %6934 = vmatprep.subr.bf16.mxu0 %v9449_v8  ;;  %v1291_v8 = vld [vmem:[#allocation7 + $0x1780] sm:$0xff]  ;;  %v9393_v10 = vcombine.high %v1163_v31, %v1167_v4  ;;  %v9392_v15 = vcombine.low %v1163_v31, %v1167_v4 }
 0x2e8   :  { %6894 = vmatpush1.bf16.msra.mxu1 %v9320_v9  ;;  %v1295_v9 = vld [vmem:[#allocation7 + $0x17a0] sm:$0xff] }
 0x2e9   :  { %6895 = vmatprep.subr.bf16.mxu1 %v9313_v12  ;;  %v1155_v12 = vld [vmem:[#allocation7 + $0x1340] sm:$0xff]  ;;  %v9521_v14 = vcombine.high %v1291_v8, %v1295_v9  ;;  %v9520_v21 = vcombine.low %v1291_v8, %v1295_v9 }
 0x2ea   :  { %6935 = vmatpush1.bf16.msra.mxu0 %v9448_v13  ;;  %v1159_v13 = vld [vmem:[#allocation7 + $0x1360] sm:$0xff] }
 0x2eb   :  { %6936 = vmatprep.subr.bf16.mxu0 %v9441_v16  ;;  %v1283_v16 = vld [vmem:[#allocation7 + $0x1740] sm:$0xff]  ;;  %v9385_v20 = vcombine.high %v1155_v12, %v1159_v13  ;;  %v9384_v28 = vcombine.low %v1155_v12, %v1159_v13 }
 0x2ec   :  { %6896 = vmatpush1.bf16.msra.mxu1 %v9312_v19  ;;  %v1287_v19 = vld [vmem:[#allocation7 + $0x1760] sm:$0xff] }
 0x2ed   :  { %6897 = vmatprep.subr.bf16.mxu1 %v9305_v25  ;;  %v1147_v25 = vld [vmem:[#allocation7 + $0x1300] sm:$0xff]  ;;  %v9513_v27 = vcombine.high %v1283_v16, %v1287_v19  ;;  %v9512_v32 = vcombine.low %v1283_v16, %v1287_v19 }
 0x2ee   :  { %6937 = vmatpush1.bf16.msra.mxu0 %v9440_v26  ;;  %v1151_v26 = vld [vmem:[#allocation7 + $0x1320] sm:$0xff] }
 0x2ef   :  { %6938 = vmatprep.subr.bf16.mxu0 %v9433_v30  ;;  %v1275_v30 = vld [vmem:[#allocation7 + $0x1700] sm:$0xff]  ;;  %v9377_v40 = vcombine.high %v1147_v25, %v1151_v26  ;;  %v9376_v39 = vcombine.low %v1147_v25, %v1151_v26  ;;  %v503_v25 = vcombine.high %v10374_v22, %v10374_v22 }
 0x2f0   :  { %6898 = vmatpush1.bf16.msra.mxu1 %v9304_v37  ;;  %v1279_v37 = vld [vmem:[#allocation7 + $0x1720] sm:$0xff] }
 0x2f1   :  { %6899 = vmatprep.subr.bf16.mxu1 %v9297_v44  ;;  %v1139_v44 = vld [vmem:[#allocation7 + $0x12c0] sm:$0xff]  ;;  %v9505_v38 = vcombine.high %v1275_v30, %v1279_v37  ;;  %v9504_v48 = vcombine.low %v1275_v30, %v1279_v37 }
 0x2f2   :  { %6939 = vmatpush1.bf16.msra.mxu0 %v9432_v45  ;;  %v1143_v45 = vld [vmem:[#allocation7 + $0x12e0] sm:$0xff] }
 0x2f3   :  { %6940 = vmatprep.subr.bf16.mxu0 %v9425_v41  ;;  %v1267_v41 = vld [vmem:[#allocation7 + $0x16c0] sm:$0xff]  ;;  %v9369_v47 = vcombine.high %v1139_v44, %v1143_v45  ;;  %v9368_v53 = vcombine.low %v1139_v44, %v1143_v45  ;;  %v10432_v44 = vpack.c.bf16 %v10383_v33, %v10383_v33 }
 0x2f4   :  { %6900 = vmatpush1.bf16.msra.mxu1 %v9296_v46  ;;  %v1271_v46 = vld [vmem:[#allocation7 + $0x16e0] sm:$0xff] }
 0x2f5   :  { %6901 = vmatprep.subr.bf16.mxu1 %v9289_v49  ;;  %v1131_v49 = vld [vmem:[#allocation7 + $0x1280] sm:$0xff]  ;;  %v9497_v52 = vcombine.high %v1267_v41, %v1271_v46  ;;  %v9496_v54 = vcombine.low %v1267_v41, %v1271_v46  ;;  %v10435_v41 = vpack.c.bf16 %v503_v25, %v503_v25 }
 0x2f6   :  { %6941 = vmatpush1.bf16.msra.mxu0 %v9424_v51  ;;  %v1135_v51 = vld [vmem:[#allocation7 + $0x12a0] sm:$0xff] }
 0x2f7   :  { %6942 = vmatprep.subr.bf16.mxu0 %v9417_v42  ;;  %v1259_v42 = vld [vmem:[#allocation7 + $0x1680] sm:$0xff]  ;;  %v9361_v35 = vcombine.high %v1131_v49, %v1135_v51  ;;  %v9360_v60 = vcombine.low %v1131_v49, %v1135_v51 }
 0x2f8   :  { %6902 = vmatpush1.bf16.msra.mxu1 %v9288_v29  ;;  %v1263_v29 = vld [vmem:[#allocation7 + $0x16a0] sm:$0xff] }
 0x2f9   :  { %6903 = vmatprep.subr.bf16.mxu1 %v9281_v55  ;;  %v1123_v55 = vld [vmem:[#allocation7 + $0x1240] sm:$0xff]  ;;  %v9489_v58 = vcombine.high %v1259_v42, %v1263_v29  ;;  %v9488_v1 = vcombine.low %v1259_v42, %v1263_v29 }
 0x2fa   :  { %6943 = vmatpush1.bf16.msra.mxu0 %v9416_v56  ;;  %v1127_v56 = vld [vmem:[#allocation7 + $0x1260] sm:$0xff] }
 0x2fb   :  { %6944 = vmatprep.subr.bf16.mxu0 %v9409_v61  ;;  %v1251_v61 = vld [vmem:[#allocation7 + $0x1640] sm:$0xff]  ;;  %v9353_v0 = vcombine.high %v1123_v55, %v1127_v56  ;;  %v9352_v4 = vcombine.low %v1123_v55, %v1127_v56 }
 0x2fc   :  { %6904 = vmatpush1.bf16.msra.mxu1 %v9280_v62  ;;  %v1255_v62 = vld [vmem:[#allocation7 + $0x1660] sm:$0xff] }
 0x2fd   :  { %6905 = vmatprep.subr.bf16.mxu1 %v9401_v2  ;;  %v1115_v2 = vld [vmem:[#allocation7 + $0x1200] sm:$0xff]  ;;  %v9481_v31 = vcombine.high %v1251_v61, %v1255_v62  ;;  %v9480_v9 = vcombine.low %v1251_v61, %v1255_v62 }
 0x2fe   :  { %6945 = vmatpush1.bf16.msra.mxu0 %v9408_v3  ;;  %v1119_v3 = vld [vmem:[#allocation7 + $0x1220] sm:$0xff] }
 0x2ff   :  { %6946 = vmatprep.subr.bf16.mxu0 %v9529_v6  ;;  %v1243_v6 = vld [vmem:[#allocation7 + $0x1600] sm:$0xff]  ;;  %v9345_v8 = vcombine.high %v1115_v2, %v1119_v3  ;;  %v9344_v13 = vcombine.low %v1115_v2, %v1119_v3 }
 0x300   :  { %6906 = vmatpush2.bf16.msra.mxu1 %v9400_v7  ;;  %v1247_v7 = vld [vmem:[#allocation7 + $0x1620] sm:$0xff] }
 0x301   :  { %6907 = vmatprep.subr.bf16.mxu1 %v9393_v10  ;;  %v1363_v10 = vld [vmem:[#allocation7 + $0x19c0] sm:$0xff]  ;;  %v9473_v12 = vcombine.high %v1243_v6, %v1247_v7  ;;  %v9472_v19 = vcombine.low %v1243_v6, %v1247_v7 }
 0x302   :  { %6947 = vmatpush2.bf16.msra.mxu0 %v9528_v11  ;;  %v1367_v11 = vld [vmem:[#allocation7 + $0x19e0] sm:$0xff] }
 0x303   :  { %6948 = vmatprep.subr.bf16.mxu0 %v9521_v14  ;;  %v1491_v14 = vld [vmem:[#allocation7 + $0x1dc0] sm:$0xff]  ;;  %v9593_v16 = vcombine.high %v1363_v10, %v1367_v11 }
 0x304   :  { %6908 = vmatpush2.bf16.msra.mxu1 %v9392_v15  ;;  %v1495_v15 = vld [vmem:[#allocation7 + $0x1de0] sm:$0xff] }
 0x305   :  { %6909 = vmatprep.subr.bf16.mxu1 %v9385_v20  ;;  %v1355_v20 = vld [vmem:[#allocation7 + $0x1980] sm:$0xff]  ;;  %v9721_v26 = vcombine.high %v1491_v14, %v1495_v15  ;;  %v9720_v45 = vcombine.low %v1491_v14, %v1495_v15 }
 0x306   :  { %6949 = vmatpush2.bf16.msra.mxu0 %v9520_v21  ;;  %v1359_v21 = vld [vmem:[#allocation7 + $0x19a0] sm:$0xff] }
 0x307   :  { %6950 = vmatprep.subr.bf16.mxu0 %v9513_v27  ;;  %v9592_v27 = vcombine.low %v1363_v10, %v1367_v11  ;;  %v1483_v30 = vld [vmem:[#allocation7 + $0x1d80] sm:$0xff] }
 0x308   :  { %6910 = vmatpush2.bf16.msra.mxu1 %v9384_v28  ;;  %v506_v28 = vcombine.high %v10383_v33, %v10383_v33  ;;  %v1487_v37 = vld [vmem:[#allocation7 + $0x1da0] sm:$0xff] }
 0x309   :  { %6911 = vmatprep.subr.bf16.mxu1 %v9377_v40  ;;  %v10428_v40 = vpack.c.bf16 %v10374_v22, %v10374_v22  ;;  %v9713_v46 = vcombine.high %v1483_v30, %v1487_v37  ;;  %v1479_v49 = vld [vmem:[#allocation7 + $0x1d60] sm:$0xff]  ;;  %v9712_v51 = vcombine.low %v1483_v30, %v1487_v37 }
 0x30a   :  { %6951 = vmatpush2.bf16.msra.mxu0 %v9512_v32  ;;  %v9585_v32 = vcombine.high %v1355_v20, %v1359_v21  ;;  %v10438_v22 = vpack.c.bf16 %v506_v28, %v506_v28  ;;  %v1307_v25 = vld [vmem:[#allocation7 + $0x1800] sm:$0xff] }
 0x30b   :  { %6952 = vmatprep.subr.bf16.mxu0 %v9505_v38  ;;  %v1347_v38 = vld [vmem:[#allocation7 + $0x1940] sm:$0xff] }
 0x30c   :  { %6912 = vmatpush2.bf16.msra.mxu1 %v9376_v39  ;;  %v1351_v39 = vld [vmem:[#allocation7 + $0x1960] sm:$0xff] }
 0x30d   :  { %6913 = vmatprep.subr.bf16.mxu1 %v9369_v47  ;;  %v9584_v47 = vcombine.low %v1355_v20, %v1359_v21  ;;  %v9577_v33 = vcombine.high %v1347_v38, %v1351_v39  ;;  %v9576_v29 = vcombine.low %v1347_v38, %v1351_v39  ;;  %v1435_v30 = vld [vmem:[#allocation7 + $0x1c00] sm:$0xff] }
 0x30e   :  { %6953 = vmatpush2.bf16.msra.mxu0 %v9504_v48  ;;  %v1475_v48 = vld [vmem:[#allocation7 + $0x1d40] sm:$0xff] }
 0x30f   :  { %6954 = vmatprep.subr.bf16.mxu0 %v9497_v52  ;;  %v1339_v52 = vld [vmem:[#allocation7 + $0x1900] sm:$0xff]  ;;  %v9705_v42 = vcombine.high %v1475_v48, %v1479_v49  ;;  %v9704_v56 = vcombine.low %v1475_v48, %v1479_v49 }
 0x310   :  { %6914 = vmatpush2.bf16.msra.mxu1 %v9368_v53  ;;  %v1343_v53 = vld [vmem:[#allocation7 + $0x1920] sm:$0xff] }
 0x311   :  { %6915 = vmatprep.subr.bf16.mxu1 %v9361_v35  ;;  %v1467_v35 = vld [vmem:[#allocation7 + $0x1d00] sm:$0xff]  ;;  %v9569_v55 = vcombine.high %v1339_v52, %v1343_v53  ;;  %v9568_v62 = vcombine.low %v1339_v52, %v1343_v53 }
 0x312   :  { %6955 = vmatpush2.bf16.msra.mxu0 %v9496_v54  ;;  %v1471_v54 = vld [vmem:[#allocation7 + $0x1d20] sm:$0xff] }
 0x313   :  { %6956 = vmatprep.subr.bf16.mxu0 %v9489_v58  ;;  %v1331_v58 = vld [vmem:[#allocation7 + $0x18c0] sm:$0xff]  ;;  %v9697_v61 = vcombine.high %v1467_v35, %v1471_v54  ;;  %v9696_v3 = vcombine.low %v1467_v35, %v1471_v54 }
 0x314   :  { %6916 = vmatpush2.bf16.msra.mxu1 %v9360_v60  ;;  %v1335_v60 = vld [vmem:[#allocation7 + $0x18e0] sm:$0xff] }
 0x315   :  { %6917 = vmatprep.subr.bf16.mxu1 %v9353_v0  ;;  %v1459_v0 = vld [vmem:[#allocation7 + $0x1cc0] sm:$0xff]  ;;  %v9561_v2 = vcombine.high %v1331_v58, %v1335_v60  ;;  %v9560_v7 = vcombine.low %v1331_v58, %v1335_v60 }
 0x316   :  { %6957 = vmatpush2.bf16.msra.mxu0 %v9488_v1  ;;  %v1463_v1 = vld [vmem:[#allocation7 + $0x1ce0] sm:$0xff] }
 0x317   :  { %6958 = vmatprep.subr.bf16.mxu0 %v9481_v31  ;;  %v1323_v31 = vld [vmem:[#allocation7 + $0x1880] sm:$0xff]  ;;  %v9689_v6 = vcombine.high %v1459_v0, %v1463_v1  ;;  %v9688_v11 = vcombine.low %v1459_v0, %v1463_v1 }
 0x318   :  { %6918 = vmatpush2.bf16.msra.mxu1 %v9352_v4  ;;  %v1327_v4 = vld [vmem:[#allocation7 + $0x18a0] sm:$0xff] }
 0x319   :  { %6919 = vmatprep.subr.bf16.mxu1 %v9345_v8  ;;  %v1451_v8 = vld [vmem:[#allocation7 + $0x1c80] sm:$0xff]  ;;  %v9553_v10 = vcombine.high %v1323_v31, %v1327_v4  ;;  %v9552_v15 = vcombine.low %v1323_v31, %v1327_v4 }
 0x31a   :  { %6959 = vmatpush2.bf16.msra.mxu0 %v9480_v9  ;;  %v1455_v9 = vld [vmem:[#allocation7 + $0x1ca0] sm:$0xff] }
 0x31b   :  { %6960 = vmatprep.subr.bf16.mxu0 %v9473_v12  ;;  %v1315_v12 = vld [vmem:[#allocation7 + $0x1840] sm:$0xff]  ;;  %v9681_v14 = vcombine.high %v1451_v8, %v1455_v9  ;;  %v9680_v21 = vcombine.low %v1451_v8, %v1455_v9 }
 0x31c   :  { %6920 = vmatpush2.bf16.msra.mxu1 %v9344_v13  ;;  %v1319_v13 = vld [vmem:[#allocation7 + $0x1860] sm:$0xff] }
 0x31d   :  { %6971 = vmatprep.subr.bf16.mxu1 %v9593_v16  ;;  %v1443_v16 = vld [vmem:[#allocation7 + $0x1c40] sm:$0xff]  ;;  %v9545_v20 = vcombine.high %v1315_v12, %v1319_v13  ;;  %v9544_v28 = vcombine.low %v1315_v12, %v1319_v13 }
 0x31e   :  { %6961 = vmatpush2.bf16.msra.mxu0 %v9472_v19  ;;  %v1447_v19 = vld [vmem:[#allocation7 + $0x1c60] sm:$0xff] }
 0x31f   :  { %6922 = vmatmul.mubr.bf16.vlgmr.msra.gmra.mxu1 %v10428_v40  ;;  %7012 = vmatprep.subr.bf16.mxu0 %v9721_v26  ;;  %v1311_v26 = vld [vmem:[#allocation7 + $0x1820] sm:$0xff] }
 0x320   :  { %6972 = vmatpush1.bf16.msra.mxu1 %v9592_v27  ;;  %7003 = vmatprep.mubr.bf16.mxu1 %v10432_v44  ;;  %v9673_v27 = vcombine.high %v1443_v16, %v1447_v19  ;;  %v1439_v37 = vld [vmem:[#allocation7 + $0x1c20] sm:$0xff] }
 0x321   :  { %6963 = vmatmul.mubr.bf16.vlgmr.msra.gmra.mxu0 %v10435_v41  ;;  %6973 = vmatprep.subr.bf16.mxu1 %v9585_v32  ;;  %v9537_v32 = vcombine.high %v1307_v25, %v1311_v26  ;;  %v1427_v38 = vld [vmem:[#allocation7 + $0x1bc0] sm:$0xff] }
 0x322   :  { %7013 = vmatpush1.bf16.msra.mxu0 %v9720_v45  ;;  %7044 = vmatprep.mubr.bf16.mxu0 %v10438_v22  ;;  %v9672_v45 = vcombine.low %v1443_v16, %v1447_v19  ;;  %v1431_v39 = vld [vmem:[#allocation7 + $0x1be0] sm:$0xff] }
 0x323   :  { %7014 = vmatprep.subr.bf16.mxu0 %v9713_v46  ;;  %v9665_v46 = vcombine.high %v1435_v30, %v1439_v37  ;;  %v1555_v48 = vld [vmem:[#allocation7 + $0x1fc0] sm:$0xff] }
 0x324   :  { %6974 = vmatpush1.bf16.msra.mxu1 %v9584_v47  ;;  %v9536_v47 = vcombine.low %v1307_v25, %v1311_v26  ;;  %v1559_v49 = vld [vmem:[#allocation7 + $0x1fe0] sm:$0xff] }
 0x325   :  { %6975 = vmatprep.subr.bf16.mxu1 %v9577_v33  ;;  %v9657_v33 = vcombine.high %v1427_v38, %v1431_v39  ;;  %v1419_v52 = vld [vmem:[#allocation7 + $0x1b80] sm:$0xff] }
 0x326   :  { %7015 = vmatpush1.bf16.msra.mxu0 %v9712_v51  ;;  %v9664_v51 = vcombine.low %v1435_v30, %v1439_v37  ;;  %v1423_v53 = vld [vmem:[#allocation7 + $0x1ba0] sm:$0xff] }
 0x327   :  { %7016 = vmatprep.subr.bf16.mxu0 %v9705_v42  ;;  %v9785_v42 = vcombine.high %v1555_v48, %v1559_v49  ;;  %v1547_v35 = vld [vmem:[#allocation7 + $0x1f80] sm:$0xff] }
 0x328   :  { %6976 = vmatpush1.bf16.msra.mxu1 %v9576_v29  ;;  %v9656_v29 = vcombine.low %v1427_v38, %v1431_v39  ;;  %v1551_v54 = vld [vmem:[#allocation7 + $0x1fa0] sm:$0xff] }
 0x329   :  { %6977 = vmatprep.subr.bf16.mxu1 %v9569_v55  ;;  %v9649_v55 = vcombine.high %v1419_v52, %v1423_v53  ;;  %v1411_v58 = vld [vmem:[#allocation7 + $0x1b40] sm:$0xff] }
 0x32a   :  { %7017 = vmatpush1.bf16.msra.mxu0 %v9704_v56  ;;  %v9784_v56 = vcombine.low %v1555_v48, %v1559_v49  ;;  %v1415_v60 = vld [vmem:[#allocation7 + $0x1b60] sm:$0xff] }
 0x32b   :  { %7018 = vmatprep.subr.bf16.mxu0 %v9697_v61  ;;  %v9777_v61 = vcombine.high %v1547_v35, %v1551_v54  ;;  %v1539_v0 = vld [vmem:[#allocation7 + $0x1f40] sm:$0xff] }
 0x32c   :  { %6978 = vmatpush1.bf16.msra.mxu1 %v9568_v62  ;;  %v9648_v62 = vcombine.low %v1419_v52, %v1423_v53  ;;  %v1543_v1 = vld [vmem:[#allocation7 + $0x1f60] sm:$0xff] }
 0x32d   :  { %6979 = vmatprep.subr.bf16.mxu1 %v9561_v2  ;;  %v9641_v2 = vcombine.high %v1411_v58, %v1415_v60  ;;  %v1403_v31 = vld [vmem:[#allocation7 + $0x1b00] sm:$0xff] }
 0x32e   :  { %7019 = vmatpush1.bf16.msra.mxu0 %v9696_v3  ;;  %v9776_v3 = vcombine.low %v1547_v35, %v1551_v54  ;;  %v1407_v4 = vld [vmem:[#allocation7 + $0x1b20] sm:$0xff] }
 0x32f   :  { %7020 = vmatprep.subr.bf16.mxu0 %v9689_v6  ;;  %v9769_v6 = vcombine.high %v1539_v0, %v1543_v1  ;;  %v1531_v8 = vld [vmem:[#allocation7 + $0x1f00] sm:$0xff] }
 0x330   :  { %6980 = vmatpush1.bf16.msra.mxu1 %v9560_v7  ;;  %v9640_v7 = vcombine.low %v1411_v58, %v1415_v60  ;;  %v1535_v9 = vld [vmem:[#allocation7 + $0x1f20] sm:$0xff]  ;;  %v596_v58 = vld [vmem:[#allocation7 + $0x1c8] sm:$0xff] }
 0x331   :  { %6981 = vmatprep.subr.bf16.mxu1 %v9553_v10  ;;  %v9633_v10 = vcombine.high %v1403_v31, %v1407_v4  ;;  %v1395_v12 = vld [vmem:[#allocation7 + $0x1ac0] sm:$0xff]  ;;  %v600_v60 = vld [vmem:[#allocation7 + $0x1e8] sm:$0xff] }
 0x332   :  { %7021 = vmatpush1.bf16.msra.mxu0 %v9688_v11  ;;  %v9768_v11 = vcombine.low %v1539_v0, %v1543_v1  ;;  %v1399_v13 = vld [vmem:[#allocation7 + $0x1ae0] sm:$0xff]  ;;  %v1567_v0 = vsub.s32 0, %v10365_v50  ;;  %v724_v1 = vld [vmem:[#allocation7 + $0x5c8] sm:$0xff] }
 0x333   :  { %7022 = vmatprep.subr.bf16.mxu0 %v9681_v14  ;;  %v9761_v14 = vcombine.high %v1531_v8, %v1535_v9  ;;  %v1523_v16 = vld [vmem:[#allocation7 + $0x1ec0] sm:$0xff] }
 0x334   :  { %6982 = vmatpush1.bf16.msra.mxu1 %v9552_v15  ;;  %v9632_v15 = vcombine.low %v1403_v31, %v1407_v4  ;;  %v1527_v19 = vld [vmem:[#allocation7 + $0x1ee0] sm:$0xff] }
 0x335   :  { %6983 = vmatprep.subr.bf16.mxu1 %v9545_v20  ;;  %v9625_v20 = vcombine.high %v1395_v12, %v1399_v13  ;;  %v1387_v25 = vld [vmem:[#allocation7 + $0x1a80] sm:$0xff] }
 0x336   :  { %7023 = vmatpush1.bf16.msra.mxu0 %v9680_v21  ;;  %v9760_v21 = vcombine.low %v1531_v8, %v1535_v9  ;;  %v1391_v26 = vld [vmem:[#allocation7 + $0x1aa0] sm:$0xff]  ;;  %v592_v8 = vld [vmem:[#allocation7 + $0x1a8] sm:$0xff]  ;;  %v504_v9 = vcombine.high %v10376_v23, %v10376_v23 }
 0x337   :  { %7024 = vmatprep.subr.bf16.mxu0 %v9673_v27  ;;  %v9753_v27 = vcombine.high %v1523_v16, %v1527_v19  ;;  %v1515_v30 = vld [vmem:[#allocation7 + $0x1e80] sm:$0xff] }
 0x338   :  { %6984 = vmatpush1.bf16.msra.mxu1 %v9544_v28  ;;  %v9624_v28 = vcombine.low %v1395_v12, %v1399_v13  ;;  %v1519_v37 = vld [vmem:[#allocation7 + $0x1ea0] sm:$0xff]  ;;  %v716_v13 = vld [vmem:[#allocation7 + $0x588] sm:$0xff] }
 0x339   :  { %6985 = vmatprep.subr.bf16.mxu1 %v9537_v32  ;;  %v9617_v32 = vcombine.high %v1387_v25, %v1391_v26  ;;  %v1379_v38 = vld [vmem:[#allocation7 + $0x1a40] sm:$0xff] }
 0x33a   :  { %7025 = vmatpush1.bf16.msra.mxu0 %v9672_v45  ;;  %v9752_v45 = vcombine.low %v1523_v16, %v1527_v19  ;;  %v1383_v39 = vld [vmem:[#allocation7 + $0x1a60] sm:$0xff] }
 0x33b   :  { %7026 = vmatprep.subr.bf16.mxu0 %v9665_v46  ;;  %v9745_v46 = vcombine.high %v1515_v30, %v1519_v37  ;;  %v1507_v48 = vld [vmem:[#allocation7 + $0x1e40] sm:$0xff] }
 0x33c   :  { %6986 = vmatpush1.bf16.msra.mxu1 %v9536_v47  ;;  %v9616_v47 = vcombine.low %v1387_v25, %v1391_v26  ;;  %v1511_v49 = vld [vmem:[#allocation7 + $0x1e60] sm:$0xff]  ;;  %v584_v25 = vld [vmem:[#allocation7 + $0x168] sm:$0xff] }
 0x33d   :  { %6987 = vmatprep.subr.bf16.mxu1 %v9657_v33  ;;  %v9609_v33 = vcombine.high %v1379_v38, %v1383_v39  ;;  %v1371_v52 = vld [vmem:[#allocation7 + $0x1a00] sm:$0xff] }
 0x33e   :  { %7027 = vmatpush1.bf16.msra.mxu0 %v9664_v51  ;;  %v9744_v51 = vcombine.low %v1515_v30, %v1519_v37  ;;  %v1375_v53 = vld [vmem:[#allocation7 + $0x1a20] sm:$0xff]  ;;  %v708_v37 = vld [vmem:[#allocation7 + $0x548] sm:$0xff] }
 0x33f   :  { %7028 = vmatprep.subr.bf16.mxu0 %v9785_v42  ;;  %v9737_v42 = vcombine.high %v1507_v48, %v1511_v49  ;;  %v1499_v35 = vld [vmem:[#allocation7 + $0x1e00] sm:$0xff] }
 0x340   :  { %6988 = vmatpush2.bf16.msra.mxu1 %v9656_v29  ;;  %v9608_v29 = vcombine.low %v1379_v38, %v1383_v39  ;;  %v1503_v54 = vld [vmem:[#allocation7 + $0x1e20] sm:$0xff] }
 0x341   :  { %6989 = vmatprep.subr.bf16.mxu1 %v9649_v55  ;;  %v9601_v55 = vcombine.high %v1371_v52, %v1375_v53  ;;  %v1563_v31 = vld [vmem:[#allocation8] sm:$0xff]  ;;  %v9728_v4 = vcombine.low %v1499_v35, %v1503_v54 }
 0x342   :  { %7029 = vmatpush2.bf16.msra.mxu0 %v9784_v56  ;;  %v9736_v56 = vcombine.low %v1507_v48, %v1511_v49  ;;  %v1568_v12 = vrot.slane %v1563_v31, %v1567_v0  ;;  %v572_v49 = vld [vmem:[#allocation7 + $0x108] sm:$0xff] }
 0x343   :  { %7030 = vmatprep.subr.bf16.mxu0 %v9777_v61  ;;  %v9729_v61 = vcombine.high %v1499_v35, %v1503_v54  ;;  %v700_v35 = vld [vmem:[#allocation7 + $0x508] sm:$0xff] }
 0x344   :  { %6990 = vmatpush2.bf16.msra.mxu1 %v9648_v62  ;;  %v9600_v62 = vcombine.low %v1371_v52, %v1375_v53  ;;  %v704_v54 = vld [vmem:[#allocation7 + $0x528] sm:$0xff] }
 0x345   :  { %6991 = vmatprep.subr.bf16.mxu1 %v9641_v2  ;;  %v728_v2 = vld [vmem:[#allocation7 + $0x5e8] sm:$0xff] }
 0x346   :  { %7031 = vmatpush2.bf16.msra.mxu0 %v9776_v3  ;;  %v8827_v3 = vcombine.high %v596_v58, %v600_v60  ;;  %v8954_v19 = vcombine.low %v724_v1, %v728_v2 }
 0x347   :  { %7032 = vmatprep.subr.bf16.mxu0 %v9769_v6  ;;  %v1571_v6 = vsub.s32 1, %v10365_v50 }
 0x348   :  { %6992 = vmatpush2.bf16.msra.mxu1 %v9640_v7  ;;  %v588_v7 = vld [vmem:[#allocation7 + $0x188] sm:$0xff] }
 0x349   :  { %6993 = vmatprep.subr.bf16.mxu1 %v9633_v10  ;;  %v8955_v10 = vcombine.high %v724_v1, %v728_v2  ;;  %v8819_v16 = vcombine.high %v588_v7, %v592_v8  ;;  %v8931_v1 = vcombine.high %v700_v35, %v704_v54 }
 0x34a   :  { %7033 = vmatpush2.bf16.msra.mxu0 %v9768_v11  ;;  %v8826_v11 = vcombine.low %v596_v58, %v600_v60 }
 0x34b   :  { %7034 = vmatprep.subr.bf16.mxu0 %v9761_v14  ;;  %v720_v14 = vld [vmem:[#allocation7 + $0x5a8] sm:$0xff] }
 0x34c   :  { %6994 = vmatpush2.bf16.msra.mxu1 %v9632_v15  ;;  %v10448_v15 = vpack.c.bf16 %v10376_v23, %v10376_v23  ;;  %v8818_v23 = vcombine.low %v588_v7, %v592_v8  ;;  %v8946_v48 = vcombine.low %v716_v13, %v720_v14  ;;  %v556_v7 = vld [vmem:[#allocation7 + $0x88] sm:$0xff] }
 0x34d   :  { %6995 = vmatprep.subr.bf16.mxu1 %v9625_v20  ;;  %v1572_v20 = vrot.slane %v1563_v31, %v1571_v6  ;;  %v696_v31 = vld [vmem:[#allocation7 + $0x4e8] sm:$0xff]  ;;  %v8930_v6 = vcombine.low %v700_v35, %v704_v54 }
 0x34e   :  { %7035 = vmatpush2.bf16.msra.mxu0 %v9760_v21  ;;  %v580_v21 = vld [vmem:[#allocation7 + $0x148] sm:$0xff] }
 0x34f   :  { %7036 = vmatprep.subr.bf16.mxu0 %v9753_v27  ;;  %v10451_v27 = vpack.c.bf16 %v504_v9, %v504_v9  ;;  %v8811_v39 = vcombine.high %v580_v21, %v584_v25  ;;  %v560_v8 = vld [vmem:[#allocation7 + $0xa8] sm:$0xff] }
 0x350   :  { %6996 = vmatpush2.bf16.msra.mxu1 %v9624_v28  ;;  %v8947_v28 = vcombine.high %v716_v13, %v720_v14  ;;  %v8787_v13 = vcombine.high %v556_v7, %v560_v8 }
 0x351   :  { %6997 = vmatprep.subr.bf16.mxu1 %v9617_v32  ;;  %v712_v32 = vld [vmem:[#allocation7 + $0x568] sm:$0xff] }
 0x352   :  { %7037 = vmatpush2.bf16.msra.mxu0 %v9752_v45  ;;  %v8939_v53 = vcombine.high %v708_v37, %v712_v32  ;;  %v8938_v60 = vcombine.low %v708_v37, %v712_v32  ;;  %v544_v37 = vld [vmem:[#allocation7 + $0x28] sm:$0xff] }
 0x353   :  { %7038 = vmatprep.subr.bf16.mxu0 %v9745_v46 }
 0x354   :  { %6998 = vmatpush2.bf16.msra.mxu1 %v9616_v47 }
 0x355   :  { %6999 = vmatprep.subr.bf16.mxu1 %v9609_v33  ;;  %v576_v33 = vld [vmem:[#allocation7 + $0x128] sm:$0xff] }
 0x356   :  { %7039 = vmatpush2.bf16.msra.mxu0 %v9744_v51  ;;  %v8803_v58 = vcombine.high %v572_v49, %v576_v33  ;;  %v8802_v2 = vcombine.low %v572_v49, %v576_v33  ;;  %v660_v49 = vld [vmem:[#allocation7 + $0x3c8] sm:$0xff] }
 0x357   :  { %7040 = vmatprep.subr.bf16.mxu0 %v9737_v42  ;;  %v664_v33 = vld [vmem:[#allocation7 + $0x3e8] sm:$0xff] }
 0x358   :  { %7000 = vmatpush2.bf16.msra.mxu1 %v9608_v29  ;;  %v8810_v29 = vcombine.low %v580_v21, %v584_v25  ;;  %v8786_v21 = vcombine.low %v556_v7, %v560_v8  ;;  %v676_v25 = vld [vmem:[#allocation7 + $0x448] sm:$0xff]  ;;  %v8891_v35 = vcombine.high %v660_v49, %v664_v33 }
 0x359   :  { %7001 = vmatprep.subr.bf16.mxu1 %v9601_v55  ;;  %v776_v7 = vld [vmem:[#allocation7 + $0x768] sm:$0xff] }
 0x35a   :  { %7041 = vmatpush2.bf16.msra.mxu0 %v9736_v56 }
 0x35b   :  { %7042 = vmatprep.subr.bf16.mxu0 %v9729_v61  ;;  %v564_v61 = vld [vmem:[#allocation7 + $0xc8] sm:$0xff] }
 0x35c   :  { %7002 = vmatpush2.bf16.msra.mxu1 %v9600_v62  ;;  %v568_v62 = vld [vmem:[#allocation7 + $0xe8] sm:$0xff] }
 0x35d   :  { %7053 = vmatprep.subr.bf16.mxu1 %v8827_v3  ;;  %v692_v3 = vld [vmem:[#allocation7 + $0x4c8] sm:$0xff] }
 0x35e   :  { %7043 = vmatpush2.bf16.msra.mxu0 %v9728_v4  ;;  %v8795_v4 = vcombine.high %v564_v61, %v568_v62  ;;  %v8923_v9 = vcombine.high %v692_v3, %v696_v31  ;;  %v8922_v14 = vcombine.low %v692_v3, %v696_v31  ;;  %v648_v3 = vld [vmem:[#allocation7 + $0x368] sm:$0xff] }
 0x35f   :  { %7004 = vmatmul.mubr.bf16.vlgmr.msra.gmra.mxu1 %v10448_v15  ;;  %v6759_v26 = vpop.f32.mrf.mxu1  ;;  %7094 = vmatprep.subr.bf16.mxu0 %v8955_v10  ;;  %v8794_v10 = vcombine.low %v564_v61, %v568_v62  ;;  %v780_v61 = vld [vmem:[#allocation7 + $0x788] sm:$0xff] }
 0x360   :  { %v6760_v30 = vadd.f32 %v6759_v26, %v1568_v12  ;;  %7054 = vmatpush1.bf16.msra.mxu1 %v8826_v11  ;;  %7085 = vmatprep.mubr.bf16.mxu1 %v10370_v17  ;;  %v684_v11 = vld [vmem:[#allocation7 + $0x488] sm:$0xff] }
 0x361   :  { %7045 = vmatmul.mubr.bf16.vlgmr.msra.gmra.mxu0 %v10451_v27  ;;  %v6761_v45 = vpop.f32.mrf.mxu1  ;;  %v6800_v38 = vpop.f32.mrf.mxu0  ;;  %7055 = vmatprep.subr.bf16.mxu1 %v8819_v16  ;;  %v688_v12 = vld [vmem:[#allocation7 + $0x4a8] sm:$0xff] }
 0x362   :  { %v6762_v46 = vadd.f32 %v6761_v45, %v1572_v20  ;;  %v10455_v47 = vadd.f32 %v6800_v38, %v6760_v30  ;;  %7095 = vmatpush1.bf16.msra.mxu0 %v8954_v19  ;;  %7126 = vmatprep.mubr.bf16.mxu0 %v10379_v24  ;;  %v548_v16 = vld [vmem:[#allocation7 + $0x48] sm:$0xff]  ;;  %v8915_v20 = vcombine.high %v684_v11, %v688_v12 }
 0x363   :  { %v6763_v51 = vpop.f32.mrf.mxu1  ;;  %v6802_v52 = vpop.f32.mrf.mxu0  ;;  %7096 = vmatprep.subr.bf16.mxu0 %v8947_v28  ;;  %v552_v19 = vld [vmem:[#allocation7 + $0x68] sm:$0xff]  ;;  %v8914_v30 = vcombine.low %v684_v11, %v688_v12 }
 0x364   :  { %v10458_v42 = vadd.f32 %v6802_v52, %v6762_v46  ;;  %7056 = vmatpush1.bf16.msra.mxu1 %v8818_v23  ;;  %v680_v26 = vld [vmem:[#allocation7 + $0x468] sm:$0xff]  ;;  %v8779_v28 = vcombine.high %v548_v16, %v552_v19  ;;  %v8778_v45 = vcombine.low %v548_v16, %v552_v19 }
 0x365   :  { %v6764_v55 = vpop.f32.mrf.mxu1  ;;  %v6804_v56 = vpop.f32.mrf.mxu0  ;;  %7057 = vmatprep.subr.bf16.mxu1 %v8811_v39  ;;  %v540_v23 = vld [vmem:[#allocation7 + $0x8] sm:$0xff]  ;;  %v8907_v32 = vcombine.high %v676_v25, %v680_v26 }
 0x366   :  { %7097 = vmatpush1.bf16.msra.mxu0 %v8946_v48  ;;  %v668_v38 = vld [vmem:[#allocation7 + $0x408] sm:$0xff]  ;;  %v8771_v46 = vcombine.high %v540_v23, %v544_v37  ;;  %v8906_v48 = vcombine.low %v676_v25, %v680_v26  ;;  %v8770_v52 = vcombine.low %v540_v23, %v544_v37 }
 0x367   :  { %v6805_v0 = vpop.f32.mrf.mxu0  ;;  %7098 = vmatprep.subr.bf16.mxu0 %v8939_v53  ;;  %v672_v39 = vld [vmem:[#allocation7 + $0x428] sm:$0xff] }
 0x368   :  { %7058 = vmatpush1.bf16.msra.mxu1 %v8810_v29  ;;  %v8899_v51 = vcombine.high %v668_v38, %v672_v39  ;;  %v788_v53 = vld [vmem:[#allocation7 + $0x7c8] sm:$0xff]  ;;  %v8898_v54 = vcombine.low %v668_v38, %v672_v39 }
 0x369   :  { %7059 = vmatprep.subr.bf16.mxu1 %v8803_v58  ;;  %v792_v29 = vld [vmem:[#allocation7 + $0x7e8] sm:$0xff] }
 0x36a   :  { %7099 = vmatpush1.bf16.msra.mxu0 %v8938_v60  ;;  %v652_v55 = vld [vmem:[#allocation7 + $0x388] sm:$0xff]  ;;  %v9019_v58 = vcombine.high %v788_v53, %v792_v29  ;;  %v8890_v60 = vcombine.low %v660_v49, %v664_v33 }
 0x36b   :  { %7100 = vmatprep.subr.bf16.mxu0 %v8931_v1  ;;  %v656_v56 = vld [vmem:[#allocation7 + $0x3a8] sm:$0xff]  ;;  %v9018_v1 = vcombine.low %v788_v53, %v792_v29 }
 0x36c   :  { %7060 = vmatpush1.bf16.msra.mxu1 %v8802_v2  ;;  %v784_v62 = vld [vmem:[#allocation7 + $0x7a8] sm:$0xff]  ;;  %v8883_v0 = vcombine.high %v652_v55, %v656_v56 }
 0x36d   :  { %7061 = vmatprep.subr.bf16.mxu1 %v8795_v4  ;;  %v644_v2 = vld [vmem:[#allocation7 + $0x348] sm:$0xff]  ;;  %v9011_v31 = vcombine.high %v780_v61, %v784_v62  ;;  %v8882_v4 = vcombine.low %v652_v55, %v656_v56 }
 0x36e   :  { %7101 = vmatpush1.bf16.msra.mxu0 %v8930_v6  ;;  %v772_v6 = vld [vmem:[#allocation7 + $0x748] sm:$0xff]  ;;  %v8875_v8 = vcombine.high %v644_v2, %v648_v3 }
 0x36f   :  { %7102 = vmatprep.subr.bf16.mxu0 %v8923_v9  ;;  %v9010_v9 = vcombine.low %v780_v61, %v784_v62  ;;  %v640_v11 = vld [vmem:[#allocation7 + $0x328] sm:$0xff]  ;;  %v9003_v12 = vcombine.high %v772_v6, %v776_v7 }
 0x370   :  { %7062 = vmatpush1.bf16.msra.mxu1 %v8794_v10  ;;  %v636_v10 = vld [vmem:[#allocation7 + $0x308] sm:$0xff] }
 0x371   :  { %7063 = vmatprep.subr.bf16.mxu1 %v8787_v13  ;;  %v8874_v13 = vcombine.low %v644_v2, %v648_v3  ;;  %v768_v16 = vld [vmem:[#allocation7 + $0x728] sm:$0xff]  ;;  %v8867_v19 = vcombine.high %v636_v10, %v640_v11 }
 0x372   :  { %7103 = vmatpush1.bf16.msra.mxu0 %v8922_v14  ;;  %v764_v14 = vld [vmem:[#allocation7 + $0x708] sm:$0xff] }
 0x373   :  { %7104 = vmatprep.subr.bf16.mxu0 %v8915_v20  ;;  %v9002_v20 = vcombine.low %v772_v6, %v776_v7  ;;  %v632_v25 = vld [vmem:[#allocation7 + $0x2e8] sm:$0xff]  ;;  %v8995_v26 = vcombine.high %v764_v14, %v768_v16 }
 0x374   :  { %7064 = vmatpush1.bf16.msra.mxu1 %v8786_v21  ;;  %v628_v21 = vld [vmem:[#allocation7 + $0x2c8] sm:$0xff] }
 0x375   :  { %7065 = vmatprep.subr.bf16.mxu1 %v8779_v28  ;;  %v8866_v28 = vcombine.low %v636_v10, %v640_v11  ;;  %v760_v23 = vld [vmem:[#allocation7 + $0x6e8] sm:$0xff]  ;;  %v8859_v37 = vcombine.high %v628_v21, %v632_v25 }
 0x376   :  { %7105 = vmatpush1.bf16.msra.mxu0 %v8914_v30  ;;  %v756_v30 = vld [vmem:[#allocation7 + $0x6c8] sm:$0xff] }
 0x377   :  { %7106 = vmatprep.subr.bf16.mxu0 %v8907_v32  ;;  %v8994_v32 = vcombine.low %v764_v14, %v768_v16  ;;  %v624_v38 = vld [vmem:[#allocation7 + $0x2a8] sm:$0xff]  ;;  %v8987_v39 = vcombine.high %v756_v30, %v760_v23 }
 0x378   :  { %7066 = vmatpush1.bf16.msra.mxu1 %v8778_v45  ;;  %v620_v45 = vld [vmem:[#allocation7 + $0x288] sm:$0xff] }
 0x379   :  { %7067 = vmatprep.subr.bf16.mxu1 %v8771_v46  ;;  %v8858_v46 = vcombine.low %v628_v21, %v632_v25  ;;  %v752_v49 = vld [vmem:[#allocation7 + $0x6a8] sm:$0xff]  ;;  %v8851_v33 = vcombine.high %v620_v45, %v624_v38 }
 0x37a   :  { %7107 = vmatpush1.bf16.msra.mxu0 %v8906_v48  ;;  %v748_v48 = vld [vmem:[#allocation7 + $0x688] sm:$0xff] }
 0x37b   :  { %7108 = vmatprep.subr.bf16.mxu0 %v8899_v51  ;;  %v8986_v51 = vcombine.low %v756_v30, %v760_v23  ;;  %v616_v53 = vld [vmem:[#allocation7 + $0x268] sm:$0xff]  ;;  %v8979_v29 = vcombine.high %v748_v48, %v752_v49 }
 0x37c   :  { %7068 = vmatpush1.bf16.msra.mxu1 %v8770_v52  ;;  %v612_v52 = vld [vmem:[#allocation7 + $0x248] sm:$0xff] }
 0x37d   :  { %7069 = vmatprep.subr.bf16.mxu1 %v8891_v35  ;;  %v8850_v35 = vcombine.low %v620_v45, %v624_v38  ;;  %v744_v55 = vld [vmem:[#allocation7 + $0x668] sm:$0xff]  ;;  %v8843_v56 = vcombine.high %v612_v52, %v616_v53 }
 0x37e   :  { %7109 = vmatpush1.bf16.msra.mxu0 %v8898_v54  ;;  %v740_v54 = vld [vmem:[#allocation7 + $0x648] sm:$0xff] }
 0x37f   :  { %7110 = vmatprep.subr.bf16.mxu0 %v9019_v58  ;;  %v8978_v58 = vcombine.low %v748_v48, %v752_v49  ;;  %v608_v61 = vld [vmem:[#allocation7 + $0x228] sm:$0xff]  ;;  %v8971_v62 = vcombine.high %v740_v54, %v744_v55 }
 0x380   :  { %7070 = vmatpush2.bf16.msra.mxu1 %v8890_v60  ;;  %v604_v60 = vld [vmem:[#allocation7 + $0x208] sm:$0xff] }
 0x381   :  { %7071 = vmatprep.subr.bf16.mxu1 %v8883_v0  ;;  %v8842_v0 = vcombine.low %v612_v52, %v616_v53  ;;  %v736_v2 = vld [vmem:[#allocation7 + $0x628] sm:$0xff]  ;;  %v8835_v3 = vcombine.high %v604_v60, %v608_v61 }
 0x382   :  { %7111 = vmatpush2.bf16.msra.mxu0 %v9018_v1  ;;  %v732_v1 = vld [vmem:[#allocation7 + $0x608] sm:$0xff] }
 0x383   :  { %7112 = vmatprep.subr.bf16.mxu0 %v9011_v31  ;;  %v8970_v31 = vcombine.low %v740_v54, %v744_v55  ;;  %v856_v6 = vld [vmem:[#allocation7 + $0x9e8] sm:$0xff]  ;;  %v8963_v7 = vcombine.high %v732_v1, %v736_v2 }
 0x384   :  { %7072 = vmatpush2.bf16.msra.mxu1 %v8882_v4  ;;  %v852_v4 = vld [vmem:[#allocation7 + $0x9c8] sm:$0xff] }
 0x385   :  { %7073 = vmatprep.subr.bf16.mxu1 %v8875_v8  ;;  %v8834_v8 = vcombine.low %v604_v60, %v608_v61  ;;  %v984_v10 = vld [vmem:[#allocation7 + $0xde8] sm:$0xff]  ;;  %v9083_v11 = vcombine.high %v852_v4, %v856_v6 }
 0x386   :  { %7113 = vmatpush2.bf16.msra.mxu0 %v9010_v9  ;;  %v980_v9 = vld [vmem:[#allocation7 + $0xdc8] sm:$0xff] }
 0x387   :  { %7114 = vmatprep.subr.bf16.mxu0 %v9003_v12  ;;  %v8962_v12 = vcombine.low %v732_v1, %v736_v2  ;;  %v848_v14 = vld [vmem:[#allocation7 + $0x9a8] sm:$0xff]  ;;  %v9211_v16 = vcombine.high %v980_v9, %v984_v10 }
 0x388   :  { %7074 = vmatpush2.bf16.msra.mxu1 %v8874_v13  ;;  %v844_v13 = vld [vmem:[#allocation7 + $0x988] sm:$0xff] }
 0x389   :  { %7075 = vmatprep.subr.bf16.mxu1 %v8867_v19  ;;  %v9082_v19 = vcombine.low %v852_v4, %v856_v6  ;;  %v976_v21 = vld [vmem:[#allocation7 + $0xda8] sm:$0xff]  ;;  %v9075_v25 = vcombine.high %v844_v13, %v848_v14  ;;  %v9074_v45 = vcombine.low %v844_v13, %v848_v14 }
 0x38a   :  { %7115 = vmatpush2.bf16.msra.mxu0 %v9002_v20  ;;  %v972_v20 = vld [vmem:[#allocation7 + $0xd88] sm:$0xff] }
 0x38b   :  { %7116 = vmatprep.subr.bf16.mxu0 %v8995_v26  ;;  %v9210_v26 = vcombine.low %v980_v9, %v984_v10  ;;  %v840_v30 = vld [vmem:[#allocation7 + $0x968] sm:$0xff] }
 0x38c   :  { %7076 = vmatpush2.bf16.msra.mxu1 %v8866_v28  ;;  %v836_v28 = vld [vmem:[#allocation7 + $0x948] sm:$0xff] }
 0x38d   :  { %7077 = vmatprep.subr.bf16.mxu1 %v8859_v37  ;;  %v9203_v37 = vcombine.high %v972_v20, %v976_v21  ;;  %v964_v38 = vld [vmem:[#allocation7 + $0xd48] sm:$0xff]  ;;  %v9067_v49 = vcombine.high %v836_v28, %v840_v30 }
 0x38e   :  { %7117 = vmatpush2.bf16.msra.mxu0 %v8994_v32  ;;  %v828_v52 = vld [vmem:[#allocation7 + $0x908] sm:$0xff] }
 0x38f   :  { %7118 = vmatprep.subr.bf16.mxu0 %v8987_v39  ;;  %v968_v39 = vld [vmem:[#allocation7 + $0xd68] sm:$0xff] }
 0x390   :  { %7078 = vmatpush2.bf16.msra.mxu1 %v8858_v46  ;;  %v832_v53 = vld [vmem:[#allocation7 + $0x928] sm:$0xff]  ;;  %v9195_v54 = vcombine.high %v964_v38, %v968_v39 }
 0x391   :  { %7079 = vmatprep.subr.bf16.mxu1 %v8851_v33  ;;  %v960_v60 = vld [vmem:[#allocation7 + $0xd28] sm:$0xff]  ;;  %v9058_v4 = vcombine.low %v828_v52, %v832_v53 }
 0x392   :  { %7119 = vmatpush2.bf16.msra.mxu0 %v8986_v51  ;;  %v820_v1 = vld [vmem:[#allocation7 + $0x8c8] sm:$0xff] }
 0x393   :  { %7120 = vmatprep.subr.bf16.mxu0 %v8979_v29  ;;  %v824_v2 = vld [vmem:[#allocation7 + $0x8e8] sm:$0xff] }
 0x394   :  { %7080 = vmatpush2.bf16.msra.mxu1 %v8850_v35  ;;  %v948_v6 = vld [vmem:[#allocation7 + $0xcc8] sm:$0xff]  ;;  %v9050_v13 = vcombine.low %v820_v1, %v824_v2 }
 0x395   :  { %7081 = vmatprep.subr.bf16.mxu1 %v8843_v56  ;;  %v9066_v56 = vcombine.low %v836_v28, %v840_v30  ;;  %v812_v10 = vld [vmem:[#allocation7 + $0x888] sm:$0xff] }
 0x396   :  { %7121 = vmatpush2.bf16.msra.mxu0 %v8978_v58  ;;  %v956_v58 = vld [vmem:[#allocation7 + $0xd08] sm:$0xff] }
 0x397   :  { %7122 = vmatprep.subr.bf16.mxu0 %v8971_v62  ;;  %v9059_v62 = vcombine.high %v828_v52, %v832_v53  ;;  %v9186_v9 = vcombine.low %v956_v58, %v960_v60  ;;  %v940_v14 = vld [vmem:[#allocation7 + $0xc88] sm:$0xff] }
 0x398   :  { %7082 = vmatpush2.bf16.msra.mxu1 %v8842_v0  ;;  %v9194_v0 = vcombine.low %v964_v38, %v968_v39  ;;  %v932_v30 = vld [vmem:[#allocation7 + $0xc48] sm:$0xff] }
 0x399   :  { %7083 = vmatprep.subr.bf16.mxu1 %v8835_v3  ;;  %v800_v38 = vld [vmem:[#allocation7 + $0x828] sm:$0xff] }
 0x39a   :  { %7123 = vmatpush2.bf16.msra.mxu0 %v8970_v31  ;;  %v9187_v31 = vcombine.high %v956_v58, %v960_v60  ;;  %v916_v52 = vld [vmem:[#allocation7 + $0xbc8] sm:$0xff] }
 0x39b   :  { %7124 = vmatprep.subr.bf16.mxu0 %v8963_v7  ;;  %v952_v7 = vld [vmem:[#allocation7 + $0xce8] sm:$0xff] }
 0x39c   :  { %7084 = vmatpush2.bf16.msra.mxu1 %v8834_v8  ;;  %v9051_v8 = vcombine.high %v820_v1, %v824_v2  ;;  %v920_v53 = vld [vmem:[#allocation7 + $0xbe8] sm:$0xff] }
 0x39d   :  { %7135 = vmatprep.subr.bf16.mxu1 %v9083_v11  ;;  %v816_v11 = vld [vmem:[#allocation7 + $0x8a8] sm:$0xff]  ;;  %v9147_v58 = vcombine.high %v916_v52, %v920_v53 }
 0x39e   :  { %7125 = vmatpush2.bf16.msra.mxu0 %v8962_v12  ;;  %v9179_v12 = vcombine.high %v948_v6, %v952_v7  ;;  %v9042_v28 = vcombine.low %v812_v10, %v816_v11  ;;  %v1036_v1 = vld [vmem:[#allocation7 + $0xf88] sm:$0xff] }
 0x39f   :  { %v6841_v23 = vpop.f32.mrf.mxu1  ;;  %7086 = vmatmul.mubr.bf16.vlgmr.msra.gmra.mxu1 %v10372_v18  ;;  %7176 = vmatprep.subr.bf16.mxu0 %v9211_v16  ;;  %v944_v16 = vld [vmem:[#allocation7 + $0xca8] sm:$0xff] }
 0x3a0   :  { %v6842_v32 = vadd.f32 %v6841_v23, %v10455_v47  ;;  %7136 = vmatpush1.bf16.msra.mxu1 %v9082_v19  ;;  %7167 = vmatprep.mubr.bf16.mxu1 %v10386_v34  ;;  %v9202_v47 = vcombine.low %v972_v20, %v976_v21  ;;  %v9043_v19 = vcombine.high %v812_v10, %v816_v11  ;;  %v804_v21 = vld [vmem:[#allocation7 + $0x848] sm:$0xff] }
 0x3a1   :  { %v6843_v46 = vpop.f32.mrf.mxu1  ;;  %v6882_v48 = vpop.f32.mrf.mxu0  ;;  %7127 = vmatmul.mubr.bf16.vlgmr.msra.gmra.mxu0 %v10388_v36  ;;  %7137 = vmatprep.subr.bf16.mxu1 %v9075_v25  ;;  %v9178_v20 = vcombine.low %v948_v6, %v952_v7  ;;  %v808_v25 = vld [vmem:[#allocation7 + $0x868] sm:$0xff] }
 0x3a2   :  { %v6844_v33 = vadd.f32 %v6843_v46, %v10458_v42  ;;  %v10465_v51 = vadd.f32 %v6882_v48, %v6842_v32  ;;  %7177 = vmatpush1.bf16.msra.mxu0 %v9210_v26  ;;  %7208 = vmatprep.mubr.bf16.mxu0 %v10396_v43  ;;  %v9171_v26 = vcombine.high %v940_v14, %v944_v16  ;;  %v936_v23 = vld [vmem:[#allocation7 + $0xc68] sm:$0xff] }
 0x3a3   :  { %v6845_v29 = vpop.f32.mrf.mxu1  ;;  %v6884_v35 = vpop.f32.mrf.mxu0  ;;  %7178 = vmatprep.subr.bf16.mxu0 %v9203_v37  ;;  %v9035_v37 = vcombine.high %v804_v21, %v808_v25  ;;  %v9170_v32 = vcombine.low %v940_v14, %v944_v16  ;;  %v9163_v39 = vcombine.high %v932_v30, %v936_v23  ;;  %v9034_v46 = vcombine.low %v804_v21, %v808_v25  ;;  %v924_v48 = vld [vmem:[#allocation7 + $0xc08] sm:$0xff] }
 0x3a4   :  { %v10468_v55 = vadd.f32 %v6884_v35, %v6844_v33  ;;  %7138 = vmatpush1.bf16.msra.mxu1 %v9074_v45  ;;  %v796_v45 = vld [vmem:[#allocation7 + $0x808] sm:$0xff] }
 0x3a5   :  { %v6846_v61 = vpop.f32.mrf.mxu1  ;;  %v6886_v42 = vpop.f32.mrf.mxu0  ;;  %7139 = vmatprep.subr.bf16.mxu1 %v9067_v49  ;;  %v928_v49 = vld [vmem:[#allocation7 + $0xc28] sm:$0xff]  ;;  %v9027_v33 = vcombine.high %v796_v45, %v800_v38  ;;  %v9026_v35 = vcombine.low %v796_v45, %v800_v38 }
 0x3a6   :  { %7179 = vmatpush1.bf16.msra.mxu0 %v9202_v47  ;;  %v9162_v47 = vcombine.low %v932_v30, %v936_v23  ;;  %v9155_v29 = vcombine.high %v924_v48, %v928_v49  ;;  %v9154_v60 = vcombine.low %v924_v48, %v928_v49  ;;  %v908_v61 = vld [vmem:[#allocation7 + $0xb88] sm:$0xff] }
 0x3a7   :  { %v6887_v3 = vpop.f32.mrf.mxu0  ;;  %7180 = vmatprep.subr.bf16.mxu0 %v9195_v54  ;;  %v1044_v54 = vld [vmem:[#allocation7 + $0xfc8] sm:$0xff] }
 0x3a8   :  { %7140 = vmatpush1.bf16.msra.mxu1 %v9066_v56  ;;  %v1048_v56 = vld [vmem:[#allocation7 + $0xfe8] sm:$0xff] }
 0x3a9   :  { %7141 = vmatprep.subr.bf16.mxu1 %v9059_v62  ;;  %v912_v42 = vld [vmem:[#allocation7 + $0xba8] sm:$0xff]  ;;  %v9275_v62 = vcombine.high %v1044_v54, %v1048_v56 }
 0x3aa   :  { %7181 = vmatpush1.bf16.msra.mxu0 %v9194_v0  ;;  %v9146_v0 = vcombine.low %v916_v52, %v920_v53  ;;  %v1040_v2 = vld [vmem:[#allocation7 + $0xfa8] sm:$0xff]  ;;  %v9139_v3 = vcombine.high %v908_v61, %v912_v42 }
 0x3ab   :  { %7182 = vmatprep.subr.bf16.mxu0 %v9187_v31  ;;  %v9274_v31 = vcombine.low %v1044_v54, %v1048_v56  ;;  %v904_v6 = vld [vmem:[#allocation7 + $0xb68] sm:$0xff]  ;;  %v9267_v7 = vcombine.high %v1036_v1, %v1040_v2 }
 0x3ac   :  { %7142 = vmatpush1.bf16.msra.mxu1 %v9058_v4  ;;  %v900_v4 = vld [vmem:[#allocation7 + $0xb48] sm:$0xff] }
 0x3ad   :  { %7143 = vmatprep.subr.bf16.mxu1 %v9051_v8  ;;  %v9138_v8 = vcombine.low %v908_v61, %v912_v42  ;;  %v1032_v10 = vld [vmem:[#allocation7 + $0xf68] sm:$0xff]  ;;  %v9131_v11 = vcombine.high %v900_v4, %v904_v6 }
 0x3ae   :  { %7183 = vmatpush1.bf16.msra.mxu0 %v9186_v9  ;;  %v1028_v9 = vld [vmem:[#allocation7 + $0xf48] sm:$0xff] }
 0x3af   :  { %7184 = vmatprep.subr.bf16.mxu0 %v9179_v12  ;;  %v9266_v12 = vcombine.low %v1036_v1, %v1040_v2  ;;  %v896_v14 = vld [vmem:[#allocation7 + $0xb28] sm:$0xff]  ;;  %v9259_v16 = vcombine.high %v1028_v9, %v1032_v10 }
 0x3b0   :  { %7144 = vmatpush1.bf16.msra.mxu1 %v9050_v13  ;;  %v892_v13 = vld [vmem:[#allocation7 + $0xb08] sm:$0xff] }
 0x3b1   :  { %7145 = vmatprep.subr.bf16.mxu1 %v9043_v19  ;;  %v9130_v19 = vcombine.low %v900_v4, %v904_v6  ;;  %v1024_v21 = vld [vmem:[#allocation7 + $0xf28] sm:$0xff]  ;;  %v9123_v25 = vcombine.high %v892_v13, %v896_v14 }
 0x3b2   :  { %7185 = vmatpush1.bf16.msra.mxu0 %v9178_v20  ;;  %v1020_v20 = vld [vmem:[#allocation7 + $0xf08] sm:$0xff] }
 0x3b3   :  { %7186 = vmatprep.subr.bf16.mxu0 %v9171_v26  ;;  %v9258_v26 = vcombine.low %v1028_v9, %v1032_v10  ;;  %v888_v30 = vld [vmem:[#allocation7 + $0xae8] sm:$0xff]  ;;  %v9251_v23 = vcombine.high %v1020_v20, %v1024_v21 }
 0x3b4   :  { %7146 = vmatpush1.bf16.msra.mxu1 %v9042_v28  ;;  %v884_v28 = vld [vmem:[#allocation7 + $0xac8] sm:$0xff] }
 0x3b5   :  { %7147 = vmatprep.subr.bf16.mxu1 %v9035_v37  ;;  %v9122_v37 = vcombine.low %v892_v13, %v896_v14  ;;  %v1016_v45 = vld [vmem:[#allocation7 + $0xee8] sm:$0xff]  ;;  %v9115_v38 = vcombine.high %v884_v28, %v888_v30 }
 0x3b6   :  { %7187 = vmatpush1.bf16.msra.mxu0 %v9170_v32  ;;  %v1012_v32 = vld [vmem:[#allocation7 + $0xec8] sm:$0xff] }
 0x3b7   :  { %7188 = vmatprep.subr.bf16.mxu0 %v9163_v39  ;;  %v9250_v39 = vcombine.low %v1020_v20, %v1024_v21  ;;  %v880_v48 = vld [vmem:[#allocation7 + $0xaa8] sm:$0xff]  ;;  %v9243_v49 = vcombine.high %v1012_v32, %v1016_v45 }
 0x3b8   :  { %7148 = vmatpush1.bf16.msra.mxu1 %v9034_v46  ;;  %v876_v46 = vld [vmem:[#allocation7 + $0xa88] sm:$0xff] }
 0x3b9   :  { %7149 = vmatprep.subr.bf16.mxu1 %v9027_v33  ;;  %v9114_v33 = vcombine.low %v884_v28, %v888_v30  ;;  %v1008_v52 = vld [vmem:[#allocation7 + $0xea8] sm:$0xff]  ;;  %v9107_v53 = vcombine.high %v876_v46, %v880_v48 }
 0x3ba   :  { %7189 = vmatpush1.bf16.msra.mxu0 %v9162_v47  ;;  %v1004_v47 = vld [vmem:[#allocation7 + $0xe88] sm:$0xff] }
 0x3bb   :  { %7190 = vmatprep.subr.bf16.mxu0 %v9155_v29  ;;  %v9242_v29 = vcombine.low %v1012_v32, %v1016_v45  ;;  %v872_v54 = vld [vmem:[#allocation7 + $0xa68] sm:$0xff]  ;;  %v9235_v56 = vcombine.high %v1004_v47, %v1008_v52 }
 0x3bc   :  { %7150 = vmatpush1.bf16.msra.mxu1 %v9026_v35  ;;  %v868_v35 = vld [vmem:[#allocation7 + $0xa48] sm:$0xff] }
 0x3bd   :  { %7151 = vmatprep.subr.bf16.mxu1 %v9147_v58  ;;  %v9106_v58 = vcombine.low %v876_v46, %v880_v48  ;;  %v1000_v61 = vld [vmem:[#allocation7 + $0xe68] sm:$0xff]  ;;  %v9099_v42 = vcombine.high %v868_v35, %v872_v54 }
 0x3be   :  { %7191 = vmatpush1.bf16.msra.mxu0 %v9154_v60  ;;  %v996_v60 = vld [vmem:[#allocation7 + $0xe48] sm:$0xff] }
 0x3bf   :  { %7192 = vmatprep.subr.bf16.mxu0 %v9275_v62  ;;  %v9234_v62 = vcombine.low %v1004_v47, %v1008_v52  ;;  %v864_v1 = vld [vmem:[#allocation7 + $0xa28] sm:$0xff]  ;;  %v9227_v2 = vcombine.high %v996_v60, %v1000_v61 }
 0x3c0   :  { %7152 = vmatpush2.bf16.msra.mxu1 %v9146_v0  ;;  %v860_v0 = vld [vmem:[#allocation7 + $0xa08] sm:$0xff] }
 0x3c1   :  { %7153 = vmatprep.subr.bf16.mxu1 %v9139_v3  ;;  %v9098_v3 = vcombine.low %v868_v35, %v872_v54  ;;  %v992_v4 = vld [vmem:[#allocation7 + $0xe28] sm:$0xff]  ;;  %v9091_v6 = vcombine.high %v860_v0, %v864_v1 }
 0x3c2   :  { %7193 = vmatpush2.bf16.msra.mxu0 %v9274_v31  ;;  %v988_v31 = vld [vmem:[#allocation7 + $0xe08] sm:$0xff] }
 0x3c3   :  { %7194 = vmatprep.subr.bf16.mxu0 %v9267_v7  ;;  %v9226_v7 = vcombine.low %v996_v60, %v1000_v61  ;;  %v1112_v9 = vld [vmem:[#allocation7 + $0x11e8] sm:$0xff]  ;;  %v9219_v10 = vcombine.high %v988_v31, %v992_v4 }
 0x3c4   :  { %7154 = vmatpush2.bf16.msra.mxu1 %v9138_v8  ;;  %v1108_v8 = vld [vmem:[#allocation7 + $0x11c8] sm:$0xff] }
 0x3c5   :  { %7155 = vmatprep.subr.bf16.mxu1 %v9131_v11  ;;  %v9090_v11 = vcombine.low %v860_v0, %v864_v1  ;;  %v1240_v13 = vld [vmem:[#allocation7 + $0x15e8] sm:$0xff]  ;;  %v9339_v14 = vcombine.high %v1108_v8, %v1112_v9 }
 0x3c6   :  { %7195 = vmatpush2.bf16.msra.mxu0 %v9266_v12  ;;  %v1236_v12 = vld [vmem:[#allocation7 + $0x15c8] sm:$0xff] }
 0x3c7   :  { %7196 = vmatprep.subr.bf16.mxu0 %v9259_v16  ;;  %v9218_v16 = vcombine.low %v988_v31, %v992_v4  ;;  %v1104_v20 = vld [vmem:[#allocation7 + $0x11a8] sm:$0xff]  ;;  %v9467_v21 = vcombine.high %v1236_v12, %v1240_v13 }
 0x3c8   :  { %7156 = vmatpush2.bf16.msra.mxu1 %v9130_v19  ;;  %v1100_v19 = vld [vmem:[#allocation7 + $0x1188] sm:$0xff] }
 0x3c9   :  { %7157 = vmatprep.subr.bf16.mxu1 %v9123_v25  ;;  %v9338_v25 = vcombine.low %v1108_v8, %v1112_v9  ;;  %v1232_v28 = vld [vmem:[#allocation7 + $0x15a8] sm:$0xff]  ;;  %v9331_v30 = vcombine.high %v1100_v19, %v1104_v20  ;;  %v9330_v46 = vcombine.low %v1100_v19, %v1104_v20 }
 0x3ca   :  { %7197 = vmatpush2.bf16.msra.mxu0 %v9258_v26  ;;  %v1228_v26 = vld [vmem:[#allocation7 + $0x1588] sm:$0xff] }
 0x3cb   :  { %7198 = vmatprep.subr.bf16.mxu0 %v9251_v23  ;;  %v9466_v23 = vcombine.low %v1236_v12, %v1240_v13  ;;  %v1096_v32 = vld [vmem:[#allocation7 + $0x1168] sm:$0xff] }
 0x3cc   :  { %7158 = vmatpush2.bf16.msra.mxu1 %v9122_v37  ;;  %v1092_v37 = vld [vmem:[#allocation7 + $0x1148] sm:$0xff] }
 0x3cd   :  { %7159 = vmatprep.subr.bf16.mxu1 %v9115_v38  ;;  %v9459_v38 = vcombine.high %v1228_v26, %v1232_v28  ;;  %v1220_v48 = vld [vmem:[#allocation7 + $0x1548] sm:$0xff]  ;;  %v9323_v52 = vcombine.high %v1092_v37, %v1096_v32 }
 0x3ce   :  { %7199 = vmatpush2.bf16.msra.mxu0 %v9250_v39  ;;  %v1084_v35 = vld [vmem:[#allocation7 + $0x1108] sm:$0xff] }
 0x3cf   :  { %7200 = vmatprep.subr.bf16.mxu0 %v9243_v49  ;;  %v1224_v49 = vld [vmem:[#allocation7 + $0x1568] sm:$0xff] }
 0x3d0   :  { %7160 = vmatpush2.bf16.msra.mxu1 %v9114_v33  ;;  %v1088_v54 = vld [vmem:[#allocation7 + $0x1128] sm:$0xff]  ;;  %v9451_v60 = vcombine.high %v1220_v48, %v1224_v49 }
 0x3d1   :  { %7161 = vmatprep.subr.bf16.mxu1 %v9107_v53  ;;  %v1216_v0 = vld [vmem:[#allocation7 + $0x1528] sm:$0xff]  ;;  %v9314_v8 = vcombine.low %v1084_v35, %v1088_v54 }
 0x3d2   :  { %7201 = vmatpush2.bf16.msra.mxu0 %v9242_v29  ;;  %v1076_v31 = vld [vmem:[#allocation7 + $0x10c8] sm:$0xff] }
 0x3d3   :  { %7202 = vmatprep.subr.bf16.mxu0 %v9235_v56  ;;  %v1080_v4 = vld [vmem:[#allocation7 + $0x10e8] sm:$0xff] }
 0x3d4   :  { %7162 = vmatpush2.bf16.msra.mxu1 %v9106_v58  ;;  %v1204_v9 = vld [vmem:[#allocation7 + $0x14c8] sm:$0xff]  ;;  %v9306_v19 = vcombine.low %v1076_v31, %v1080_v4 }
 0x3d5   :  { %7163 = vmatprep.subr.bf16.mxu1 %v9099_v42  ;;  %v9322_v42 = vcombine.low %v1092_v37, %v1096_v32  ;;  %v1068_v13 = vld [vmem:[#allocation7 + $0x1088] sm:$0xff] }
 0x3d6   :  { %7203 = vmatpush2.bf16.msra.mxu0 %v9234_v62  ;;  %v1212_v62 = vld [vmem:[#allocation7 + $0x1508] sm:$0xff] }
 0x3d7   :  { %7204 = vmatprep.subr.bf16.mxu0 %v9227_v2  ;;  %v9315_v2 = vcombine.high %v1084_v35, %v1088_v54  ;;  %v9442_v12 = vcombine.low %v1212_v62, %v1216_v0  ;;  %v1196_v20 = vld [vmem:[#allocation7 + $0x1488] sm:$0xff] }
 0x3d8   :  { %7164 = vmatpush2.bf16.msra.mxu1 %v9098_v3  ;;  %v9450_v3 = vcombine.low %v1220_v48, %v1224_v49  ;;  %v1188_v32 = vld [vmem:[#allocation7 + $0x1448] sm:$0xff] }
 0x3d9   :  { %7165 = vmatprep.subr.bf16.mxu1 %v9091_v6  ;;  %v1056_v48 = vld [vmem:[#allocation7 + $0x1028] sm:$0xff] }
 0x3da   :  { %7205 = vmatpush2.bf16.msra.mxu0 %v9226_v7  ;;  %v9443_v7 = vcombine.high %v1212_v62, %v1216_v0  ;;  %v1172_v35 = vld [vmem:[#allocation7 + $0x13c8] sm:$0xff] }
 0x3db   :  { %7206 = vmatprep.subr.bf16.mxu0 %v9219_v10  ;;  %v1208_v10 = vld [vmem:[#allocation7 + $0x14e8] sm:$0xff] }
 0x3dc   :  { %7166 = vmatpush2.bf16.msra.mxu1 %v9090_v11  ;;  %v9307_v11 = vcombine.high %v1076_v31, %v1080_v4  ;;  %v1176_v54 = vld [vmem:[#allocation7 + $0x13e8] sm:$0xff] }
 0x3dd   :  { %7217 = vmatprep.subr.bf16.mxu1 %v9339_v14  ;;  %v1072_v14 = vld [vmem:[#allocation7 + $0x10a8] sm:$0xff]  ;;  %v9403_v62 = vcombine.high %v1172_v35, %v1176_v54 }
 0x3de   :  { %7207 = vmatpush2.bf16.msra.mxu0 %v9218_v16  ;;  %v9435_v16 = vcombine.high %v1204_v9, %v1208_v10  ;;  %v9298_v37 = vcombine.low %v1068_v13, %v1072_v14  ;;  %v1292_v31 = vld [vmem:[#allocation7 + $0x1788] sm:$0xff] }
 0x3df   :  { %v6923_v45 = vpop.f32.mrf.mxu1  ;;  %7168 = vmatmul.mubr.bf16.vlgmr.msra.gmra.mxu1 %v10408_v57  ;;  %7258 = vmatprep.subr.bf16.mxu0 %v9467_v21  ;;  %v1200_v21 = vld [vmem:[#allocation7 + $0x14a8] sm:$0xff] }
 0x3e0   :  { %v6924_v39 = vadd.f32 %v6923_v45, %v10465_v51  ;;  %7218 = vmatpush1.bf16.msra.mxu1 %v9338_v25  ;;  %7249 = vmatprep.mubr.bf16.mxu1 %v10412_v59  ;;  %v9458_v51 = vcombine.low %v1228_v26, %v1232_v28  ;;  %v9299_v25 = vcombine.high %v1068_v13, %v1072_v14  ;;  %v1060_v28 = vld [vmem:[#allocation7 + $0x1048] sm:$0xff] }
 0x3e1   :  { %v6925_v33 = vpop.f32.mrf.mxu1  ;;  %v6964_v47 = vpop.f32.mrf.mxu0  ;;  %7209 = vmatmul.mubr.bf16.vlgmr.msra.gmra.mxu0 %v10415_v63  ;;  %7219 = vmatprep.subr.bf16.mxu1 %v9331_v30  ;;  %v9434_v26 = vcombine.low %v1204_v9, %v1208_v10  ;;  %v1064_v30 = vld [vmem:[#allocation7 + $0x1068] sm:$0xff] }
 0x3e2   :  { %v6926_v53 = vadd.f32 %v6925_v33, %v10468_v55  ;;  %v10475_v29 = vadd.f32 %v6964_v47, %v6924_v39  ;;  %7259 = vmatpush1.bf16.msra.mxu0 %v9466_v23  ;;  %7290 = vmatprep.mubr.bf16.mxu0 %v10418_v5  ;;  %v9427_v23 = vcombine.high %v1196_v20, %v1200_v21  ;;  %v1192_v45 = vld [vmem:[#allocation7 + $0x1468] sm:$0xff] }
 0x3e3   :  { %v6927_v56 = vpop.f32.mrf.mxu1  ;;  %v6966_v58 = vpop.f32.mrf.mxu0  ;;  %7260 = vmatprep.subr.bf16.mxu0 %v9459_v38  ;;  %v9291_v38 = vcombine.high %v1060_v28, %v1064_v30  ;;  %v9426_v39 = vcombine.low %v1196_v20, %v1200_v21  ;;  %v9419_v49 = vcombine.high %v1188_v32, %v1192_v45  ;;  %v9290_v33 = vcombine.low %v1060_v28, %v1064_v30  ;;  %v1180_v47 = vld [vmem:[#allocation7 + $0x1408] sm:$0xff] }
 0x3e4   :  { %v10478_v61 = vadd.f32 %v6966_v58, %v6926_v53  ;;  %7220 = vmatpush1.bf16.msra.mxu1 %v9330_v46  ;;  %v1052_v46 = vld [vmem:[#allocation7 + $0x1008] sm:$0xff] }
 0x3e5   :  { %v6928_v1 = vpop.f32.mrf.mxu1  ;;  %v6968_v55 = vpop.f32.mrf.mxu0  ;;  %7221 = vmatprep.subr.bf16.mxu1 %v9323_v52  ;;  %v1184_v52 = vld [vmem:[#allocation7 + $0x1428] sm:$0xff]  ;;  %v9283_v53 = vcombine.high %v1052_v46, %v1056_v48  ;;  %v9282_v58 = vcombine.low %v1052_v46, %v1056_v48 }
 0x3e6   :  { %7261 = vmatpush1.bf16.msra.mxu0 %v9458_v51  ;;  %v9418_v51 = vcombine.low %v1188_v32, %v1192_v45  ;;  %v9411_v56 = vcombine.high %v1180_v47, %v1184_v52  ;;  %v9410_v0 = vcombine.low %v1180_v47, %v1184_v52  ;;  %v1164_v1 = vld [vmem:[#allocation7 + $0x1388] sm:$0xff] }
 0x3e7   :  { %v6969_v6 = vpop.f32.mrf.mxu0  ;;  %7262 = vmatprep.subr.bf16.mxu0 %v9451_v60  ;;  %v1300_v60 = vld [vmem:[#allocation7 + $0x17c8] sm:$0xff] }
 0x3e8   :  { %7222 = vmatpush1.bf16.msra.mxu1 %v9322_v42  ;;  %v1304_v42 = vld [vmem:[#allocation7 + $0x17e8] sm:$0xff] }
 0x3e9   :  { %7223 = vmatprep.subr.bf16.mxu1 %v9315_v2  ;;  %v1168_v55 = vld [vmem:[#allocation7 + $0x13a8] sm:$0xff]  ;;  %v9531_v2 = vcombine.high %v1300_v60, %v1304_v42 }
 0x3ea   :  { %7263 = vmatpush1.bf16.msra.mxu0 %v9450_v3  ;;  %v9402_v3 = vcombine.low %v1172_v35, %v1176_v54  ;;  %v1296_v4 = vld [vmem:[#allocation7 + $0x17a8] sm:$0xff]  ;;  %v9395_v6 = vcombine.high %v1164_v1, %v1168_v55 }
 0x3eb   :  { %7264 = vmatprep.subr.bf16.mxu0 %v9443_v7  ;;  %v9530_v7 = vcombine.low %v1300_v60, %v1304_v42  ;;  %v1160_v9 = vld [vmem:[#allocation7 + $0x1368] sm:$0xff]  ;;  %v9523_v10 = vcombine.high %v1292_v31, %v1296_v4 }
 0x3ec   :  { %7224 = vmatpush1.bf16.msra.mxu1 %v9314_v8  ;;  %v1156_v8 = vld [vmem:[#allocation7 + $0x1348] sm:$0xff] }
 0x3ed   :  { %7225 = vmatprep.subr.bf16.mxu1 %v9307_v11  ;;  %v9394_v11 = vcombine.low %v1164_v1, %v1168_v55  ;;  %v1288_v13 = vld [vmem:[#allocation7 + $0x1768] sm:$0xff]  ;;  %v9387_v14 = vcombine.high %v1156_v8, %v1160_v9 }
 0x3ee   :  { %7265 = vmatpush1.bf16.msra.mxu0 %v9442_v12  ;;  %v1284_v12 = vld [vmem:[#allocation7 + $0x1748] sm:$0xff] }
 0x3ef   :  { %7266 = vmatprep.subr.bf16.mxu0 %v9435_v16  ;;  %v9522_v16 = vcombine.low %v1292_v31, %v1296_v4  ;;  %v1152_v20 = vld [vmem:[#allocation7 + $0x1328] sm:$0xff]  ;;  %v9515_v21 = vcombine.high %v1284_v12, %v1288_v13 }
 0x3f0   :  { %7226 = vmatpush1.bf16.msra.mxu1 %v9306_v19  ;;  %v1148_v19 = vld [vmem:[#allocation7 + $0x1308] sm:$0xff] }
 0x3f1   :  { %7227 = vmatprep.subr.bf16.mxu1 %v9299_v25  ;;  %v9386_v25 = vcombine.low %v1156_v8, %v1160_v9  ;;  %v1280_v28 = vld [vmem:[#allocation7 + $0x1728] sm:$0xff]  ;;  %v9379_v30 = vcombine.high %v1148_v19, %v1152_v20 }
 0x3f2   :  { %7267 = vmatpush1.bf16.msra.mxu0 %v9434_v26  ;;  %v1276_v26 = vld [vmem:[#allocation7 + $0x1708] sm:$0xff] }
 0x3f3   :  { %7268 = vmatprep.subr.bf16.mxu0 %v9427_v23  ;;  %v9514_v23 = vcombine.low %v1284_v12, %v1288_v13  ;;  %v1144_v32 = vld [vmem:[#allocation7 + $0x12e8] sm:$0xff]  ;;  %v9507_v45 = vcombine.high %v1276_v26, %v1280_v28 }
 0x3f4   :  { %7228 = vmatpush1.bf16.msra.mxu1 %v9298_v37  ;;  %v1140_v37 = vld [vmem:[#allocation7 + $0x12c8] sm:$0xff] }
 0x3f5   :  { %7229 = vmatprep.subr.bf16.mxu1 %v9291_v38  ;;  %v9378_v38 = vcombine.low %v1148_v19, %v1152_v20  ;;  %v1272_v46 = vld [vmem:[#allocation7 + $0x16e8] sm:$0xff]  ;;  %v9371_v48 = vcombine.high %v1140_v37, %v1144_v32 }
 0x3f6   :  { %7269 = vmatpush1.bf16.msra.mxu0 %v9426_v39  ;;  %v1268_v39 = vld [vmem:[#allocation7 + $0x16c8] sm:$0xff] }
 0x3f7   :  { %7270 = vmatprep.subr.bf16.mxu0 %v9419_v49  ;;  %v9506_v49 = vcombine.low %v1276_v26, %v1280_v28  ;;  %v1136_v47 = vld [vmem:[#allocation7 + $0x12a8] sm:$0xff]  ;;  %v9499_v52 = vcombine.high %v1268_v39, %v1272_v46 }
 0x3f8   :  { %7230 = vmatpush1.bf16.msra.mxu1 %v9290_v33  ;;  %v1132_v33 = vld [vmem:[#allocation7 + $0x1288] sm:$0xff] }
 0x3f9   :  { %7231 = vmatprep.subr.bf16.mxu1 %v9283_v53  ;;  %v9370_v53 = vcombine.low %v1140_v37, %v1144_v32  ;;  %v1264_v35 = vld [vmem:[#allocation7 + $0x16a8] sm:$0xff]  ;;  %v9363_v54 = vcombine.high %v1132_v33, %v1136_v47 }
 0x3fa   :  { %7271 = vmatpush1.bf16.msra.mxu0 %v9418_v51  ;;  %v1260_v51 = vld [vmem:[#allocation7 + $0x1688] sm:$0xff] }
 0x3fb   :  { %7272 = vmatprep.subr.bf16.mxu0 %v9411_v56  ;;  %v9498_v56 = vcombine.low %v1268_v39, %v1272_v46  ;;  %v1128_v60 = vld [vmem:[#allocation7 + $0x1268] sm:$0xff]  ;;  %v9491_v42 = vcombine.high %v1260_v51, %v1264_v35 }
 0x3fc   :  { %7232 = vmatpush1.bf16.msra.mxu1 %v9282_v58  ;;  %v1124_v58 = vld [vmem:[#allocation7 + $0x1248] sm:$0xff] }
 0x3fd   :  { %7233 = vmatprep.subr.bf16.mxu1 %v9403_v62  ;;  %v9362_v62 = vcombine.low %v1132_v33, %v1136_v47  ;;  %v1256_v1 = vld [vmem:[#allocation7 + $0x1668] sm:$0xff]  ;;  %v9355_v55 = vcombine.high %v1124_v58, %v1128_v60 }
 0x3fe   :  { %7273 = vmatpush1.bf16.msra.mxu0 %v9410_v0  ;;  %v1252_v0 = vld [vmem:[#allocation7 + $0x1648] sm:$0xff] }
 0x3ff   :  { %7274 = vmatprep.subr.bf16.mxu0 %v9531_v2  ;;  %v9490_v2 = vcombine.low %v1260_v51, %v1264_v35  ;;  %v1120_v31 = vld [vmem:[#allocation7 + $0x1228] sm:$0xff]  ;;  %v9483_v4 = vcombine.high %v1252_v0, %v1256_v1 }
 0x400   :  { %7234 = vmatpush2.bf16.msra.mxu1 %v9402_v3  ;;  %v1116_v3 = vld [vmem:[#allocation7 + $0x1208] sm:$0xff] }
 0x401   :  { %7235 = vmatprep.subr.bf16.mxu1 %v9395_v6  ;;  %v9354_v6 = vcombine.low %v1124_v58, %v1128_v60  ;;  %v1248_v8 = vld [vmem:[#allocation7 + $0x1628] sm:$0xff]  ;;  %v9347_v9 = vcombine.high %v1116_v3, %v1120_v31 }
 0x402   :  { %7275 = vmatpush2.bf16.msra.mxu0 %v9530_v7  ;;  %v1244_v7 = vld [vmem:[#allocation7 + $0x1608] sm:$0xff] }
 0x403   :  { %7276 = vmatprep.subr.bf16.mxu0 %v9523_v10  ;;  %v9482_v10 = vcombine.low %v1252_v0, %v1256_v1  ;;  %v1368_v12 = vld [vmem:[#allocation7 + $0x19e8] sm:$0xff]  ;;  %v9475_v13 = vcombine.high %v1244_v7, %v1248_v8 }
 0x404   :  { %7236 = vmatpush2.bf16.msra.mxu1 %v9394_v11  ;;  %v1364_v11 = vld [vmem:[#allocation7 + $0x19c8] sm:$0xff] }
 0x405   :  { %7237 = vmatprep.subr.bf16.mxu1 %v9387_v14  ;;  %v9346_v14 = vcombine.low %v1116_v3, %v1120_v31  ;;  %v1496_v19 = vld [vmem:[#allocation7 + $0x1de8] sm:$0xff]  ;;  %v9595_v20 = vcombine.high %v1364_v11, %v1368_v12 }
 0x406   :  { %7277 = vmatpush2.bf16.msra.mxu0 %v9522_v16  ;;  %v1492_v16 = vld [vmem:[#allocation7 + $0x1dc8] sm:$0xff] }
 0x407   :  { %7278 = vmatprep.subr.bf16.mxu0 %v9515_v21  ;;  %v9474_v21 = vcombine.low %v1244_v7, %v1248_v8  ;;  %v1360_v26 = vld [vmem:[#allocation7 + $0x19a8] sm:$0xff]  ;;  %v9723_v28 = vcombine.high %v1492_v16, %v1496_v19 }
 0x408   :  { %7238 = vmatpush2.bf16.msra.mxu1 %v9386_v25  ;;  %v1356_v25 = vld [vmem:[#allocation7 + $0x1988] sm:$0xff] }
 0x409   :  { %7239 = vmatprep.subr.bf16.mxu1 %v9379_v30  ;;  %v9594_v30 = vcombine.low %v1364_v11, %v1368_v12  ;;  %v1488_v37 = vld [vmem:[#allocation7 + $0x1da8] sm:$0xff]  ;;  %v9587_v32 = vcombine.high %v1356_v25, %v1360_v26  ;;  %v9586_v33 = vcombine.low %v1356_v25, %v1360_v26 }
 0x40a   :  { %7279 = vmatpush2.bf16.msra.mxu0 %v9514_v23  ;;  %v1484_v23 = vld [vmem:[#allocation7 + $0x1d88] sm:$0xff] }
 0x40b   :  { %7280 = vmatprep.subr.bf16.mxu0 %v9507_v45  ;;  %v9722_v45 = vcombine.low %v1492_v16, %v1496_v19  ;;  %v1352_v39 = vld [vmem:[#allocation7 + $0x1968] sm:$0xff] }
 0x40c   :  { %7240 = vmatpush2.bf16.msra.mxu1 %v9378_v38  ;;  %v1348_v38 = vld [vmem:[#allocation7 + $0x1948] sm:$0xff] }
 0x40d   :  { %7241 = vmatprep.subr.bf16.mxu1 %v9371_v48  ;;  %v9715_v48 = vcombine.high %v1484_v23, %v1488_v37  ;;  %v1476_v47 = vld [vmem:[#allocation7 + $0x1d48] sm:$0xff]  ;;  %v9579_v35 = vcombine.high %v1348_v38, %v1352_v39 }
 0x40e   :  { %7281 = vmatpush2.bf16.msra.mxu0 %v9506_v49  ;;  %v1340_v58 = vld [vmem:[#allocation7 + $0x1908] sm:$0xff] }
 0x40f   :  { %7282 = vmatprep.subr.bf16.mxu0 %v9499_v52  ;;  %v1480_v52 = vld [vmem:[#allocation7 + $0x1d68] sm:$0xff] }
 0x410   :  { %7242 = vmatpush2.bf16.msra.mxu1 %v9370_v53  ;;  %v1344_v60 = vld [vmem:[#allocation7 + $0x1928] sm:$0xff]  ;;  %v9707_v0 = vcombine.high %v1476_v47, %v1480_v52 }
 0x411   :  { %7243 = vmatprep.subr.bf16.mxu1 %v9363_v54  ;;  %v1472_v3 = vld [vmem:[#allocation7 + $0x1d28] sm:$0xff]  ;;  %v9570_v11 = vcombine.low %v1340_v58, %v1344_v60 }
 0x412   :  { %7283 = vmatpush2.bf16.msra.mxu0 %v9498_v56  ;;  %v1332_v7 = vld [vmem:[#allocation7 + $0x18c8] sm:$0xff] }
 0x413   :  { %7284 = vmatprep.subr.bf16.mxu0 %v9491_v42  ;;  %v1336_v8 = vld [vmem:[#allocation7 + $0x18e8] sm:$0xff] }
 0x414   :  { %7244 = vmatpush2.bf16.msra.mxu1 %v9362_v62  ;;  %v1460_v12 = vld [vmem:[#allocation7 + $0x1cc8] sm:$0xff]  ;;  %v9562_v25 = vcombine.low %v1332_v7, %v1336_v8 }
 0x415   :  { %7245 = vmatprep.subr.bf16.mxu1 %v9355_v55  ;;  %v9578_v55 = vcombine.low %v1348_v38, %v1352_v39  ;;  %v1324_v19 = vld [vmem:[#allocation7 + $0x1888] sm:$0xff] }
 0x416   :  { %7285 = vmatpush2.bf16.msra.mxu0 %v9490_v2  ;;  %v1468_v2 = vld [vmem:[#allocation7 + $0x1d08] sm:$0xff] }
 0x417   :  { %7286 = vmatprep.subr.bf16.mxu0 %v9483_v4  ;;  %v9571_v4 = vcombine.high %v1340_v58, %v1344_v60  ;;  %v9698_v16 = vcombine.low %v1468_v2, %v1472_v3  ;;  %v1452_v26 = vld [vmem:[#allocation7 + $0x1c88] sm:$0xff] }
 0x418   :  { %7246 = vmatpush2.bf16.msra.mxu1 %v9354_v6  ;;  %v9706_v6 = vcombine.low %v1476_v47, %v1480_v52  ;;  %v1444_v39 = vld [vmem:[#allocation7 + $0x1c48] sm:$0xff] }
 0x419   :  { %7247 = vmatprep.subr.bf16.mxu1 %v9347_v9  ;;  %v1312_v47 = vld [vmem:[#allocation7 + $0x1828] sm:$0xff] }
 0x41a   :  { %7287 = vmatpush2.bf16.msra.mxu0 %v9482_v10  ;;  %v9699_v10 = vcombine.high %v1468_v2, %v1472_v3  ;;  %v1428_v58 = vld [vmem:[#allocation7 + $0x1bc8] sm:$0xff] }
 0x41b   :  { %7288 = vmatprep.subr.bf16.mxu0 %v9475_v13  ;;  %v1464_v13 = vld [vmem:[#allocation7 + $0x1ce8] sm:$0xff] }
 0x41c   :  { %7248 = vmatpush2.bf16.msra.mxu1 %v9346_v14  ;;  %v9563_v14 = vcombine.high %v1332_v7, %v1336_v8  ;;  %v1432_v60 = vld [vmem:[#allocation7 + $0x1be8] sm:$0xff] }
 0x41d   :  { %7299 = vmatprep.subr.bf16.mxu1 %v9595_v20  ;;  %v1328_v20 = vld [vmem:[#allocation7 + $0x18a8] sm:$0xff]  ;;  %v9659_v2 = vcombine.high %v1428_v58, %v1432_v60 }
 0x41e   :  { %7289 = vmatpush2.bf16.msra.mxu0 %v9474_v21  ;;  %v9691_v21 = vcombine.high %v1460_v12, %v1464_v13  ;;  %v9554_v38 = vcombine.low %v1324_v19, %v1328_v20  ;;  %v1548_v7 = vld [vmem:[#allocation7 + $0x1f88] sm:$0xff] }
 0x41f   :  { %v7005_v46 = vpop.f32.mrf.mxu1  ;;  %7250 = vmatmul.mubr.bf16.vlgmr.msra.gmra.mxu1 %v10428_v40  ;;  %7340 = vmatprep.subr.bf16.mxu0 %v9723_v28  ;;  %v1456_v28 = vld [vmem:[#allocation7 + $0x1ca8] sm:$0xff] }
 0x420   :  { %v7006_v49 = vadd.f32 %v7005_v46, %v10475_v29  ;;  %7300 = vmatpush1.bf16.msra.mxu1 %v9594_v30  ;;  %7331 = vmatprep.mubr.bf16.mxu1 %v10432_v44  ;;  %v9714_v29 = vcombine.low %v1484_v23, %v1488_v37  ;;  %v9555_v30 = vcombine.high %v1324_v19, %v1328_v20  ;;  %v1316_v37 = vld [vmem:[#allocation7 + $0x1848] sm:$0xff] }
 0x421   :  { %v7007_v53 = vpop.f32.mrf.mxu1  ;;  %v7046_v51 = vpop.f32.mrf.mxu0  ;;  %7291 = vmatmul.mubr.bf16.vlgmr.msra.gmra.mxu0 %v10435_v41  ;;  %7301 = vmatprep.subr.bf16.mxu1 %v9587_v32  ;;  %v9690_v23 = vcombine.low %v1460_v12, %v1464_v13  ;;  %v1320_v32 = vld [vmem:[#allocation7 + $0x1868] sm:$0xff] }
 0x422   :  { %v7008_v54 = vadd.f32 %v7007_v53, %v10478_v61  ;;  %v10485_v56 = vadd.f32 %v7046_v51, %v7006_v49  ;;  %7341 = vmatpush1.bf16.msra.mxu0 %v9722_v45  ;;  %7372 = vmatprep.mubr.bf16.mxu0 %v10438_v22  ;;  %v9683_v45 = vcombine.high %v1452_v26, %v1456_v28  ;;  %v1448_v46 = vld [vmem:[#allocation7 + $0x1c68] sm:$0xff] }
 0x423   :  { %v7009_v42 = vpop.f32.mrf.mxu1  ;;  %v7048_v62 = vpop.f32.mrf.mxu0  ;;  %7342 = vmatprep.subr.bf16.mxu0 %v9715_v48  ;;  %v9547_v48 = vcombine.high %v1316_v37, %v1320_v32  ;;  %v9682_v49 = vcombine.low %v1452_v26, %v1456_v28  ;;  %v9675_v52 = vcombine.high %v1444_v39, %v1448_v46  ;;  %v9546_v53 = vcombine.low %v1316_v37, %v1320_v32  ;;  %v1436_v51 = vld [vmem:[#allocation7 + $0x1c08] sm:$0xff] }
 0x424   :  { %v10488_v1 = vadd.f32 %v7048_v62, %v7008_v54  ;;  %7302 = vmatpush1.bf16.msra.mxu1 %v9586_v33  ;;  %v1308_v33 = vld [vmem:[#allocation7 + $0x1808] sm:$0xff] }
 0x425   :  { %v7010_v31 = vpop.f32.mrf.mxu1  ;;  %v7050_v61 = vpop.f32.mrf.mxu0  ;;  %7303 = vmatprep.subr.bf16.mxu1 %v9579_v35  ;;  %v1440_v35 = vld [vmem:[#allocation7 + $0x1c28] sm:$0xff]  ;;  %v9539_v54 = vcombine.high %v1308_v33, %v1312_v47  ;;  %v9538_v62 = vcombine.low %v1308_v33, %v1312_v47 }
 0x426   :  { %7343 = vmatpush1.bf16.msra.mxu0 %v9714_v29  ;;  %v9674_v29 = vcombine.low %v1444_v39, %v1448_v46  ;;  %v9667_v42 = vcombine.high %v1436_v51, %v1440_v35  ;;  %v9666_v3 = vcombine.low %v1436_v51, %v1440_v35  ;;  %v1420_v31 = vld [vmem:[#allocation7 + $0x1b88] sm:$0xff] }
 0x427   :  { %v7051_v9 = vpop.f32.mrf.mxu0  ;;  %7344 = vmatprep.subr.bf16.mxu0 %v9707_v0  ;;  %v1556_v0 = vld [vmem:[#allocation7 + $0x1fc8] sm:$0xff] }
 0x428   :  { %7304 = vmatpush1.bf16.msra.mxu1 %v9578_v55  ;;  %v1560_v55 = vld [vmem:[#allocation7 + $0x1fe8] sm:$0xff] }
 0x429   :  { %7305 = vmatprep.subr.bf16.mxu1 %v9571_v4  ;;  %v1424_v61 = vld [vmem:[#allocation7 + $0x1ba8] sm:$0xff]  ;;  %v9787_v4 = vcombine.high %v1556_v0, %v1560_v55 }
 0x42a   :  { %7345 = vmatpush1.bf16.msra.mxu0 %v9706_v6  ;;  %v9658_v6 = vcombine.low %v1428_v58, %v1432_v60  ;;  %v1552_v8 = vld [vmem:[#allocation7 + $0x1fa8] sm:$0xff]  ;;  %v9651_v9 = vcombine.high %v1420_v31, %v1424_v61 }
 0x42b   :  { %7346 = vmatprep.subr.bf16.mxu0 %v9699_v10  ;;  %v9786_v10 = vcombine.low %v1556_v0, %v1560_v55  ;;  %v1416_v12 = vld [vmem:[#allocation7 + $0x1b68] sm:$0xff]  ;;  %v9779_v13 = vcombine.high %v1548_v7, %v1552_v8 }
 0x42c   :  { %7306 = vmatpush1.bf16.msra.mxu1 %v9570_v11  ;;  %v1412_v11 = vld [vmem:[#allocation7 + $0x1b48] sm:$0xff] }
 0x42d   :  { %7307 = vmatprep.subr.bf16.mxu1 %v9563_v14  ;;  %v9650_v14 = vcombine.low %v1420_v31, %v1424_v61  ;;  %v1544_v19 = vld [vmem:[#allocation7 + $0x1f68] sm:$0xff]  ;;  %v9643_v20 = vcombine.high %v1412_v11, %v1416_v12 }
 0x42e   :  { %7347 = vmatpush1.bf16.msra.mxu0 %v9698_v16  ;;  %v1540_v16 = vld [vmem:[#allocation7 + $0x1f48] sm:$0xff] }
 0x42f   :  { %7348 = vmatprep.subr.bf16.mxu0 %v9691_v21  ;;  %v9778_v21 = vcombine.low %v1548_v7, %v1552_v8  ;;  %v1408_v26 = vld [vmem:[#allocation7 + $0x1b28] sm:$0xff]  ;;  %v9771_v28 = vcombine.high %v1540_v16, %v1544_v19 }
 0x430   :  { %7308 = vmatpush1.bf16.msra.mxu1 %v9562_v25  ;;  %v1404_v25 = vld [vmem:[#allocation7 + $0x1b08] sm:$0xff] }
 0x431   :  { %7309 = vmatprep.subr.bf16.mxu1 %v9555_v30  ;;  %v9642_v30 = vcombine.low %v1412_v11, %v1416_v12  ;;  %v1536_v37 = vld [vmem:[#allocation7 + $0x1f28] sm:$0xff]  ;;  %v9635_v32 = vcombine.high %v1404_v25, %v1408_v26 }
 0x432   :  { %7349 = vmatpush1.bf16.msra.mxu0 %v9690_v23  ;;  %v1532_v23 = vld [vmem:[#allocation7 + $0x1f08] sm:$0xff] }
 0x433   :  { %7350 = vmatprep.subr.bf16.mxu0 %v9683_v45  ;;  %v9770_v45 = vcombine.low %v1540_v16, %v1544_v19  ;;  %v1400_v39 = vld [vmem:[#allocation7 + $0x1ae8] sm:$0xff]  ;;  %v9763_v46 = vcombine.high %v1532_v23, %v1536_v37  ;;  %v601_v16 = vld [vmem:[#allocation7 + $0x1f0] sm:$0xff] }
 0x434   :  { %7310 = vmatpush1.bf16.msra.mxu1 %v9554_v38  ;;  %v1396_v38 = vld [vmem:[#allocation7 + $0x1ac8] sm:$0xff] }
 0x435   :  { %7311 = vmatprep.subr.bf16.mxu1 %v9547_v48  ;;  %v9634_v48 = vcombine.low %v1404_v25, %v1408_v26  ;;  %v1528_v33 = vld [vmem:[#allocation7 + $0x1ee8] sm:$0xff]  ;;  %v9627_v47 = vcombine.high %v1396_v38, %v1400_v39  ;;  %v725_v25 = vld [vmem:[#allocation7 + $0x5d0] sm:$0xff] }
 0x436   :  { %7351 = vmatpush1.bf16.msra.mxu0 %v9682_v49  ;;  %v1524_v49 = vld [vmem:[#allocation7 + $0x1ec8] sm:$0xff]  ;;  %v729_v26 = vld [vmem:[#allocation7 + $0x5f0] sm:$0xff] }
 0x437   :  { %7352 = vmatprep.subr.bf16.mxu0 %v9675_v52  ;;  %v9762_v52 = vcombine.low %v1532_v23, %v1536_v37  ;;  %v1392_v51 = vld [vmem:[#allocation7 + $0x1aa8] sm:$0xff]  ;;  %v9755_v35 = vcombine.high %v1524_v49, %v1528_v33  ;;  %v1579_v23 = vsub.s32 3, %v10365_v50  ;;  %v589_v37 = vld [vmem:[#allocation7 + $0x190] sm:$0xff] }
 0x438   :  { %7312 = vmatpush1.bf16.msra.mxu1 %v9546_v53  ;;  %v1388_v53 = vld [vmem:[#allocation7 + $0x1a88] sm:$0xff] }
 0x439   :  { %7313 = vmatprep.subr.bf16.mxu1 %v9539_v54  ;;  %v9626_v54 = vcombine.low %v1396_v38, %v1400_v39  ;;  %v1520_v58 = vld [vmem:[#allocation7 + $0x1ea8] sm:$0xff]  ;;  %v9619_v60 = vcombine.high %v1388_v53, %v1392_v51  ;;  %v10061_v38 = vld [vmem:[#allocation8] sm:$0xff] }
 0x43a   :  { %7353 = vmatpush1.bf16.msra.mxu0 %v9674_v29  ;;  %v1516_v29 = vld [vmem:[#allocation7 + $0x1e88] sm:$0xff] }
 0x43b   :  { %7354 = vmatprep.subr.bf16.mxu0 %v9667_v42  ;;  %v9754_v42 = vcombine.low %v1524_v49, %v1528_v33  ;;  %v1384_v0 = vld [vmem:[#allocation7 + $0x1a68] sm:$0xff]  ;;  %v9747_v55 = vcombine.high %v1516_v29, %v1520_v58  ;;  %v721_v49 = vld [vmem:[#allocation7 + $0x5b0] sm:$0xff] }
 0x43c   :  { %7314 = vmatpush1.bf16.msra.mxu1 %v9538_v62  ;;  %v1380_v62 = vld [vmem:[#allocation7 + $0x1a48] sm:$0xff] }
 0x43d   :  { %7315 = vmatprep.subr.bf16.mxu1 %v9659_v2  ;;  %v9618_v2 = vcombine.low %v1388_v53, %v1392_v51  ;;  %v1512_v31 = vld [vmem:[#allocation7 + $0x1e68] sm:$0xff]  ;;  %v9611_v61 = vcombine.high %v1380_v62, %v1384_v0  ;;  %v581_v53 = vld [vmem:[#allocation7 + $0x150] sm:$0xff] }
 0x43e   :  { %7355 = vmatpush1.bf16.msra.mxu0 %v9666_v3  ;;  %v1508_v3 = vld [vmem:[#allocation7 + $0x1e48] sm:$0xff]  ;;  %v585_v51 = vld [vmem:[#allocation7 + $0x170] sm:$0xff] }
 0x43f   :  { %7356 = vmatprep.subr.bf16.mxu0 %v9787_v4  ;;  %v9746_v4 = vcombine.low %v1516_v29, %v1520_v58  ;;  %v1376_v7 = vld [vmem:[#allocation7 + $0x1a28] sm:$0xff]  ;;  %v9739_v8 = vcombine.high %v1508_v3, %v1512_v31 }
 0x440   :  { %7316 = vmatpush2.bf16.msra.mxu1 %v9658_v6  ;;  %v1372_v6 = vld [vmem:[#allocation7 + $0x1a08] sm:$0xff] }
 0x441   :  { %7317 = vmatprep.subr.bf16.mxu1 %v9651_v9  ;;  %v9610_v9 = vcombine.low %v1380_v62, %v1384_v0  ;;  %v1504_v11 = vld [vmem:[#allocation7 + $0x1e28] sm:$0xff]  ;;  %v9603_v12 = vcombine.high %v1372_v6, %v1376_v7 }
 0x442   :  { %7357 = vmatpush2.bf16.msra.mxu0 %v9786_v10  ;;  %v1500_v10 = vld [vmem:[#allocation7 + $0x1e08] sm:$0xff] }
 0x443   :  { %7358 = vmatprep.subr.bf16.mxu0 %v9779_v13  ;;  %v9738_v13 = vcombine.low %v1508_v3, %v1512_v31  ;;  %v9731_v19 = vcombine.high %v1500_v10, %v1504_v11 }
 0x444   :  { %7318 = vmatpush2.bf16.msra.mxu1 %v9650_v14  ;;  %v597_v14 = vld [vmem:[#allocation7 + $0x1d0] sm:$0xff] }
 0x445   :  { %7319 = vmatprep.subr.bf16.mxu1 %v9643_v20  ;;  %v9602_v20 = vcombine.low %v1372_v6, %v1376_v7 }
 0x446   :  { %7359 = vmatpush2.bf16.msra.mxu0 %v9778_v21  ;;  %v1575_v21 = vsub.s32 2, %v10365_v50 }
 0x447   :  { %7360 = vmatprep.subr.bf16.mxu0 %v9771_v28  ;;  %v8829_v28 = vcombine.high %v597_v14, %v601_v16 }
 0x448   :  { %7320 = vmatpush2.bf16.msra.mxu1 %v9642_v30  ;;  %v9730_v30 = vcombine.low %v1500_v10, %v1504_v11  ;;  %v1576_v39 = vrot.slane %v10061_v38, %v1575_v21  ;;  %v8812_v10 = vcombine.low %v581_v53, %v585_v51  ;;  %v701_v11 = vld [vmem:[#allocation7 + $0x510] sm:$0xff] }
 0x449   :  { %7321 = vmatprep.subr.bf16.mxu1 %v9635_v32  ;;  %v593_v32 = vld [vmem:[#allocation7 + $0x1b0] sm:$0xff] }
 0x44a   :  { %7361 = vmatpush2.bf16.msra.mxu0 %v9770_v45  ;;  %v8957_v45 = vcombine.high %v725_v25, %v729_v26  ;;  %v8821_v33 = vcombine.high %v589_v37, %v593_v32  ;;  %v8820_v58 = vcombine.low %v589_v37, %v593_v32  ;;  %v569_v21 = vld [vmem:[#allocation7 + $0xf0] sm:$0xff] }
 0x44b   :  { %7362 = vmatprep.subr.bf16.mxu0 %v9763_v46  ;;  %v8828_v46 = vcombine.low %v597_v14, %v601_v16 }
 0x44c   :  { %7322 = vmatpush2.bf16.msra.mxu1 %v9634_v48  ;;  %v717_v48 = vld [vmem:[#allocation7 + $0x590] sm:$0xff] }
 0x44d   :  { %7323 = vmatprep.subr.bf16.mxu1 %v9627_v47  ;;  %v1580_v47 = vrot.slane %v10061_v38, %v1579_v23  ;;  %v8948_v31 = vcombine.low %v717_v48, %v721_v49  ;;  %v697_v23 = vld [vmem:[#allocation7 + $0x4f0] sm:$0xff] }
 0x44e   :  { %7363 = vmatpush2.bf16.msra.mxu0 %v9762_v52  ;;  %v8956_v52 = vcombine.low %v725_v25, %v729_v26  ;;  %v561_v38 = vld [vmem:[#allocation7 + $0xb0] sm:$0xff] }
 0x44f   :  { %7364 = vmatprep.subr.bf16.mxu0 %v9755_v35 }
 0x450   :  { %7324 = vmatpush2.bf16.msra.mxu1 %v9626_v54  ;;  %v8949_v54 = vcombine.high %v717_v48, %v721_v49  ;;  %v685_v48 = vld [vmem:[#allocation7 + $0x490] sm:$0xff] }
 0x451   :  { %7325 = vmatprep.subr.bf16.mxu1 %v9619_v60  ;;  %v709_v60 = vld [vmem:[#allocation7 + $0x550] sm:$0xff] }
 0x452   :  { %7365 = vmatpush2.bf16.msra.mxu0 %v9754_v42  ;;  %v713_v42 = vld [vmem:[#allocation7 + $0x570] sm:$0xff] }
 0x453   :  { %7366 = vmatprep.subr.bf16.mxu0 %v9747_v55  ;;  %v8813_v55 = vcombine.high %v581_v53, %v585_v51  ;;  %v689_v49 = vld [vmem:[#allocation7 + $0x4b0] sm:$0xff] }
 0x454   :  { %7326 = vmatpush2.bf16.msra.mxu1 %v9618_v2  ;;  %v553_v53 = vld [vmem:[#allocation7 + $0x70] sm:$0xff]  ;;  %v8917_v51 = vcombine.high %v685_v48, %v689_v49 }
 0x455   :  { %7327 = vmatprep.subr.bf16.mxu1 %v9611_v61  ;;  %v573_v61 = vld [vmem:[#allocation7 + $0x110] sm:$0xff] }
 0x456   :  { %7367 = vmatpush2.bf16.msra.mxu0 %v9746_v4  ;;  %v577_v4 = vld [vmem:[#allocation7 + $0x130] sm:$0xff] }
 0x457   :  { %7368 = vmatprep.subr.bf16.mxu0 %v9739_v8  ;;  %v8941_v8 = vcombine.high %v709_v60, %v713_v42  ;;  %v8805_v16 = vcombine.high %v573_v61, %v577_v4 }
 0x458   :  { %7328 = vmatpush2.bf16.msra.mxu1 %v9610_v9 }
 0x459   :  { %7329 = vmatprep.subr.bf16.mxu1 %v9603_v12  ;;  %v705_v12 = vld [vmem:[#allocation7 + $0x530] sm:$0xff] }
 0x45a   :  { %7369 = vmatpush2.bf16.msra.mxu0 %v9738_v13  ;;  %v8933_v26 = vcombine.high %v701_v11, %v705_v12  ;;  %v8932_v32 = vcombine.low %v701_v11, %v705_v12  ;;  %v789_v11 = vld [vmem:[#allocation7 + $0x7d0] sm:$0xff] }
 0x45b   :  { %7370 = vmatprep.subr.bf16.mxu0 %v9731_v19  ;;  %v8940_v19 = vcombine.low %v709_v60, %v713_v42  ;;  %v8916_v60 = vcombine.low %v685_v48, %v689_v49  ;;  %v541_v42 = vld [vmem:[#allocation7 + $0x10] sm:$0xff] }
 0x45c   :  { %7330 = vmatpush2.bf16.msra.mxu1 %v9602_v20  ;;  %v565_v20 = vld [vmem:[#allocation7 + $0xd0] sm:$0xff] }
 0x45d   :  { %7381 = vmatprep.subr.bf16.mxu1 %v8829_v28  ;;  %v8804_v28 = vcombine.low %v573_v61, %v577_v4  ;;  %v8797_v37 = vcombine.high %v565_v20, %v569_v21  ;;  %v793_v12 = vld [vmem:[#allocation7 + $0x7f0] sm:$0xff] }
 0x45e   :  { %7371 = vmatpush2.bf16.msra.mxu0 %v9730_v30  ;;  %v693_v30 = vld [vmem:[#allocation7 + $0x4d0] sm:$0xff] }
 0x45f   :  { %v7087_v35 = vpop.f32.mrf.mxu1  ;;  %7332 = vmatmul.mubr.bf16.vlgmr.msra.gmra.mxu1 %v10448_v15  ;;  %7422 = vmatprep.subr.bf16.mxu0 %v8957_v45  ;;  %v557_v45 = vld [vmem:[#allocation7 + $0x90] sm:$0xff] }
 0x460   :  { %v7088_v29 = vadd.f32 %v7087_v35, %v1576_v39  ;;  %7382 = vmatpush1.bf16.msra.mxu1 %v8828_v46  ;;  %7413 = vmatprep.mubr.bf16.mxu1 %v10370_v17  ;;  %v8925_v39 = vcombine.high %v693_v30, %v697_v23  ;;  %v8796_v46 = vcombine.low %v565_v20, %v569_v21  ;;  %v637_v49 = vld [vmem:[#allocation7 + $0x310] sm:$0xff] }
 0x461   :  { %v7089_v62 = vpop.f32.mrf.mxu1  ;;  %v7128_v0 = vpop.f32.mrf.mxu0  ;;  %7373 = vmatmul.mubr.bf16.vlgmr.msra.gmra.mxu0 %v10451_v27  ;;  %7383 = vmatprep.subr.bf16.mxu1 %v8821_v33  ;;  %v8789_v33 = vcombine.high %v557_v45, %v561_v38  ;;  %v8788_v35 = vcombine.low %v557_v45, %v561_v38  ;;  %v9021_v20 = vcombine.high %v789_v11, %v793_v12  ;;  %v773_v38 = vld [vmem:[#allocation7 + $0x750] sm:$0xff] }
 0x462   :  { %v7090_v2 = vadd.f32 %v7089_v62, %v1580_v47  ;;  %v10495_v3 = vadd.f32 %v7128_v0, %v7088_v29  ;;  %7423 = vmatpush1.bf16.msra.mxu0 %v8956_v52  ;;  %7454 = vmatprep.mubr.bf16.mxu0 %v10379_v24  ;;  %v8924_v47 = vcombine.low %v693_v30, %v697_v23  ;;  %v549_v52 = vld [vmem:[#allocation7 + $0x50] sm:$0xff] }
 0x463   :  { %v7091_v6 = vpop.f32.mrf.mxu1  ;;  %v7130_v7 = vpop.f32.mrf.mxu0  ;;  %7424 = vmatprep.subr.bf16.mxu0 %v8949_v54  ;;  %v677_v54 = vld [vmem:[#allocation7 + $0x450] sm:$0xff]  ;;  %v9020_v30 = vcombine.low %v789_v11, %v793_v12 }
 0x464   :  { %v10498_v9 = vadd.f32 %v7130_v7, %v7090_v2  ;;  %7384 = vmatpush1.bf16.msra.mxu1 %v8820_v58  ;;  %v681_v29 = vld [vmem:[#allocation7 + $0x470] sm:$0xff]  ;;  %v8781_v58 = vcombine.high %v549_v52, %v553_v53 }
 0x465   :  { %v7092_v13 = vpop.f32.mrf.mxu1  ;;  %v7132_v14 = vpop.f32.mrf.mxu0  ;;  %7385 = vmatprep.subr.bf16.mxu1 %v8813_v55  ;;  %v545_v62 = vld [vmem:[#allocation7 + $0x30] sm:$0xff]  ;;  %v8909_v0 = vcombine.high %v677_v54, %v681_v29  ;;  %v8780_v55 = vcombine.low %v549_v52, %v553_v53  ;;  %v8908_v4 = vcombine.low %v677_v54, %v681_v29 }
 0x466   :  { %7425 = vmatpush1.bf16.msra.mxu0 %v8948_v31  ;;  %v669_v2 = vld [vmem:[#allocation7 + $0x410] sm:$0xff]  ;;  %v8773_v61 = vcombine.high %v541_v42, %v545_v62 }
 0x467   :  { %v7133_v25 = vpop.f32.mrf.mxu0  ;;  %7426 = vmatprep.subr.bf16.mxu0 %v8941_v8  ;;  %v673_v31 = vld [vmem:[#allocation7 + $0x430] sm:$0xff] }
 0x468   :  { %7386 = vmatpush1.bf16.msra.mxu1 %v8812_v10  ;;  %v661_v6 = vld [vmem:[#allocation7 + $0x3d0] sm:$0xff]  ;;  %v8901_v8 = vcombine.high %v669_v2, %v673_v31  ;;  %v8772_v10 = vcombine.low %v541_v42, %v545_v62  ;;  %v8900_v14 = vcombine.low %v669_v2, %v673_v31 }
 0x469   :  { %7387 = vmatprep.subr.bf16.mxu1 %v8805_v16  ;;  %v665_v7 = vld [vmem:[#allocation7 + $0x3f0] sm:$0xff] }
 0x46a   :  { %7427 = vmatpush1.bf16.msra.mxu0 %v8940_v19  ;;  %v8893_v13 = vcombine.high %v661_v6, %v665_v7  ;;  %v653_v16 = vld [vmem:[#allocation7 + $0x390] sm:$0xff]  ;;  %v8892_v21 = vcombine.low %v661_v6, %v665_v7 }
 0x46b   :  { %7428 = vmatprep.subr.bf16.mxu0 %v8933_v26  ;;  %v657_v19 = vld [vmem:[#allocation7 + $0x3b0] sm:$0xff] }
 0x46c   :  { %7388 = vmatpush1.bf16.msra.mxu1 %v8804_v28  ;;  %v781_v25 = vld [vmem:[#allocation7 + $0x790] sm:$0xff]  ;;  %v8885_v28 = vcombine.high %v653_v16, %v657_v19  ;;  %v8884_v45 = vcombine.low %v653_v16, %v657_v19 }
 0x46d   :  { %7389 = vmatprep.subr.bf16.mxu1 %v8797_v37  ;;  %v785_v26 = vld [vmem:[#allocation7 + $0x7b0] sm:$0xff] }
 0x46e   :  { %7429 = vmatpush1.bf16.msra.mxu0 %v8932_v32  ;;  %v645_v23 = vld [vmem:[#allocation7 + $0x350] sm:$0xff]  ;;  %v9013_v32 = vcombine.high %v781_v25, %v785_v26  ;;  %v9012_v48 = vcombine.low %v781_v25, %v785_v26 }
 0x46f   :  { %7430 = vmatprep.subr.bf16.mxu0 %v8925_v39  ;;  %v649_v37 = vld [vmem:[#allocation7 + $0x370] sm:$0xff] }
 0x470   :  { %7390 = vmatpush1.bf16.msra.mxu1 %v8796_v46  ;;  %v777_v39 = vld [vmem:[#allocation7 + $0x770] sm:$0xff]  ;;  %v8877_v46 = vcombine.high %v645_v23, %v649_v37  ;;  %v8876_v52 = vcombine.low %v645_v23, %v649_v37 }
 0x471   :  { %7391 = vmatprep.subr.bf16.mxu1 %v8789_v33  ;;  %v641_v33 = vld [vmem:[#allocation7 + $0x330] sm:$0xff]  ;;  %v9004_v54 = vcombine.low %v773_v38, %v777_v39 }
 0x472   :  { %7431 = vmatpush1.bf16.msra.mxu0 %v8924_v47  ;;  %v9005_v47 = vcombine.high %v773_v38, %v777_v39  ;;  %v765_v53 = vld [vmem:[#allocation7 + $0x710] sm:$0xff]  ;;  %v8868_v42 = vcombine.low %v637_v49, %v641_v33 }
 0x473   :  { %7432 = vmatprep.subr.bf16.mxu0 %v8917_v51  ;;  %v769_v51 = vld [vmem:[#allocation7 + $0x730] sm:$0xff] }
 0x474   :  { %7392 = vmatpush1.bf16.msra.mxu1 %v8788_v35  ;;  %v8869_v35 = vcombine.high %v637_v49, %v641_v33  ;;  %v629_v29 = vld [vmem:[#allocation7 + $0x2d0] sm:$0xff]  ;;  %v8996_v2 = vcombine.low %v765_v53, %v769_v51 }
 0x475   :  { %7393 = vmatprep.subr.bf16.mxu1 %v8781_v58  ;;  %v633_v58 = vld [vmem:[#allocation7 + $0x2f0] sm:$0xff] }
 0x476   :  { %7433 = vmatpush1.bf16.msra.mxu0 %v8916_v60  ;;  %v8997_v60 = vcombine.high %v765_v53, %v769_v51  ;;  %v757_v62 = vld [vmem:[#allocation7 + $0x6d0] sm:$0xff]  ;;  %v8860_v6 = vcombine.low %v629_v29, %v633_v58 }
 0x477   :  { %7434 = vmatprep.subr.bf16.mxu0 %v8909_v0  ;;  %v761_v0 = vld [vmem:[#allocation7 + $0x6f0] sm:$0xff] }
 0x478   :  { %7394 = vmatpush1.bf16.msra.mxu1 %v8780_v55  ;;  %v8861_v55 = vcombine.high %v629_v29, %v633_v58  ;;  %v621_v31 = vld [vmem:[#allocation7 + $0x290] sm:$0xff]  ;;  %v8988_v11 = vcombine.low %v757_v62, %v761_v0 }
 0x479   :  { %7395 = vmatprep.subr.bf16.mxu1 %v8773_v61  ;;  %v625_v61 = vld [vmem:[#allocation7 + $0x2b0] sm:$0xff] }
 0x47a   :  { %7435 = vmatpush1.bf16.msra.mxu0 %v8908_v4  ;;  %v8989_v4 = vcombine.high %v757_v62, %v761_v0  ;;  %v749_v7 = vld [vmem:[#allocation7 + $0x690] sm:$0xff]  ;;  %v8852_v16 = vcombine.low %v621_v31, %v625_v61 }
 0x47b   :  { %7436 = vmatprep.subr.bf16.mxu0 %v8901_v8  ;;  %v753_v8 = vld [vmem:[#allocation7 + $0x6b0] sm:$0xff] }
 0x47c   :  { %7396 = vmatpush1.bf16.msra.mxu1 %v8772_v10  ;;  %v8853_v10 = vcombine.high %v621_v31, %v625_v61  ;;  %v613_v12 = vld [vmem:[#allocation7 + $0x250] sm:$0xff]  ;;  %v8980_v25 = vcombine.low %v749_v7, %v753_v8 }
 0x47d   :  { %7397 = vmatprep.subr.bf16.mxu1 %v8893_v13  ;;  %v617_v13 = vld [vmem:[#allocation7 + $0x270] sm:$0xff] }
 0x47e   :  { %7437 = vmatpush1.bf16.msra.mxu0 %v8900_v14  ;;  %v8981_v14 = vcombine.high %v749_v7, %v753_v8  ;;  %v741_v19 = vld [vmem:[#allocation7 + $0x650] sm:$0xff]  ;;  %v8844_v23 = vcombine.low %v613_v12, %v617_v13 }
 0x47f   :  { %7438 = vmatprep.subr.bf16.mxu0 %v9021_v20  ;;  %v745_v20 = vld [vmem:[#allocation7 + $0x670] sm:$0xff] }
 0x480   :  { %7398 = vmatpush2.bf16.msra.mxu1 %v8892_v21  ;;  %v8845_v21 = vcombine.high %v613_v12, %v617_v13  ;;  %v605_v26 = vld [vmem:[#allocation7 + $0x210] sm:$0xff]  ;;  %v8972_v38 = vcombine.low %v741_v19, %v745_v20 }
 0x481   :  { %7399 = vmatprep.subr.bf16.mxu1 %v8885_v28  ;;  %v609_v28 = vld [vmem:[#allocation7 + $0x230] sm:$0xff] }
 0x482   :  { %7439 = vmatpush2.bf16.msra.mxu0 %v9020_v30  ;;  %v8973_v30 = vcombine.high %v741_v19, %v745_v20  ;;  %v733_v37 = vld [vmem:[#allocation7 + $0x610] sm:$0xff]  ;;  %v8836_v49 = vcombine.low %v605_v26, %v609_v28 }
 0x483   :  { %7440 = vmatprep.subr.bf16.mxu0 %v9013_v32  ;;  %v737_v32 = vld [vmem:[#allocation7 + $0x630] sm:$0xff] }
 0x484   :  { %7400 = vmatpush2.bf16.msra.mxu1 %v8884_v45  ;;  %v8837_v45 = vcombine.high %v605_v26, %v609_v28  ;;  %v853_v39 = vld [vmem:[#allocation7 + $0x9d0] sm:$0xff]  ;;  %v8964_v53 = vcombine.low %v733_v37, %v737_v32 }
 0x485   :  { %7401 = vmatprep.subr.bf16.mxu1 %v8877_v46  ;;  %v857_v46 = vld [vmem:[#allocation7 + $0x9f0] sm:$0xff] }
 0x486   :  { %7441 = vmatpush2.bf16.msra.mxu0 %v9012_v48  ;;  %v8965_v48 = vcombine.high %v733_v37, %v737_v32  ;;  %v981_v33 = vld [vmem:[#allocation7 + $0xdd0] sm:$0xff]  ;;  %v9084_v29 = vcombine.low %v853_v39, %v857_v46 }
 0x487   :  { %7442 = vmatprep.subr.bf16.mxu0 %v9005_v47  ;;  %v985_v47 = vld [vmem:[#allocation7 + $0xdf0] sm:$0xff] }
 0x488   :  { %7402 = vmatpush2.bf16.msra.mxu1 %v8876_v52  ;;  %v9085_v52 = vcombine.high %v853_v39, %v857_v46  ;;  %v845_v51 = vld [vmem:[#allocation7 + $0x990] sm:$0xff]  ;;  %v9212_v62 = vcombine.low %v981_v33, %v985_v47 }
 0x489   :  { %7403 = vmatprep.subr.bf16.mxu1 %v8869_v35  ;;  %v849_v35 = vld [vmem:[#allocation7 + $0x9b0] sm:$0xff] }
 0x48a   :  { %7443 = vmatpush2.bf16.msra.mxu0 %v9004_v54  ;;  %v9213_v54 = vcombine.high %v981_v33, %v985_v47  ;;  %v973_v58 = vld [vmem:[#allocation7 + $0xd90] sm:$0xff] }
 0x48b   :  { %7444 = vmatprep.subr.bf16.mxu0 %v8997_v60  ;;  %v977_v60 = vld [vmem:[#allocation7 + $0xdb0] sm:$0xff] }
 0x48c   :  { %7404 = vmatpush2.bf16.msra.mxu1 %v8868_v42  ;;  %v9077_v42 = vcombine.high %v845_v51, %v849_v35  ;;  %v837_v0 = vld [vmem:[#allocation7 + $0x950] sm:$0xff]  ;;  %v9205_v31 = vcombine.high %v973_v58, %v977_v60 }
 0x48d   :  { %7405 = vmatprep.subr.bf16.mxu1 %v8861_v55  ;;  %v841_v55 = vld [vmem:[#allocation7 + $0x970] sm:$0xff] }
 0x48e   :  { %7445 = vmatpush2.bf16.msra.mxu0 %v8996_v2  ;;  %v969_v7 = vld [vmem:[#allocation7 + $0xd70] sm:$0xff]  ;;  %v9068_v26 = vcombine.low %v837_v0, %v841_v55 }
 0x48f   :  { %7446 = vmatprep.subr.bf16.mxu0 %v8989_v4  ;;  %v9076_v4 = vcombine.low %v845_v51, %v849_v35  ;;  %v957_v28 = vld [vmem:[#allocation7 + $0xd10] sm:$0xff] }
 0x490   :  { %7406 = vmatpush2.bf16.msra.mxu1 %v8860_v6  ;;  %v965_v6 = vld [vmem:[#allocation7 + $0xd50] sm:$0xff] }
 0x491   :  { %7407 = vmatprep.subr.bf16.mxu1 %v8853_v10  ;;  %v9196_v32 = vcombine.low %v965_v6, %v969_v7  ;;  %v953_v33 = vld [vmem:[#allocation7 + $0xcf0] sm:$0xff] }
 0x492   :  { %7447 = vmatpush2.bf16.msra.mxu0 %v8988_v11  ;;  %v9069_v11 = vcombine.high %v837_v0, %v841_v55  ;;  %v817_v51 = vld [vmem:[#allocation7 + $0x8b0] sm:$0xff] }
 0x493   :  { %7448 = vmatprep.subr.bf16.mxu0 %v8981_v14  ;;  %v829_v14 = vld [vmem:[#allocation7 + $0x910] sm:$0xff] }
 0x494   :  { %7408 = vmatpush2.bf16.msra.mxu1 %v8852_v16  ;;  %v833_v16 = vld [vmem:[#allocation7 + $0x930] sm:$0xff] }
 0x495   :  { %7409 = vmatprep.subr.bf16.mxu1 %v8845_v21  ;;  %v9197_v21 = vcombine.high %v965_v6, %v969_v7  ;;  %v9061_v37 = vcombine.high %v829_v14, %v833_v16  ;;  %v809_v0 = vld [vmem:[#allocation7 + $0x870] sm:$0xff] }
 0x496   :  { %7449 = vmatpush2.bf16.msra.mxu0 %v8980_v25  ;;  %v797_v7 = vld [vmem:[#allocation7 + $0x810] sm:$0xff] }
 0x497   :  { %7450 = vmatprep.subr.bf16.mxu0 %v8973_v30  ;;  %v961_v30 = vld [vmem:[#allocation7 + $0xd30] sm:$0xff] }
 0x498   :  { %7410 = vmatpush2.bf16.msra.mxu1 %v8844_v23  ;;  %v9189_v46 = vcombine.high %v957_v28, %v961_v30 }
 0x499   :  { %7411 = vmatprep.subr.bf16.mxu1 %v8837_v45  ;;  %v821_v45 = vld [vmem:[#allocation7 + $0x8d0] sm:$0xff] }
 0x49a   :  { %7451 = vmatpush2.bf16.msra.mxu0 %v8972_v38  ;;  %v825_v38 = vld [vmem:[#allocation7 + $0x8f0] sm:$0xff] }
 0x49b   :  { %7452 = vmatprep.subr.bf16.mxu0 %v8965_v48  ;;  %v9060_v48 = vcombine.low %v829_v14, %v833_v16  ;;  %v9053_v47 = vcombine.high %v821_v45, %v825_v38 }
 0x49c   :  { %7412 = vmatpush2.bf16.msra.mxu1 %v8836_v49  ;;  %v949_v49 = vld [vmem:[#allocation7 + $0xcd0] sm:$0xff] }
 0x49d   :  { %7463 = vmatprep.subr.bf16.mxu1 %v9085_v52  ;;  %v9188_v52 = vcombine.low %v957_v28, %v961_v30  ;;  %v9181_v35 = vcombine.high %v949_v49, %v953_v33  ;;  %v1045_v28 = vld [vmem:[#allocation7 + $0xfd0] sm:$0xff] }
 0x49e   :  { %7453 = vmatpush2.bf16.msra.mxu0 %v8964_v53  ;;  %v813_v53 = vld [vmem:[#allocation7 + $0x890] sm:$0xff] }
 0x49f   :  { %v7169_v2 = vpop.f32.mrf.mxu1  ;;  %7414 = vmatmul.mubr.bf16.vlgmr.msra.gmra.mxu1 %v10372_v18  ;;  %7504 = vmatprep.subr.bf16.mxu0 %v9213_v54  ;;  %v9052_v54 = vcombine.low %v821_v45, %v825_v38  ;;  %v1049_v30 = vld [vmem:[#allocation7 + $0xff0] sm:$0xff] }
 0x4a0   :  { %v7170_v61 = vadd.f32 %v7169_v2, %v10495_v3  ;;  %7464 = vmatpush1.bf16.msra.mxu1 %v9084_v29  ;;  %7495 = vmatprep.mubr.bf16.mxu1 %v10386_v34  ;;  %v9204_v3 = vcombine.low %v973_v58, %v977_v60  ;;  %v941_v29 = vld [vmem:[#allocation7 + $0xc90] sm:$0xff]  ;;  %v9045_v60 = vcombine.high %v813_v53, %v817_v51 }
 0x4a1   :  { %v7171_v8 = vpop.f32.mrf.mxu1  ;;  %v7210_v10 = vpop.f32.mrf.mxu0  ;;  %7455 = vmatmul.mubr.bf16.vlgmr.msra.gmra.mxu0 %v10388_v36  ;;  %7465 = vmatprep.subr.bf16.mxu1 %v9077_v42  ;;  %v945_v58 = vld [vmem:[#allocation7 + $0xcb0] sm:$0xff]  ;;  %v9180_v42 = vcombine.low %v949_v49, %v953_v33  ;;  %v9044_v2 = vcombine.low %v813_v53, %v817_v51  ;;  %v9277_v45 = vcombine.high %v1045_v28, %v1049_v30 }
 0x4a2   :  { %v7172_v12 = vadd.f32 %v7171_v8, %v10498_v9  ;;  %v10505_v13 = vadd.f32 %v7210_v10, %v7170_v61  ;;  %7505 = vmatpush1.bf16.msra.mxu0 %v9212_v62  ;;  %7536 = vmatprep.mubr.bf16.mxu0 %v10396_v43  ;;  %v805_v62 = vld [vmem:[#allocation7 + $0x850] sm:$0xff]  ;;  %v9173_v55 = vcombine.high %v941_v29, %v945_v58 }
 0x4a3   :  { %v7173_v19 = vpop.f32.mrf.mxu1  ;;  %v7212_v20 = vpop.f32.mrf.mxu0  ;;  %7506 = vmatprep.subr.bf16.mxu0 %v9205_v31  ;;  %v933_v31 = vld [vmem:[#allocation7 + $0xc50] sm:$0xff]  ;;  %v9172_v6 = vcombine.low %v941_v29, %v945_v58  ;;  %v9276_v49 = vcombine.low %v1045_v28, %v1049_v30 }
 0x4a4   :  { %v10508_v25 = vadd.f32 %v7212_v20, %v7172_v12  ;;  %7466 = vmatpush1.bf16.msra.mxu1 %v9076_v4  ;;  %v937_v61 = vld [vmem:[#allocation7 + $0xc70] sm:$0xff]  ;;  %v9037_v4 = vcombine.high %v805_v62, %v809_v0 }
 0x4a5   :  { %v7174_v23 = vpop.f32.mrf.mxu1  ;;  %v7214_v9 = vpop.f32.mrf.mxu0  ;;  %7467 = vmatprep.subr.bf16.mxu1 %v9069_v11  ;;  %v801_v8 = vld [vmem:[#allocation7 + $0x830] sm:$0xff]  ;;  %v9165_v10 = vcombine.high %v933_v31, %v937_v61  ;;  %v9036_v11 = vcombine.low %v805_v62, %v809_v0  ;;  %v9164_v16 = vcombine.low %v933_v31, %v937_v61 }
 0x4a6   :  { %7507 = vmatpush1.bf16.msra.mxu0 %v9204_v3  ;;  %v925_v12 = vld [vmem:[#allocation7 + $0xc10] sm:$0xff]  ;;  %v9029_v14 = vcombine.high %v797_v7, %v801_v8 }
 0x4a7   :  { %v7215_v39 = vpop.f32.mrf.mxu0  ;;  %7508 = vmatprep.subr.bf16.mxu0 %v9197_v21  ;;  %v929_v3 = vld [vmem:[#allocation7 + $0xc30] sm:$0xff] }
 0x4a8   :  { %7468 = vmatpush1.bf16.msra.mxu1 %v9068_v26  ;;  %v917_v19 = vld [vmem:[#allocation7 + $0xbd0] sm:$0xff]  ;;  %v9157_v21 = vcombine.high %v925_v12, %v929_v3  ;;  %v9028_v26 = vcombine.low %v797_v7, %v801_v8  ;;  %v9156_v9 = vcombine.low %v925_v12, %v929_v3 }
 0x4a9   :  { %7469 = vmatprep.subr.bf16.mxu1 %v9061_v37  ;;  %v921_v20 = vld [vmem:[#allocation7 + $0xbf0] sm:$0xff] }
 0x4aa   :  { %7509 = vmatpush1.bf16.msra.mxu0 %v9196_v32  ;;  %v9149_v23 = vcombine.high %v917_v19, %v921_v20  ;;  %v909_v37 = vld [vmem:[#allocation7 + $0xb90] sm:$0xff]  ;;  %v9148_v38 = vcombine.low %v917_v19, %v921_v20 }
 0x4ab   :  { %7510 = vmatprep.subr.bf16.mxu0 %v9189_v46  ;;  %v913_v32 = vld [vmem:[#allocation7 + $0xbb0] sm:$0xff] }
 0x4ac   :  { %7470 = vmatpush1.bf16.msra.mxu1 %v9060_v48  ;;  %v1037_v39 = vld [vmem:[#allocation7 + $0xf90] sm:$0xff]  ;;  %v9141_v48 = vcombine.high %v909_v37, %v913_v32  ;;  %v9140_v53 = vcombine.low %v909_v37, %v913_v32 }
 0x4ad   :  { %7471 = vmatprep.subr.bf16.mxu1 %v9053_v47  ;;  %v1041_v46 = vld [vmem:[#allocation7 + $0xfb0] sm:$0xff] }
 0x4ae   :  { %7511 = vmatpush1.bf16.msra.mxu0 %v9188_v52  ;;  %v901_v33 = vld [vmem:[#allocation7 + $0xb50] sm:$0xff]  ;;  %v9269_v52 = vcombine.high %v1037_v39, %v1041_v46  ;;  %v9268_v29 = vcombine.low %v1037_v39, %v1041_v46 }
 0x4af   :  { %7512 = vmatprep.subr.bf16.mxu0 %v9181_v35  ;;  %v905_v47 = vld [vmem:[#allocation7 + $0xb70] sm:$0xff] }
 0x4b0   :  { %7472 = vmatpush1.bf16.msra.mxu1 %v9052_v54  ;;  %v1029_v51 = vld [vmem:[#allocation7 + $0xf50] sm:$0xff]  ;;  %v9133_v54 = vcombine.high %v901_v33, %v905_v47  ;;  %v9132_v62 = vcombine.low %v901_v33, %v905_v47 }
 0x4b1   :  { %7473 = vmatprep.subr.bf16.mxu1 %v9045_v60  ;;  %v1033_v35 = vld [vmem:[#allocation7 + $0xf70] sm:$0xff] }
 0x4b2   :  { %7513 = vmatpush1.bf16.msra.mxu0 %v9180_v42  ;;  %v893_v58 = vld [vmem:[#allocation7 + $0xb10] sm:$0xff]  ;;  %v9261_v42 = vcombine.high %v1029_v51, %v1033_v35  ;;  %v9260_v31 = vcombine.low %v1029_v51, %v1033_v35 }
 0x4b3   :  { %7514 = vmatprep.subr.bf16.mxu0 %v9173_v55  ;;  %v897_v60 = vld [vmem:[#allocation7 + $0xb30] sm:$0xff] }
 0x4b4   :  { %7474 = vmatpush1.bf16.msra.mxu1 %v9044_v2  ;;  %v1021_v0 = vld [vmem:[#allocation7 + $0xf10] sm:$0xff]  ;;  %v9125_v2 = vcombine.high %v893_v58, %v897_v60  ;;  %v9124_v7 = vcombine.low %v893_v58, %v897_v60 }
 0x4b5   :  { %7475 = vmatprep.subr.bf16.mxu1 %v9037_v4  ;;  %v1025_v55 = vld [vmem:[#allocation7 + $0xf30] sm:$0xff] }
 0x4b6   :  { %7515 = vmatpush1.bf16.msra.mxu0 %v9172_v6  ;;  %v885_v61 = vld [vmem:[#allocation7 + $0xad0] sm:$0xff]  ;;  %v9253_v6 = vcombine.high %v1021_v0, %v1025_v55  ;;  %v9252_v12 = vcombine.low %v1021_v0, %v1025_v55 }
 0x4b7   :  { %7516 = vmatprep.subr.bf16.mxu0 %v9165_v10  ;;  %v889_v4 = vld [vmem:[#allocation7 + $0xaf0] sm:$0xff] }
 0x4b8   :  { %7476 = vmatpush1.bf16.msra.mxu1 %v9036_v11  ;;  %v1013_v8 = vld [vmem:[#allocation7 + $0xed0] sm:$0xff]  ;;  %v9117_v11 = vcombine.high %v885_v61, %v889_v4  ;;  %v9116_v19 = vcombine.low %v885_v61, %v889_v4 }
 0x4b9   :  { %7477 = vmatprep.subr.bf16.mxu1 %v9029_v14  ;;  %v1017_v10 = vld [vmem:[#allocation7 + $0xef0] sm:$0xff] }
 0x4ba   :  { %7517 = vmatpush1.bf16.msra.mxu0 %v9164_v16  ;;  %v877_v3 = vld [vmem:[#allocation7 + $0xa90] sm:$0xff]  ;;  %v9245_v16 = vcombine.high %v1013_v8, %v1017_v10  ;;  %v9244_v28 = vcombine.low %v1013_v8, %v1017_v10 }
 0x4bb   :  { %7518 = vmatprep.subr.bf16.mxu0 %v9157_v21  ;;  %v881_v14 = vld [vmem:[#allocation7 + $0xab0] sm:$0xff] }
 0x4bc   :  { %7478 = vmatpush1.bf16.msra.mxu1 %v9028_v26  ;;  %v1005_v20 = vld [vmem:[#allocation7 + $0xe90] sm:$0xff]  ;;  %v9109_v26 = vcombine.high %v877_v3, %v881_v14  ;;  %v9108_v37 = vcombine.low %v877_v3, %v881_v14 }
 0x4bd   :  { %7479 = vmatprep.subr.bf16.mxu1 %v9149_v23  ;;  %v1009_v21 = vld [vmem:[#allocation7 + $0xeb0] sm:$0xff] }
 0x4be   :  { %7519 = vmatpush1.bf16.msra.mxu0 %v9156_v9  ;;  %v869_v30 = vld [vmem:[#allocation7 + $0xa50] sm:$0xff]  ;;  %v9237_v9 = vcombine.high %v1005_v20, %v1009_v21  ;;  %v9236_v39 = vcombine.low %v1005_v20, %v1009_v21 }
 0x4bf   :  { %7520 = vmatprep.subr.bf16.mxu0 %v9277_v45  ;;  %v873_v23 = vld [vmem:[#allocation7 + $0xa70] sm:$0xff] }
 0x4c0   :  { %7480 = vmatpush2.bf16.msra.mxu1 %v9148_v38  ;;  %v997_v32 = vld [vmem:[#allocation7 + $0xe50] sm:$0xff]  ;;  %v9101_v38 = vcombine.high %v869_v30, %v873_v23  ;;  %v9100_v33 = vcombine.low %v869_v30, %v873_v23 }
 0x4c1   :  { %7481 = vmatprep.subr.bf16.mxu1 %v9141_v48  ;;  %v1001_v45 = vld [vmem:[#allocation7 + $0xe70] sm:$0xff] }
 0x4c2   :  { %7521 = vmatpush2.bf16.msra.mxu0 %v9276_v49  ;;  %v861_v46 = vld [vmem:[#allocation7 + $0xa10] sm:$0xff]  ;;  %v9229_v49 = vcombine.high %v997_v32, %v1001_v45  ;;  %v9228_v51 = vcombine.low %v997_v32, %v1001_v45 }
 0x4c3   :  { %7522 = vmatprep.subr.bf16.mxu0 %v9269_v52  ;;  %v865_v48 = vld [vmem:[#allocation7 + $0xa30] sm:$0xff] }
 0x4c4   :  { %7482 = vmatpush2.bf16.msra.mxu1 %v9140_v53  ;;  %v989_v47 = vld [vmem:[#allocation7 + $0xe10] sm:$0xff]  ;;  %v9093_v53 = vcombine.high %v861_v46, %v865_v48  ;;  %v9092_v58 = vcombine.low %v861_v46, %v865_v48 }
 0x4c5   :  { %7483 = vmatprep.subr.bf16.mxu1 %v9133_v54  ;;  %v993_v52 = vld [vmem:[#allocation7 + $0xe30] sm:$0xff] }
 0x4c6   :  { %7523 = vmatpush2.bf16.msra.mxu0 %v9268_v29  ;;  %v1109_v35 = vld [vmem:[#allocation7 + $0x11d0] sm:$0xff]  ;;  %v9221_v29 = vcombine.high %v989_v47, %v993_v52  ;;  %v9220_v0 = vcombine.low %v989_v47, %v993_v52 }
 0x4c7   :  { %7524 = vmatprep.subr.bf16.mxu0 %v9261_v42  ;;  %v1113_v54 = vld [vmem:[#allocation7 + $0x11f0] sm:$0xff] }
 0x4c8   :  { %7484 = vmatpush2.bf16.msra.mxu1 %v9132_v62  ;;  %v1237_v60 = vld [vmem:[#allocation7 + $0x15d0] sm:$0xff]  ;;  %v9341_v62 = vcombine.high %v1109_v35, %v1113_v54  ;;  %v9340_v61 = vcombine.low %v1109_v35, %v1113_v54 }
 0x4c9   :  { %7485 = vmatprep.subr.bf16.mxu1 %v9125_v2  ;;  %v1241_v42 = vld [vmem:[#allocation7 + $0x15f0] sm:$0xff] }
 0x4ca   :  { %7525 = vmatpush2.bf16.msra.mxu0 %v9260_v31  ;;  %v1101_v55 = vld [vmem:[#allocation7 + $0x1190] sm:$0xff]  ;;  %v9469_v31 = vcombine.high %v1237_v60, %v1241_v42  ;;  %v9468_v8 = vcombine.low %v1237_v60, %v1241_v42 }
 0x4cb   :  { %7526 = vmatprep.subr.bf16.mxu0 %v9253_v6  ;;  %v1105_v2 = vld [vmem:[#allocation7 + $0x11b0] sm:$0xff] }
 0x4cc   :  { %7486 = vmatpush2.bf16.msra.mxu1 %v9124_v7  ;;  %v1229_v4 = vld [vmem:[#allocation7 + $0x1590] sm:$0xff]  ;;  %v9333_v7 = vcombine.high %v1101_v55, %v1105_v2 }
 0x4cd   :  { %7487 = vmatprep.subr.bf16.mxu1 %v9117_v11  ;;  %v1233_v6 = vld [vmem:[#allocation7 + $0x15b0] sm:$0xff] }
 0x4ce   :  { %7527 = vmatpush2.bf16.msra.mxu0 %v9252_v12  ;;  %v1093_v10 = vld [vmem:[#allocation7 + $0x1150] sm:$0xff]  ;;  %v9461_v3 = vcombine.high %v1229_v4, %v1233_v6 }
 0x4cf   :  { %7528 = vmatprep.subr.bf16.mxu0 %v9245_v16  ;;  %v1097_v11 = vld [vmem:[#allocation7 + $0x1170] sm:$0xff]  ;;  %v9332_v16 = vcombine.low %v1101_v55, %v1105_v2 }
 0x4d0   :  { %7488 = vmatpush2.bf16.msra.mxu1 %v9116_v19  ;;  %v1221_v19 = vld [vmem:[#allocation7 + $0x1550] sm:$0xff]  ;;  %v9324_v46 = vcombine.low %v1093_v10, %v1097_v11 }
 0x4d1   :  { %7489 = vmatprep.subr.bf16.mxu1 %v9109_v26  ;;  %v1225_v20 = vld [vmem:[#allocation7 + $0x1570] sm:$0xff] }
 0x4d2   :  { %7529 = vmatpush2.bf16.msra.mxu0 %v9244_v28  ;;  %v9325_v28 = vcombine.high %v1093_v10, %v1097_v11  ;;  %v1213_v48 = vld [vmem:[#allocation7 + $0x1510] sm:$0xff]  ;;  %v9452_v52 = vcombine.low %v1221_v19, %v1225_v20 }
 0x4d3   :  { %7530 = vmatprep.subr.bf16.mxu0 %v9237_v9  ;;  %v1085_v9 = vld [vmem:[#allocation7 + $0x1110] sm:$0xff] }
 0x4d4   :  { %7490 = vmatpush2.bf16.msra.mxu1 %v9108_v37  ;;  %v1089_v37 = vld [vmem:[#allocation7 + $0x1130] sm:$0xff] }
 0x4d5   :  { %7491 = vmatprep.subr.bf16.mxu1 %v9101_v38  ;;  %v9453_v38 = vcombine.high %v1221_v19, %v1225_v20  ;;  %v9317_v47 = vcombine.high %v1085_v9, %v1089_v37  ;;  %v1209_v60 = vld [vmem:[#allocation7 + $0x14f0] sm:$0xff] }
 0x4d6   :  { %7531 = vmatpush2.bf16.msra.mxu0 %v9236_v39  ;;  %v1073_v55 = vld [vmem:[#allocation7 + $0x10b0] sm:$0xff] }
 0x4d7   :  { %7532 = vmatprep.subr.bf16.mxu0 %v9229_v49  ;;  %v1217_v49 = vld [vmem:[#allocation7 + $0x1530] sm:$0xff] }
 0x4d8   :  { %7492 = vmatpush2.bf16.msra.mxu1 %v9100_v33  ;;  %v9445_v54 = vcombine.high %v1213_v48, %v1217_v49  ;;  %v1065_v10 = vld [vmem:[#allocation7 + $0x1070] sm:$0xff] }
 0x4d9   :  { %7493 = vmatprep.subr.bf16.mxu1 %v9093_v53  ;;  %v1077_v53 = vld [vmem:[#allocation7 + $0x10d0] sm:$0xff] }
 0x4da   :  { %7533 = vmatpush2.bf16.msra.mxu0 %v9228_v51  ;;  %v1081_v51 = vld [vmem:[#allocation7 + $0x10f0] sm:$0xff] }
 0x4db   :  { %7534 = vmatprep.subr.bf16.mxu0 %v9221_v29  ;;  %v9316_v29 = vcombine.low %v1085_v9, %v1089_v37  ;;  %v9309_v42 = vcombine.high %v1077_v53, %v1081_v51  ;;  %v1053_v20 = vld [vmem:[#allocation7 + $0x1010] sm:$0xff] }
 0x4dc   :  { %7494 = vmatpush2.bf16.msra.mxu1 %v9092_v58  ;;  %v1205_v58 = vld [vmem:[#allocation7 + $0x14d0] sm:$0xff] }
 0x4dd   :  { %7545 = vmatprep.subr.bf16.mxu1 %v9341_v62  ;;  %v9444_v62 = vcombine.low %v1213_v48, %v1217_v49  ;;  %v9437_v2 = vcombine.high %v1205_v58, %v1209_v60  ;;  %v1301_v48 = vld [vmem:[#allocation7 + $0x17d0] sm:$0xff] }
 0x4de   :  { %7535 = vmatpush2.bf16.msra.mxu0 %v9220_v0  ;;  %v1069_v0 = vld [vmem:[#allocation7 + $0x1090] sm:$0xff] }
 0x4df   :  { %v7251_v12 = vpop.f32.mrf.mxu1  ;;  %7496 = vmatmul.mubr.bf16.vlgmr.msra.gmra.mxu1 %v10408_v57  ;;  %7586 = vmatprep.subr.bf16.mxu0 %v9469_v31  ;;  %v9308_v31 = vcombine.low %v1077_v53, %v1081_v51  ;;  %v1305_v49 = vld [vmem:[#allocation7 + $0x17f0] sm:$0xff] }
 0x4e0   :  { %v7252_v14 = vadd.f32 %v7251_v12, %v10505_v13  ;;  %7546 = vmatpush1.bf16.msra.mxu1 %v9340_v61  ;;  %7577 = vmatprep.mubr.bf16.mxu1 %v10412_v59  ;;  %v9460_v13 = vcombine.low %v1229_v4, %v1233_v6  ;;  %v1197_v61 = vld [vmem:[#allocation7 + $0x1490] sm:$0xff]  ;;  %v9301_v6 = vcombine.high %v1069_v0, %v1073_v55 }
 0x4e1   :  { %v7253_v21 = vpop.f32.mrf.mxu1  ;;  %v7292_v26 = vpop.f32.mrf.mxu0  ;;  %7537 = vmatmul.mubr.bf16.vlgmr.msra.gmra.mxu0 %v10415_v63  ;;  %7547 = vmatprep.subr.bf16.mxu1 %v9333_v7  ;;  %v1201_v4 = vld [vmem:[#allocation7 + $0x14b0] sm:$0xff]  ;;  %v9436_v7 = vcombine.low %v1205_v58, %v1209_v60  ;;  %v9300_v12 = vcombine.low %v1069_v0, %v1073_v55  ;;  %v9533_v53 = vcombine.high %v1301_v48, %v1305_v49 }
 0x4e2   :  { %v7254_v30 = vadd.f32 %v7253_v21, %v10508_v25  ;;  %v10515_v23 = vadd.f32 %v7292_v26, %v7252_v14  ;;  %7587 = vmatpush1.bf16.msra.mxu0 %v9468_v8  ;;  %7618 = vmatprep.mubr.bf16.mxu0 %v10418_v5  ;;  %v1061_v8 = vld [vmem:[#allocation7 + $0x1050] sm:$0xff]  ;;  %v9429_v11 = vcombine.high %v1197_v61, %v1201_v4 }
 0x4e3   :  { %v7255_v32 = vpop.f32.mrf.mxu1  ;;  %v7294_v45 = vpop.f32.mrf.mxu0  ;;  %7588 = vmatprep.subr.bf16.mxu0 %v9461_v3  ;;  %v1189_v3 = vld [vmem:[#allocation7 + $0x1450] sm:$0xff]  ;;  %v9428_v19 = vcombine.low %v1197_v61, %v1201_v4  ;;  %v9532_v58 = vcombine.low %v1301_v48, %v1305_v49 }
 0x4e4   :  { %v10518_v39 = vadd.f32 %v7294_v45, %v7254_v30  ;;  %7548 = vmatpush1.bf16.msra.mxu1 %v9332_v16  ;;  %v1193_v14 = vld [vmem:[#allocation7 + $0x1470] sm:$0xff]  ;;  %v9293_v16 = vcombine.high %v1061_v8, %v1065_v10 }
 0x4e5   :  { %v7256_v33 = vpop.f32.mrf.mxu1  ;;  %v7296_v25 = vpop.f32.mrf.mxu0  ;;  %7549 = vmatprep.subr.bf16.mxu1 %v9325_v28  ;;  %v1057_v21 = vld [vmem:[#allocation7 + $0x1030] sm:$0xff]  ;;  %v9421_v26 = vcombine.high %v1189_v3, %v1193_v14  ;;  %v9292_v28 = vcombine.low %v1061_v8, %v1065_v10  ;;  %v9420_v37 = vcombine.low %v1189_v3, %v1193_v14 }
 0x4e6   :  { %7589 = vmatpush1.bf16.msra.mxu0 %v9460_v13  ;;  %v1181_v30 = vld [vmem:[#allocation7 + $0x1410] sm:$0xff]  ;;  %v9285_v9 = vcombine.high %v1053_v20, %v1057_v21 }
 0x4e7   :  { %v7297_v35 = vpop.f32.mrf.mxu0  ;;  %7590 = vmatprep.subr.bf16.mxu0 %v9453_v38  ;;  %v1185_v13 = vld [vmem:[#allocation7 + $0x1430] sm:$0xff] }
 0x4e8   :  { %7550 = vmatpush1.bf16.msra.mxu1 %v9324_v46  ;;  %v1173_v32 = vld [vmem:[#allocation7 + $0x13d0] sm:$0xff]  ;;  %v9413_v38 = vcombine.high %v1181_v30, %v1185_v13  ;;  %v9284_v46 = vcombine.low %v1053_v20, %v1057_v21  ;;  %v9412_v25 = vcombine.low %v1181_v30, %v1185_v13 }
 0x4e9   :  { %7551 = vmatprep.subr.bf16.mxu1 %v9317_v47  ;;  %v1177_v45 = vld [vmem:[#allocation7 + $0x13f0] sm:$0xff] }
 0x4ea   :  { %7591 = vmatpush1.bf16.msra.mxu0 %v9452_v52  ;;  %v9405_v33 = vcombine.high %v1173_v32, %v1177_v45  ;;  %v1165_v47 = vld [vmem:[#allocation7 + $0x1390] sm:$0xff]  ;;  %v9404_v51 = vcombine.low %v1173_v32, %v1177_v45 }
 0x4eb   :  { %7592 = vmatprep.subr.bf16.mxu0 %v9445_v54  ;;  %v1169_v52 = vld [vmem:[#allocation7 + $0x13b0] sm:$0xff] }
 0x4ec   :  { %7552 = vmatpush1.bf16.msra.mxu1 %v9316_v29  ;;  %v1293_v35 = vld [vmem:[#allocation7 + $0x1790] sm:$0xff]  ;;  %v9397_v29 = vcombine.high %v1165_v47, %v1169_v52  ;;  %v9396_v0 = vcombine.low %v1165_v47, %v1169_v52 }
 0x4ed   :  { %7553 = vmatprep.subr.bf16.mxu1 %v9309_v42  ;;  %v1297_v54 = vld [vmem:[#allocation7 + $0x17b0] sm:$0xff] }
 0x4ee   :  { %7593 = vmatpush1.bf16.msra.mxu0 %v9444_v62  ;;  %v1157_v60 = vld [vmem:[#allocation7 + $0x1350] sm:$0xff]  ;;  %v9525_v62 = vcombine.high %v1293_v35, %v1297_v54  ;;  %v9524_v61 = vcombine.low %v1293_v35, %v1297_v54 }
 0x4ef   :  { %7594 = vmatprep.subr.bf16.mxu0 %v9437_v2  ;;  %v1161_v42 = vld [vmem:[#allocation7 + $0x1370] sm:$0xff] }
 0x4f0   :  { %7554 = vmatpush1.bf16.msra.mxu1 %v9308_v31  ;;  %v1285_v55 = vld [vmem:[#allocation7 + $0x1750] sm:$0xff]  ;;  %v9389_v31 = vcombine.high %v1157_v60, %v1161_v42  ;;  %v9388_v8 = vcombine.low %v1157_v60, %v1161_v42 }
 0x4f1   :  { %7555 = vmatprep.subr.bf16.mxu1 %v9301_v6  ;;  %v1289_v2 = vld [vmem:[#allocation7 + $0x1770] sm:$0xff] }
 0x4f2   :  { %7595 = vmatpush1.bf16.msra.mxu0 %v9436_v7  ;;  %v1149_v4 = vld [vmem:[#allocation7 + $0x1310] sm:$0xff]  ;;  %v9517_v7 = vcombine.high %v1285_v55, %v1289_v2  ;;  %v9516_v3 = vcombine.low %v1285_v55, %v1289_v2 }
 0x4f3   :  { %7596 = vmatprep.subr.bf16.mxu0 %v9429_v11  ;;  %v1153_v6 = vld [vmem:[#allocation7 + $0x1330] sm:$0xff] }
 0x4f4   :  { %7556 = vmatpush1.bf16.msra.mxu1 %v9300_v12  ;;  %v1277_v10 = vld [vmem:[#allocation7 + $0x1710] sm:$0xff]  ;;  %v9381_v12 = vcombine.high %v1149_v4, %v1153_v6  ;;  %v9380_v20 = vcombine.low %v1149_v4, %v1153_v6 }
 0x4f5   :  { %7557 = vmatprep.subr.bf16.mxu1 %v9293_v16  ;;  %v1281_v11 = vld [vmem:[#allocation7 + $0x1730] sm:$0xff] }
 0x4f6   :  { %7597 = vmatpush1.bf16.msra.mxu0 %v9428_v19  ;;  %v1141_v14 = vld [vmem:[#allocation7 + $0x12d0] sm:$0xff]  ;;  %v9509_v19 = vcombine.high %v1277_v10, %v1281_v11  ;;  %v9508_v30 = vcombine.low %v1277_v10, %v1281_v11 }
 0x4f7   :  { %7598 = vmatprep.subr.bf16.mxu0 %v9421_v26  ;;  %v1145_v16 = vld [vmem:[#allocation7 + $0x12f0] sm:$0xff] }
 0x4f8   :  { %7558 = vmatpush1.bf16.msra.mxu1 %v9292_v28  ;;  %v1269_v21 = vld [vmem:[#allocation7 + $0x16d0] sm:$0xff]  ;;  %v9373_v28 = vcombine.high %v1141_v14, %v1145_v16  ;;  %v9372_v32 = vcombine.low %v1141_v14, %v1145_v16 }
 0x4f9   :  { %7559 = vmatprep.subr.bf16.mxu1 %v9285_v9  ;;  %v1273_v26 = vld [vmem:[#allocation7 + $0x16f0] sm:$0xff] }
 0x4fa   :  { %7599 = vmatpush1.bf16.msra.mxu0 %v9420_v37  ;;  %v1133_v13 = vld [vmem:[#allocation7 + $0x1290] sm:$0xff]  ;;  %v9501_v37 = vcombine.high %v1269_v21, %v1273_v26  ;;  %v9500_v48 = vcombine.low %v1269_v21, %v1273_v26 }
 0x4fb   :  { %7600 = vmatprep.subr.bf16.mxu0 %v9413_v38  ;;  %v1137_v9 = vld [vmem:[#allocation7 + $0x12b0] sm:$0xff] }
 0x4fc   :  { %7560 = vmatpush1.bf16.msra.mxu1 %v9284_v46  ;;  %v1261_v45 = vld [vmem:[#allocation7 + $0x1690] sm:$0xff]  ;;  %v9365_v46 = vcombine.high %v1133_v13, %v1137_v9  ;;  %v9364_v47 = vcombine.low %v1133_v13, %v1137_v9 }
 0x4fd   :  { %7561 = vmatprep.subr.bf16.mxu1 %v9405_v33  ;;  %v1265_v38 = vld [vmem:[#allocation7 + $0x16b0] sm:$0xff] }
 0x4fe   :  { %7601 = vmatpush1.bf16.msra.mxu0 %v9412_v25  ;;  %v1125_v49 = vld [vmem:[#allocation7 + $0x1250] sm:$0xff]  ;;  %v9493_v25 = vcombine.high %v1261_v45, %v1265_v38  ;;  %v9492_v35 = vcombine.low %v1261_v45, %v1265_v38 }
 0x4ff   :  { %7602 = vmatprep.subr.bf16.mxu0 %v9533_v53  ;;  %v1129_v33 = vld [vmem:[#allocation7 + $0x1270] sm:$0xff] }
 0x500   :  { %7562 = vmatpush2.bf16.msra.mxu1 %v9404_v51  ;;  %v1253_v52 = vld [vmem:[#allocation7 + $0x1650] sm:$0xff]  ;;  %v9357_v51 = vcombine.high %v1125_v49, %v1129_v33  ;;  %v9356_v60 = vcombine.low %v1125_v49, %v1129_v33 }
 0x501   :  { %7563 = vmatprep.subr.bf16.mxu1 %v9397_v29  ;;  %v1257_v53 = vld [vmem:[#allocation7 + $0x1670] sm:$0xff] }
 0x502   :  { %7603 = vmatpush2.bf16.msra.mxu0 %v9532_v58  ;;  %v1117_v54 = vld [vmem:[#allocation7 + $0x1210] sm:$0xff]  ;;  %v9485_v58 = vcombine.high %v1253_v52, %v1257_v53  ;;  %v9484_v55 = vcombine.low %v1253_v52, %v1257_v53 }
 0x503   :  { %7604 = vmatprep.subr.bf16.mxu0 %v9525_v62  ;;  %v1121_v29 = vld [vmem:[#allocation7 + $0x1230] sm:$0xff] }
 0x504   :  { %7564 = vmatpush2.bf16.msra.mxu1 %v9396_v0  ;;  %v1245_v42 = vld [vmem:[#allocation7 + $0x1610] sm:$0xff]  ;;  %v9349_v0 = vcombine.high %v1117_v54, %v1121_v29  ;;  %v9348_v4 = vcombine.low %v1117_v54, %v1121_v29 }
 0x505   :  { %7565 = vmatprep.subr.bf16.mxu1 %v9389_v31  ;;  %v1249_v62 = vld [vmem:[#allocation7 + $0x1630] sm:$0xff] }
 0x506   :  { %7605 = vmatpush2.bf16.msra.mxu0 %v9524_v61  ;;  %v1365_v2 = vld [vmem:[#allocation7 + $0x19d0] sm:$0xff]  ;;  %v9477_v61 = vcombine.high %v1245_v42, %v1249_v62  ;;  %v9476_v10 = vcombine.low %v1245_v42, %v1249_v62 }
 0x507   :  { %7606 = vmatprep.subr.bf16.mxu0 %v9517_v7  ;;  %v1369_v31 = vld [vmem:[#allocation7 + $0x19f0] sm:$0xff] }
 0x508   :  { %7566 = vmatpush2.bf16.msra.mxu1 %v9388_v8  ;;  %v1493_v6 = vld [vmem:[#allocation7 + $0x1dd0] sm:$0xff]  ;;  %v9597_v8 = vcombine.high %v1365_v2, %v1369_v31  ;;  %v9596_v14 = vcombine.low %v1365_v2, %v1369_v31 }
 0x509   :  { %7567 = vmatprep.subr.bf16.mxu1 %v9381_v12  ;;  %v1497_v7 = vld [vmem:[#allocation7 + $0x1df0] sm:$0xff] }
 0x50a   :  { %7607 = vmatpush2.bf16.msra.mxu0 %v9516_v3  ;;  %v1357_v11 = vld [vmem:[#allocation7 + $0x1990] sm:$0xff]  ;;  %v9725_v3 = vcombine.high %v1493_v6, %v1497_v7  ;;  %v9724_v21 = vcombine.low %v1493_v6, %v1497_v7 }
 0x50b   :  { %7608 = vmatprep.subr.bf16.mxu0 %v9509_v19  ;;  %v1361_v12 = vld [vmem:[#allocation7 + $0x19b0] sm:$0xff] }
 0x50c   :  { %7568 = vmatpush2.bf16.msra.mxu1 %v9380_v20  ;;  %v1485_v16 = vld [vmem:[#allocation7 + $0x1d90] sm:$0xff]  ;;  %v9589_v20 = vcombine.high %v1357_v11, %v1361_v12 }
 0x50d   :  { %7569 = vmatprep.subr.bf16.mxu1 %v9373_v28  ;;  %v1489_v19 = vld [vmem:[#allocation7 + $0x1db0] sm:$0xff] }
 0x50e   :  { %7609 = vmatpush2.bf16.msra.mxu0 %v9508_v30  ;;  %v1349_v26 = vld [vmem:[#allocation7 + $0x1950] sm:$0xff]  ;;  %v9717_v13 = vcombine.high %v1485_v16, %v1489_v19 }
 0x50f   :  { %7610 = vmatprep.subr.bf16.mxu0 %v9501_v37  ;;  %v1353_v28 = vld [vmem:[#allocation7 + $0x1970] sm:$0xff]  ;;  %v9588_v37 = vcombine.low %v1357_v11, %v1361_v12 }
 0x510   :  { %7570 = vmatpush2.bf16.msra.mxu1 %v9372_v32  ;;  %v1477_v32 = vld [vmem:[#allocation7 + $0x1d50] sm:$0xff]  ;;  %v9580_v54 = vcombine.low %v1349_v26, %v1353_v28 }
 0x511   :  { %7571 = vmatprep.subr.bf16.mxu1 %v9365_v46  ;;  %v1481_v45 = vld [vmem:[#allocation7 + $0x1d70] sm:$0xff] }
 0x512   :  { %7611 = vmatpush2.bf16.msra.mxu0 %v9500_v48  ;;  %v9581_v48 = vcombine.high %v1349_v26, %v1353_v28  ;;  %v1469_v29 = vld [vmem:[#allocation7 + $0x1d10] sm:$0xff]  ;;  %v9708_v62 = vcombine.low %v1477_v32, %v1481_v45 }
 0x513   :  { %7612 = vmatprep.subr.bf16.mxu0 %v9493_v25  ;;  %v1341_v25 = vld [vmem:[#allocation7 + $0x1910] sm:$0xff] }
 0x514   :  { %7572 = vmatpush2.bf16.msra.mxu1 %v9364_v47  ;;  %v1345_v47 = vld [vmem:[#allocation7 + $0x1930] sm:$0xff] }
 0x515   :  { %7573 = vmatprep.subr.bf16.mxu1 %v9357_v51  ;;  %v9709_v51 = vcombine.high %v1477_v32, %v1481_v45  ;;  %v9573_v42 = vcombine.high %v1341_v25, %v1345_v47  ;;  %v1465_v6 = vld [vmem:[#allocation7 + $0x1cf0] sm:$0xff] }
 0x516   :  { %7613 = vmatpush2.bf16.msra.mxu0 %v9492_v35  ;;  %v1329_v11 = vld [vmem:[#allocation7 + $0x18b0] sm:$0xff] }
 0x517   :  { %7614 = vmatprep.subr.bf16.mxu0 %v9485_v58  ;;  %v1473_v58 = vld [vmem:[#allocation7 + $0x1d30] sm:$0xff] }
 0x518   :  { %7574 = vmatpush2.bf16.msra.mxu1 %v9356_v60  ;;  %v9701_v31 = vcombine.high %v1469_v29, %v1473_v58  ;;  %v1321_v26 = vld [vmem:[#allocation7 + $0x1870] sm:$0xff] }
 0x519   :  { %7575 = vmatprep.subr.bf16.mxu1 %v9349_v0  ;;  %v1333_v0 = vld [vmem:[#allocation7 + $0x18d0] sm:$0xff] }
 0x51a   :  { %7615 = vmatpush2.bf16.msra.mxu0 %v9484_v55  ;;  %v1337_v55 = vld [vmem:[#allocation7 + $0x18f0] sm:$0xff] }
 0x51b   :  { %7616 = vmatprep.subr.bf16.mxu0 %v9477_v61  ;;  %v9572_v61 = vcombine.low %v1341_v25, %v1345_v47  ;;  %v9565_v7 = vcombine.high %v1333_v0, %v1337_v55  ;;  %v1309_v45 = vld [vmem:[#allocation7 + $0x1810] sm:$0xff] }
 0x51c   :  { %7576 = vmatpush2.bf16.msra.mxu1 %v9348_v4  ;;  %v1461_v4 = vld [vmem:[#allocation7 + $0x1cd0] sm:$0xff] }
 0x51d   :  { %7627 = vmatprep.subr.bf16.mxu1 %v9597_v8  ;;  %v9700_v8 = vcombine.low %v1469_v29, %v1473_v58  ;;  %v9693_v12 = vcombine.high %v1461_v4, %v1465_v6  ;;  %v1557_v29 = vld [vmem:[#allocation7 + $0x1fd0] sm:$0xff] }
 0x51e   :  { %7617 = vmatpush2.bf16.msra.mxu0 %v9476_v10  ;;  %v1325_v10 = vld [vmem:[#allocation7 + $0x1890] sm:$0xff] }
 0x51f   :  { %v7333_v30 = vpop.f32.mrf.mxu1  ;;  %7578 = vmatmul.mubr.bf16.vlgmr.msra.gmra.mxu1 %v10428_v40  ;;  %7668 = vmatprep.subr.bf16.mxu0 %v9725_v3  ;;  %v9564_v3 = vcombine.low %v1333_v0, %v1337_v55  ;;  %v1561_v58 = vld [vmem:[#allocation7 + $0x1ff0] sm:$0xff] }
 0x520   :  { %v7334_v9 = vadd.f32 %v7333_v30, %v10515_v23  ;;  %7628 = vmatpush1.bf16.msra.mxu1 %v9596_v14  ;;  %7659 = vmatprep.mubr.bf16.mxu1 %v10432_v44  ;;  %v9716_v23 = vcombine.low %v1485_v16, %v1489_v19  ;;  %v1453_v14 = vld [vmem:[#allocation7 + $0x1c90] sm:$0xff]  ;;  %v9557_v19 = vcombine.high %v1325_v10, %v1329_v11 }
 0x521   :  { %v7335_v38 = vpop.f32.mrf.mxu1  ;;  %v7374_v46 = vpop.f32.mrf.mxu0  ;;  %7619 = vmatmul.mubr.bf16.vlgmr.msra.gmra.mxu0 %v10435_v41  ;;  %7629 = vmatprep.subr.bf16.mxu1 %v9589_v20  ;;  %v1457_v16 = vld [vmem:[#allocation7 + $0x1cb0] sm:$0xff]  ;;  %v9692_v20 = vcombine.low %v1461_v4, %v1465_v6  ;;  %v9556_v30 = vcombine.low %v1325_v10, %v1329_v11  ;;  %v9789_v0 = vcombine.high %v1557_v29, %v1561_v58 }
 0x522   :  { %v7336_v49 = vadd.f32 %v7335_v38, %v10518_v39  ;;  %v10525_v33 = vadd.f32 %v7374_v46, %v7334_v9  ;;  %7669 = vmatpush1.bf16.msra.mxu0 %v9724_v21  ;;  %7700 = vmatprep.mubr.bf16.mxu0 %v10438_v22  ;;  %v1317_v21 = vld [vmem:[#allocation7 + $0x1850] sm:$0xff]  ;;  %v9685_v28 = vcombine.high %v1453_v14, %v1457_v16 }
 0x523   :  { %v7337_v52 = vpop.f32.mrf.mxu1  ;;  %v7376_v53 = vpop.f32.mrf.mxu0  ;;  %7670 = vmatprep.subr.bf16.mxu0 %v9717_v13  ;;  %v1445_v13 = vld [vmem:[#allocation7 + $0x1c50] sm:$0xff]  ;;  %v9684_v32 = vcombine.low %v1453_v14, %v1457_v16  ;;  %v9788_v4 = vcombine.low %v1557_v29, %v1561_v58 }
 0x524   :  { %v10528_v35 = vadd.f32 %v7376_v53, %v7336_v49  ;;  %7630 = vmatpush1.bf16.msra.mxu1 %v9588_v37  ;;  %v1449_v9 = vld [vmem:[#allocation7 + $0x1c70] sm:$0xff]  ;;  %v9549_v37 = vcombine.high %v1317_v21, %v1321_v26 }
 0x525   :  { %v7338_v60 = vpop.f32.mrf.mxu1  ;;  %v7378_v39 = vpop.f32.mrf.mxu0  ;;  %7631 = vmatprep.subr.bf16.mxu1 %v9581_v48  ;;  %v1313_v38 = vld [vmem:[#allocation7 + $0x1830] sm:$0xff]  ;;  %v9677_v46 = vcombine.high %v1445_v13, %v1449_v9  ;;  %v9548_v48 = vcombine.low %v1317_v21, %v1321_v26  ;;  %v9676_v47 = vcombine.low %v1445_v13, %v1449_v9 }
 0x526   :  { %7671 = vmatpush1.bf16.msra.mxu0 %v9716_v23  ;;  %v1437_v49 = vld [vmem:[#allocation7 + $0x1c10] sm:$0xff]  ;;  %v9541_v25 = vcombine.high %v1309_v45, %v1313_v38 }
 0x527   :  { %v7379_v2 = vpop.f32.mrf.mxu0  ;;  %7672 = vmatprep.subr.bf16.mxu0 %v9709_v51  ;;  %v1441_v23 = vld [vmem:[#allocation7 + $0x1c30] sm:$0xff] }
 0x528   :  { %7632 = vmatpush1.bf16.msra.mxu1 %v9580_v54  ;;  %v1429_v52 = vld [vmem:[#allocation7 + $0x1bd0] sm:$0xff]  ;;  %v9669_v51 = vcombine.high %v1437_v49, %v1441_v23  ;;  %v9540_v54 = vcombine.low %v1309_v45, %v1313_v38  ;;  %v9668_v39 = vcombine.low %v1437_v49, %v1441_v23 }
 0x529   :  { %7633 = vmatprep.subr.bf16.mxu1 %v9573_v42  ;;  %v1433_v53 = vld [vmem:[#allocation7 + $0x1bf0] sm:$0xff] }
 0x52a   :  { %7673 = vmatpush1.bf16.msra.mxu0 %v9708_v62  ;;  %v9661_v60 = vcombine.high %v1429_v52, %v1433_v53  ;;  %v1421_v42 = vld [vmem:[#allocation7 + $0x1b90] sm:$0xff]  ;;  %v9660_v55 = vcombine.low %v1429_v52, %v1433_v53 }
 0x52b   :  { %7674 = vmatprep.subr.bf16.mxu0 %v9701_v31  ;;  %v1425_v62 = vld [vmem:[#allocation7 + $0x1bb0] sm:$0xff] }
 0x52c   :  { %7634 = vmatpush1.bf16.msra.mxu1 %v9572_v61  ;;  %v1549_v2 = vld [vmem:[#allocation7 + $0x1f90] sm:$0xff]  ;;  %v9653_v61 = vcombine.high %v1421_v42, %v1425_v62  ;;  %v9652_v10 = vcombine.low %v1421_v42, %v1425_v62 }
 0x52d   :  { %7635 = vmatprep.subr.bf16.mxu1 %v9565_v7  ;;  %v1553_v31 = vld [vmem:[#allocation7 + $0x1fb0] sm:$0xff] }
 0x52e   :  { %7675 = vmatpush1.bf16.msra.mxu0 %v9700_v8  ;;  %v1413_v6 = vld [vmem:[#allocation7 + $0x1b50] sm:$0xff]  ;;  %v9781_v8 = vcombine.high %v1549_v2, %v1553_v31  ;;  %v9780_v14 = vcombine.low %v1549_v2, %v1553_v31 }
 0x52f   :  { %7676 = vmatprep.subr.bf16.mxu0 %v9693_v12  ;;  %v1417_v7 = vld [vmem:[#allocation7 + $0x1b70] sm:$0xff] }
 0x530   :  { %7636 = vmatpush1.bf16.msra.mxu1 %v9564_v3  ;;  %v1541_v11 = vld [vmem:[#allocation7 + $0x1f50] sm:$0xff]  ;;  %v9645_v3 = vcombine.high %v1413_v6, %v1417_v7  ;;  %v9644_v21 = vcombine.low %v1413_v6, %v1417_v7 }
 0x531   :  { %7637 = vmatprep.subr.bf16.mxu1 %v9557_v19  ;;  %v1545_v12 = vld [vmem:[#allocation7 + $0x1f70] sm:$0xff] }
 0x532   :  { %7677 = vmatpush1.bf16.msra.mxu0 %v9692_v20  ;;  %v1405_v16 = vld [vmem:[#allocation7 + $0x1b10] sm:$0xff]  ;;  %v9773_v20 = vcombine.high %v1541_v11, %v1545_v12  ;;  %v9772_v13 = vcombine.low %v1541_v11, %v1545_v12  ;;  %v598_v12 = vld [vmem:[#allocation7 + $0x1d8] sm:$0xff] }
 0x533   :  { %7678 = vmatprep.subr.bf16.mxu0 %v9685_v28  ;;  %v1409_v19 = vld [vmem:[#allocation7 + $0x1b30] sm:$0xff] }
 0x534   :  { %7638 = vmatpush1.bf16.msra.mxu1 %v9556_v30  ;;  %v1533_v26 = vld [vmem:[#allocation7 + $0x1f10] sm:$0xff]  ;;  %v9637_v30 = vcombine.high %v1405_v16, %v1409_v19  ;;  %v9636_v45 = vcombine.low %v1405_v16, %v1409_v19  ;;  %v1583_v19 = vsub.s32 4, %v10365_v50 }
 0x535   :  { %7639 = vmatprep.subr.bf16.mxu1 %v9549_v37  ;;  %v1537_v28 = vld [vmem:[#allocation7 + $0x1f30] sm:$0xff] }
 0x536   :  { %7679 = vmatpush1.bf16.msra.mxu0 %v9684_v32  ;;  %v1397_v9 = vld [vmem:[#allocation7 + $0x1ad0] sm:$0xff]  ;;  %v9765_v32 = vcombine.high %v1533_v26, %v1537_v28  ;;  %v9764_v49 = vcombine.low %v1533_v26, %v1537_v28 }
 0x537   :  { %7680 = vmatprep.subr.bf16.mxu0 %v9677_v46  ;;  %v1401_v37 = vld [vmem:[#allocation7 + $0x1af0] sm:$0xff] }
 0x538   :  { %7640 = vmatpush1.bf16.msra.mxu1 %v9548_v48  ;;  %v1525_v38 = vld [vmem:[#allocation7 + $0x1ed0] sm:$0xff]  ;;  %v9629_v48 = vcombine.high %v1397_v9, %v1401_v37  ;;  %v9628_v52 = vcombine.low %v1397_v9, %v1401_v37  ;;  %v594_v9 = vld [vmem:[#allocation7 + $0x1b8] sm:$0xff] }
 0x539   :  { %7641 = vmatprep.subr.bf16.mxu1 %v9541_v25  ;;  %v1529_v46 = vld [vmem:[#allocation7 + $0x1ef0] sm:$0xff] }
 0x53a   :  { %7681 = vmatpush1.bf16.msra.mxu0 %v9676_v47  ;;  %v1389_v23 = vld [vmem:[#allocation7 + $0x1a90] sm:$0xff]  ;;  %v9757_v47 = vcombine.high %v1525_v38, %v1529_v46  ;;  %v9756_v29 = vcombine.low %v1525_v38, %v1529_v46  ;;  %v718_v46 = vld [vmem:[#allocation7 + $0x598] sm:$0xff] }
 0x53b   :  { %7682 = vmatprep.subr.bf16.mxu0 %v9669_v51  ;;  %v1393_v25 = vld [vmem:[#allocation7 + $0x1ab0] sm:$0xff] }
 0x53c   :  { %7642 = vmatpush1.bf16.msra.mxu1 %v9540_v54  ;;  %v1517_v53 = vld [vmem:[#allocation7 + $0x1e90] sm:$0xff]  ;;  %v9621_v54 = vcombine.high %v1389_v23, %v1393_v25  ;;  %v9620_v42 = vcombine.low %v1389_v23, %v1393_v25 }
 0x53d   :  { %7643 = vmatprep.subr.bf16.mxu1 %v9661_v60  ;;  %v1521_v51 = vld [vmem:[#allocation7 + $0x1eb0] sm:$0xff] }
 0x53e   :  { %7683 = vmatpush1.bf16.msra.mxu0 %v9668_v39  ;;  %v1381_v58 = vld [vmem:[#allocation7 + $0x1a50] sm:$0xff]  ;;  %v9749_v39 = vcombine.high %v1517_v53, %v1521_v51  ;;  %v9748_v2 = vcombine.low %v1517_v53, %v1521_v51 }
 0x53f   :  { %7684 = vmatprep.subr.bf16.mxu0 %v9789_v0  ;;  %v1385_v60 = vld [vmem:[#allocation7 + $0x1a70] sm:$0xff] }
 0x540   :  { %7644 = vmatpush2.bf16.msra.mxu1 %v9660_v55  ;;  %v1509_v62 = vld [vmem:[#allocation7 + $0x1e50] sm:$0xff]  ;;  %v9613_v55 = vcombine.high %v1381_v58, %v1385_v60  ;;  %v9612_v6 = vcombine.low %v1381_v58, %v1385_v60  ;;  %v710_v58 = vld [vmem:[#allocation7 + $0x558] sm:$0xff] }
 0x541   :  { %7645 = vmatprep.subr.bf16.mxu1 %v9653_v61  ;;  %v1513_v0 = vld [vmem:[#allocation7 + $0x1e70] sm:$0xff]  ;;  %v714_v60 = vld [vmem:[#allocation7 + $0x578] sm:$0xff] }
 0x542   :  { %7685 = vmatpush2.bf16.msra.mxu0 %v9788_v4  ;;  %v1373_v31 = vld [vmem:[#allocation7 + $0x1a10] sm:$0xff]  ;;  %v9741_v4 = vcombine.high %v1509_v62, %v1513_v0  ;;  %v9740_v11 = vcombine.low %v1509_v62, %v1513_v0 }
 0x543   :  { %7686 = vmatprep.subr.bf16.mxu0 %v9781_v8  ;;  %v1377_v61 = vld [vmem:[#allocation7 + $0x1a30] sm:$0xff] }
 0x544   :  { %7646 = vmatpush2.bf16.msra.mxu1 %v9652_v10  ;;  %v1501_v7 = vld [vmem:[#allocation7 + $0x1e10] sm:$0xff]  ;;  %v9605_v10 = vcombine.high %v1373_v31, %v1377_v61  ;;  %v9604_v16 = vcombine.low %v1373_v31, %v1377_v61  ;;  %v574_v31 = vld [vmem:[#allocation7 + $0x118] sm:$0xff] }
 0x545   :  { %7647 = vmatprep.subr.bf16.mxu1 %v9645_v3  ;;  %v1505_v8 = vld [vmem:[#allocation7 + $0x1e30] sm:$0xff]  ;;  %v602_v3 = vld [vmem:[#allocation7 + $0x1f8] sm:$0xff] }
 0x546   :  { %7687 = vmatpush2.bf16.msra.mxu0 %v9780_v14  ;;  %v9733_v14 = vcombine.high %v1501_v7, %v1505_v8  ;;  %v8831_v26 = vcombine.high %v598_v12, %v602_v3  ;;  %v9732_v28 = vcombine.low %v1501_v7, %v1505_v8  ;;  %v8830_v38 = vcombine.low %v598_v12, %v602_v3  ;;  %v578_v61 = vld [vmem:[#allocation7 + $0x138] sm:$0xff] }
 0x547   :  { %7688 = vmatprep.subr.bf16.mxu0 %v9773_v20  ;;  %v726_v20 = vld [vmem:[#allocation7 + $0x5d8] sm:$0xff] }
 0x548   :  { %7648 = vmatpush2.bf16.msra.mxu1 %v9644_v21  ;;  %v730_v21 = vld [vmem:[#allocation7 + $0x5f8] sm:$0xff] }
 0x549   :  { %7649 = vmatprep.subr.bf16.mxu1 %v9637_v30  ;;  %v1587_v30 = vsub.s32 5, %v10365_v50  ;;  %v8959_v37 = vcombine.high %v726_v20, %v730_v21  ;;  %v8958_v25 = vcombine.low %v726_v20, %v730_v21 }
 0x54a   :  { %7689 = vmatpush2.bf16.msra.mxu0 %v9772_v13  ;;  %v590_v13 = vld [vmem:[#allocation7 + $0x198] sm:$0xff] }
 0x54b   :  { %7690 = vmatprep.subr.bf16.mxu0 %v9765_v32  ;;  %v10062_v32 = vld [vmem:[#allocation8] sm:$0xff] }
 0x54c   :  { %7650 = vmatpush2.bf16.msra.mxu1 %v9636_v45  ;;  %v1584_v45 = vrot.slane %v10062_v32, %v1583_v19  ;;  %v1588_v23 = vrot.slane %v10062_v32, %v1587_v30  ;;  %v570_v19 = vld [vmem:[#allocation7 + $0xf8] sm:$0xff] }
 0x54d   :  { %7651 = vmatprep.subr.bf16.mxu1 %v9629_v48  ;;  %v722_v48 = vld [vmem:[#allocation7 + $0x5b8] sm:$0xff] }
 0x54e   :  { %7691 = vmatpush2.bf16.msra.mxu0 %v9764_v49  ;;  %v8823_v49 = vcombine.high %v590_v13, %v594_v9  ;;  %v8951_v51 = vcombine.high %v718_v46, %v722_v48  ;;  %v698_v30 = vld [vmem:[#allocation7 + $0x4f8] sm:$0xff] }
 0x54f   :  { %7692 = vmatprep.subr.bf16.mxu0 %v9757_v47  ;;  %v582_v47 = vld [vmem:[#allocation7 + $0x158] sm:$0xff] }
 0x550   :  { %7652 = vmatpush2.bf16.msra.mxu1 %v9628_v52  ;;  %v586_v52 = vld [vmem:[#allocation7 + $0x178] sm:$0xff] }
 0x551   :  { %7653 = vmatprep.subr.bf16.mxu1 %v9621_v54  ;;  %v8815_v62 = vcombine.high %v582_v47, %v586_v52  ;;  %v8814_v8 = vcombine.low %v582_v47, %v586_v52  ;;  %v562_v32 = vld [vmem:[#allocation7 + $0xb8] sm:$0xff] }
 0x552   :  { %7693 = vmatpush2.bf16.msra.mxu0 %v9756_v29  ;;  %v8822_v29 = vcombine.low %v590_v13, %v594_v9  ;;  %v554_v47 = vld [vmem:[#allocation7 + $0x78] sm:$0xff] }
 0x553   :  { %7694 = vmatprep.subr.bf16.mxu0 %v9749_v39 }
 0x554   :  { %7654 = vmatpush2.bf16.msra.mxu1 %v9620_v42 }
 0x555   :  { %7655 = vmatprep.subr.bf16.mxu1 %v9613_v55 }
 0x556   :  { %7695 = vmatpush2.bf16.msra.mxu0 %v9748_v2  ;;  %v8950_v2 = vcombine.low %v718_v46, %v722_v48  ;;  %v686_v46 = vld [vmem:[#allocation7 + $0x498] sm:$0xff] }
 0x557   :  { %7696 = vmatprep.subr.bf16.mxu0 %v9741_v4  ;;  %v690_v48 = vld [vmem:[#allocation7 + $0x4b8] sm:$0xff] }
 0x558   :  { %7656 = vmatpush2.bf16.msra.mxu1 %v9612_v6  ;;  %v8943_v6 = vcombine.high %v710_v58, %v714_v60  ;;  %v8919_v52 = vcombine.high %v686_v46, %v690_v48 }
 0x559   :  { %7657 = vmatprep.subr.bf16.mxu1 %v9605_v10  ;;  %v702_v10 = vld [vmem:[#allocation7 + $0x518] sm:$0xff] }
 0x55a   :  { %7697 = vmatpush2.bf16.msra.mxu0 %v9740_v11  ;;  %v706_v11 = vld [vmem:[#allocation7 + $0x538] sm:$0xff] }
 0x55b   :  { %7698 = vmatprep.subr.bf16.mxu0 %v9733_v14  ;;  %v8807_v14 = vcombine.high %v574_v31, %v578_v61  ;;  %v8935_v21 = vcombine.high %v702_v10, %v706_v11  ;;  %v8934_v9 = vcombine.low %v702_v10, %v706_v11  ;;  %v790_v10 = vld [vmem:[#allocation7 + $0x7d8] sm:$0xff] }
 0x55c   :  { %7658 = vmatpush2.bf16.msra.mxu1 %v9604_v16  ;;  %v8942_v16 = vcombine.low %v710_v58, %v714_v60  ;;  %v8918_v58 = vcombine.low %v686_v46, %v690_v48  ;;  %v542_v60 = vld [vmem:[#allocation7 + $0x18] sm:$0xff] }
 0x55d   :  { %7709 = vmatprep.subr.bf16.mxu1 %v8831_v26  ;;  %v8806_v26 = vcombine.low %v574_v31, %v578_v61  ;;  %v794_v11 = vld [vmem:[#allocation7 + $0x7f8] sm:$0xff] }
 0x55e   :  { %7699 = vmatpush2.bf16.msra.mxu0 %v9732_v28  ;;  %v694_v28 = vld [vmem:[#allocation7 + $0x4d8] sm:$0xff] }
 0x55f   :  { %v7415_v53 = vpop.f32.mrf.mxu1  ;;  %7660 = vmatmul.mubr.bf16.vlgmr.msra.gmra.mxu1 %v10448_v15  ;;  %7750 = vmatprep.subr.bf16.mxu0 %v8959_v37  ;;  %v558_v37 = vld [vmem:[#allocation7 + $0x98] sm:$0xff] }
 0x560   :  { %v7416_v54 = vadd.f32 %v7415_v53, %v1584_v45  ;;  %7710 = vmatpush1.bf16.msra.mxu1 %v8830_v38  ;;  %7741 = vmatprep.mubr.bf16.mxu1 %v10370_v17  ;;  %v8927_v45 = vcombine.high %v694_v28, %v698_v30  ;;  %v8790_v53 = vcombine.low %v558_v37, %v562_v32  ;;  %v638_v48 = vld [vmem:[#allocation7 + $0x318] sm:$0xff] }
 0x561   :  { %v7417_v39 = vpop.f32.mrf.mxu1  ;;  %v7456_v42 = vpop.f32.mrf.mxu0  ;;  %7701 = vmatmul.mubr.bf16.vlgmr.msra.gmra.mxu0 %v10451_v27  ;;  %7711 = vmatprep.subr.bf16.mxu1 %v8823_v49  ;;  %v8791_v49 = vcombine.high %v558_v37, %v562_v32  ;;  %v774_v32 = vld [vmem:[#allocation7 + $0x758] sm:$0xff] }
 0x562   :  { %v7418_v0 = vadd.f32 %v7417_v39, %v1588_v23  ;;  %v10535_v55 = vadd.f32 %v7456_v42, %v7416_v54  ;;  %7751 = vmatpush1.bf16.msra.mxu0 %v8958_v25  ;;  %7782 = vmatprep.mubr.bf16.mxu0 %v10379_v24  ;;  %v566_v24 = vld [vmem:[#allocation7 + $0xd8] sm:$0xff]  ;;  %v8926_v23 = vcombine.low %v694_v28, %v698_v30 }
 0x563   :  { %v7419_v4 = vpop.f32.mrf.mxu1  ;;  %v7458_v17 = vpop.f32.mrf.mxu0  ;;  %7752 = vmatprep.subr.bf16.mxu0 %v8951_v51  ;;  %v8799_v13 = vcombine.high %v566_v24, %v570_v19  ;;  %v8798_v38 = vcombine.low %v566_v24, %v570_v19  ;;  %v550_v25 = vld [vmem:[#allocation7 + $0x58] sm:$0xff]  ;;  %v9023_v24 = vcombine.high %v790_v10, %v794_v11  ;;  %v9022_v28 = vcombine.low %v790_v10, %v794_v11 }
 0x564   :  { %v10538_v7 = vadd.f32 %v7458_v17, %v7418_v0  ;;  %7712 = vmatpush1.bf16.msra.mxu1 %v8822_v29  ;;  %v678_v51 = vld [vmem:[#allocation7 + $0x458] sm:$0xff]  ;;  %v8783_v29 = vcombine.high %v550_v25, %v554_v47 }
 0x565   :  { %v7420_v12 = vpop.f32.mrf.mxu1  ;;  %v7460_v3 = vpop.f32.mrf.mxu0  ;;  %7713 = vmatprep.subr.bf16.mxu1 %v8815_v62  ;;  %v682_v54 = vld [vmem:[#allocation7 + $0x478] sm:$0xff]  ;;  %v8782_v62 = vcombine.low %v550_v25, %v554_v47 }
 0x566   :  { %7753 = vmatpush1.bf16.msra.mxu0 %v8950_v2  ;;  %v546_v39 = vld [vmem:[#allocation7 + $0x38] sm:$0xff]  ;;  %v8911_v42 = vcombine.high %v678_v51, %v682_v54  ;;  %v8910_v61 = vcombine.low %v678_v51, %v682_v54 }
 0x567   :  { %v7461_v20 = vpop.f32.mrf.mxu0  ;;  %7754 = vmatprep.subr.bf16.mxu0 %v8943_v6  ;;  %v670_v0 = vld [vmem:[#allocation7 + $0x418] sm:$0xff]  ;;  %v8775_v31 = vcombine.high %v542_v60, %v546_v39 }
 0x568   :  { %7714 = vmatpush1.bf16.msra.mxu1 %v8814_v8  ;;  %v674_v2 = vld [vmem:[#allocation7 + $0x438] sm:$0xff]  ;;  %v8774_v8 = vcombine.low %v542_v60, %v546_v39 }
 0x569   :  { %7715 = vmatprep.subr.bf16.mxu1 %v8807_v14  ;;  %v662_v4 = vld [vmem:[#allocation7 + $0x3d8] sm:$0xff]  ;;  %v8903_v6 = vcombine.high %v670_v0, %v674_v2  ;;  %v8902_v3 = vcombine.low %v670_v0, %v674_v2 }
 0x56a   :  { %7755 = vmatpush1.bf16.msra.mxu0 %v8942_v16  ;;  %v666_v17 = vld [vmem:[#allocation7 + $0x3f8] sm:$0xff] }
 0x56b   :  { %7756 = vmatprep.subr.bf16.mxu0 %v8935_v21  ;;  %v8895_v12 = vcombine.high %v662_v4, %v666_v17  ;;  %v654_v14 = vld [vmem:[#allocation7 + $0x398] sm:$0xff]  ;;  %v8894_v19 = vcombine.low %v662_v4, %v666_v17 }
 0x56c   :  { %7716 = vmatpush1.bf16.msra.mxu1 %v8806_v26  ;;  %v658_v16 = vld [vmem:[#allocation7 + $0x3b8] sm:$0xff] }
 0x56d   :  { %7717 = vmatprep.subr.bf16.mxu1 %v8799_v13  ;;  %v782_v20 = vld [vmem:[#allocation7 + $0x798] sm:$0xff]  ;;  %v8887_v26 = vcombine.high %v654_v14, %v658_v16  ;;  %v8886_v37 = vcombine.low %v654_v14, %v658_v16 }
 0x56e   :  { %7757 = vmatpush1.bf16.msra.mxu0 %v8934_v9  ;;  %v786_v21 = vld [vmem:[#allocation7 + $0x7b8] sm:$0xff] }
 0x56f   :  { %7758 = vmatprep.subr.bf16.mxu0 %v8927_v45  ;;  %v646_v30 = vld [vmem:[#allocation7 + $0x358] sm:$0xff]  ;;  %v9015_v9 = vcombine.high %v782_v20, %v786_v21  ;;  %v9014_v46 = vcombine.low %v782_v20, %v786_v21 }
 0x570   :  { %7718 = vmatpush1.bf16.msra.mxu1 %v8798_v38  ;;  %v650_v13 = vld [vmem:[#allocation7 + $0x378] sm:$0xff] }
 0x571   :  { %7719 = vmatprep.subr.bf16.mxu1 %v8791_v49  ;;  %v778_v45 = vld [vmem:[#allocation7 + $0x778] sm:$0xff]  ;;  %v8879_v38 = vcombine.high %v646_v30, %v650_v13  ;;  %v8878_v25 = vcombine.low %v646_v30, %v650_v13 }
 0x572   :  { %7759 = vmatpush1.bf16.msra.mxu0 %v8926_v23  ;;  %v642_v49 = vld [vmem:[#allocation7 + $0x338] sm:$0xff]  ;;  %v9007_v23 = vcombine.high %v774_v32, %v778_v45  ;;  %v9006_v51 = vcombine.low %v774_v32, %v778_v45 }
 0x573   :  { %7760 = vmatprep.subr.bf16.mxu0 %v8919_v52  ;;  %v766_v47 = vld [vmem:[#allocation7 + $0x718] sm:$0xff]  ;;  %v8870_v60 = vcombine.low %v638_v48, %v642_v49 }
 0x574   :  { %7720 = vmatpush1.bf16.msra.mxu1 %v8790_v53  ;;  %v770_v52 = vld [vmem:[#allocation7 + $0x738] sm:$0xff]  ;;  %v8871_v53 = vcombine.high %v638_v48, %v642_v49 }
 0x575   :  { %7721 = vmatprep.subr.bf16.mxu1 %v8783_v29  ;;  %v630_v54 = vld [vmem:[#allocation7 + $0x2d8] sm:$0xff]  ;;  %v8998_v0 = vcombine.low %v766_v47, %v770_v52 }
 0x576   :  { %7761 = vmatpush1.bf16.msra.mxu0 %v8918_v58  ;;  %v634_v29 = vld [vmem:[#allocation7 + $0x2f8] sm:$0xff]  ;;  %v8999_v58 = vcombine.high %v766_v47, %v770_v52 }
 0x577   :  { %7762 = vmatprep.subr.bf16.mxu0 %v8911_v42  ;;  %v758_v39 = vld [vmem:[#allocation7 + $0x6d8] sm:$0xff]  ;;  %v8862_v4 = vcombine.low %v630_v54, %v634_v29 }
 0x578   :  { %7722 = vmatpush1.bf16.msra.mxu1 %v8782_v62  ;;  %v762_v42 = vld [vmem:[#allocation7 + $0x6f8] sm:$0xff]  ;;  %v8863_v62 = vcombine.high %v630_v54, %v634_v29 }
 0x579   :  { %7723 = vmatprep.subr.bf16.mxu1 %v8775_v31  ;;  %v622_v2 = vld [vmem:[#allocation7 + $0x298] sm:$0xff]  ;;  %v8990_v10 = vcombine.low %v758_v39, %v762_v42 }
 0x57a   :  { %7763 = vmatpush1.bf16.msra.mxu0 %v8910_v61  ;;  %v626_v31 = vld [vmem:[#allocation7 + $0x2b8] sm:$0xff]  ;;  %v8991_v61 = vcombine.high %v758_v39, %v762_v42 }
 0x57b   :  { %7764 = vmatprep.subr.bf16.mxu0 %v8903_v6  ;;  %v750_v17 = vld [vmem:[#allocation7 + $0x698] sm:$0xff]  ;;  %v8854_v14 = vcombine.low %v622_v2, %v626_v31 }
 0x57c   :  { %7724 = vmatpush1.bf16.msra.mxu1 %v8774_v8  ;;  %v754_v6 = vld [vmem:[#allocation7 + $0x6b8] sm:$0xff]  ;;  %v8855_v8 = vcombine.high %v622_v2, %v626_v31 }
 0x57d   :  { %7725 = vmatprep.subr.bf16.mxu1 %v8895_v12  ;;  %v614_v11 = vld [vmem:[#allocation7 + $0x258] sm:$0xff]  ;;  %v8982_v20 = vcombine.low %v750_v17, %v754_v6 }
 0x57e   :  { %7765 = vmatpush1.bf16.msra.mxu0 %v8902_v3  ;;  %v618_v12 = vld [vmem:[#allocation7 + $0x278] sm:$0xff]  ;;  %v8983_v3 = vcombine.high %v750_v17, %v754_v6 }
 0x57f   :  { %7766 = vmatprep.subr.bf16.mxu0 %v9023_v24  ;;  %v742_v16 = vld [vmem:[#allocation7 + $0x658] sm:$0xff]  ;;  %v8846_v30 = vcombine.low %v614_v11, %v618_v12 }
 0x580   :  { %7726 = vmatpush2.bf16.msra.mxu1 %v8894_v19  ;;  %v746_v24 = vld [vmem:[#allocation7 + $0x678] sm:$0xff]  ;;  %v8847_v19 = vcombine.high %v614_v11, %v618_v12 }
 0x581   :  { %7727 = vmatprep.subr.bf16.mxu1 %v8887_v26  ;;  %v606_v21 = vld [vmem:[#allocation7 + $0x218] sm:$0xff]  ;;  %v8974_v32 = vcombine.low %v742_v16, %v746_v24 }
 0x582   :  { %7767 = vmatpush2.bf16.msra.mxu0 %v9022_v28  ;;  %v610_v26 = vld [vmem:[#allocation7 + $0x238] sm:$0xff]  ;;  %v8975_v28 = vcombine.high %v742_v16, %v746_v24 }
 0x583   :  { %7768 = vmatprep.subr.bf16.mxu0 %v9015_v9  ;;  %v734_v13 = vld [vmem:[#allocation7 + $0x618] sm:$0xff]  ;;  %v8838_v48 = vcombine.low %v606_v21, %v610_v26 }
 0x584   :  { %7728 = vmatpush2.bf16.msra.mxu1 %v8886_v37  ;;  %v738_v9 = vld [vmem:[#allocation7 + $0x638] sm:$0xff]  ;;  %v8839_v37 = vcombine.high %v606_v21, %v610_v26 }
 0x585   :  { %7729 = vmatprep.subr.bf16.mxu1 %v8879_v38  ;;  %v854_v45 = vld [vmem:[#allocation7 + $0x9d8] sm:$0xff]  ;;  %v8966_v47 = vcombine.low %v734_v13, %v738_v9 }
 0x586   :  { %7769 = vmatpush2.bf16.msra.mxu0 %v9014_v46  ;;  %v858_v38 = vld [vmem:[#allocation7 + $0x9f8] sm:$0xff]  ;;  %v8967_v46 = vcombine.high %v734_v13, %v738_v9 }
 0x587   :  { %7770 = vmatprep.subr.bf16.mxu0 %v9007_v23  ;;  %v982_v49 = vld [vmem:[#allocation7 + $0xdd8] sm:$0xff]  ;;  %v9086_v54 = vcombine.low %v854_v45, %v858_v38 }
 0x588   :  { %7730 = vmatpush2.bf16.msra.mxu1 %v8878_v25  ;;  %v986_v23 = vld [vmem:[#allocation7 + $0xdf8] sm:$0xff]  ;;  %v9087_v25 = vcombine.high %v854_v45, %v858_v38 }
 0x589   :  { %7731 = vmatprep.subr.bf16.mxu1 %v8871_v53  ;;  %v846_v52 = vld [vmem:[#allocation7 + $0x998] sm:$0xff]  ;;  %v9214_v39 = vcombine.low %v982_v49, %v986_v23 }
 0x58a   :  { %7771 = vmatpush2.bf16.msra.mxu0 %v9006_v51  ;;  %v850_v53 = vld [vmem:[#allocation7 + $0x9b8] sm:$0xff]  ;;  %v9215_v51 = vcombine.high %v982_v49, %v986_v23 }
 0x58b   :  { %7772 = vmatprep.subr.bf16.mxu0 %v8999_v58  ;;  %v974_v29 = vld [vmem:[#allocation7 + $0xd98] sm:$0xff] }
 0x58c   :  { %7732 = vmatpush2.bf16.msra.mxu1 %v8870_v60  ;;  %v978_v58 = vld [vmem:[#allocation7 + $0xdb8] sm:$0xff]  ;;  %v9079_v60 = vcombine.high %v846_v52, %v850_v53 }
 0x58d   :  { %7733 = vmatprep.subr.bf16.mxu1 %v8863_v62  ;;  %v838_v42 = vld [vmem:[#allocation7 + $0x958] sm:$0xff]  ;;  %v9207_v2 = vcombine.high %v974_v29, %v978_v58 }
 0x58e   :  { %7773 = vmatpush2.bf16.msra.mxu0 %v8998_v0  ;;  %v842_v62 = vld [vmem:[#allocation7 + $0x978] sm:$0xff] }
 0x58f   :  { %7774 = vmatprep.subr.bf16.mxu0 %v8991_v61  ;;  %v9078_v61 = vcombine.low %v846_v52, %v850_v53  ;;  %v970_v17 = vld [vmem:[#allocation7 + $0xd78] sm:$0xff] }
 0x590   :  { %7734 = vmatpush2.bf16.msra.mxu1 %v8862_v4  ;;  %v966_v4 = vld [vmem:[#allocation7 + $0xd58] sm:$0xff] }
 0x591   :  { %7735 = vmatprep.subr.bf16.mxu1 %v8855_v8  ;;  %v9199_v16 = vcombine.high %v966_v4, %v970_v17  ;;  %v954_v45 = vld [vmem:[#allocation7 + $0xcf8] sm:$0xff] }
 0x592   :  { %7775 = vmatpush2.bf16.msra.mxu0 %v8990_v10  ;;  %v9071_v10 = vcombine.high %v838_v42, %v842_v62  ;;  %v818_v49 = vld [vmem:[#allocation7 + $0x8b8] sm:$0xff] }
 0x593   :  { %7776 = vmatprep.subr.bf16.mxu0 %v8983_v3  ;;  %v834_v3 = vld [vmem:[#allocation7 + $0x938] sm:$0xff] }
 0x594   :  { %7736 = vmatpush2.bf16.msra.mxu1 %v8854_v14  ;;  %v946_v52 = vld [vmem:[#allocation7 + $0xcb8] sm:$0xff] }
 0x595   :  { %7737 = vmatprep.subr.bf16.mxu1 %v8847_v19  ;;  %v958_v19 = vld [vmem:[#allocation7 + $0xd18] sm:$0xff] }
 0x596   :  { %7777 = vmatpush2.bf16.msra.mxu0 %v8982_v20  ;;  %v962_v20 = vld [vmem:[#allocation7 + $0xd38] sm:$0xff] }
 0x597   :  { %7778 = vmatprep.subr.bf16.mxu0 %v8975_v28  ;;  %v9198_v28 = vcombine.low %v966_v4, %v970_v17  ;;  %v9191_v9 = vcombine.high %v958_v19, %v962_v20  ;;  %v926_v17 = vld [vmem:[#allocation7 + $0xc18] sm:$0xff] }
 0x598   :  { %7738 = vmatpush2.bf16.msra.mxu1 %v8846_v30  ;;  %v826_v30 = vld [vmem:[#allocation7 + $0x8f8] sm:$0xff] }
 0x599   :  { %7739 = vmatprep.subr.bf16.mxu1 %v8839_v37 }
 0x59a   :  { %7779 = vmatpush2.bf16.msra.mxu0 %v8974_v32  ;;  %v950_v32 = vld [vmem:[#allocation7 + $0xcd8] sm:$0xff] }
 0x59b   :  { %7780 = vmatprep.subr.bf16.mxu0 %v8967_v46  ;;  %v9190_v46 = vcombine.low %v958_v19, %v962_v20  ;;  %v9183_v23 = vcombine.high %v950_v32, %v954_v45  ;;  %v910_v19 = vld [vmem:[#allocation7 + $0xb98] sm:$0xff] }
 0x59c   :  { %7740 = vmatpush2.bf16.msra.mxu1 %v8838_v48  ;;  %v814_v48 = vld [vmem:[#allocation7 + $0x898] sm:$0xff] }
 0x59d   :  { %7791 = vmatprep.subr.bf16.mxu1 %v9087_v25  ;;  %v9047_v53 = vcombine.high %v814_v48, %v818_v49  ;;  %v914_v20 = vld [vmem:[#allocation7 + $0xbb8] sm:$0xff] }
 0x59e   :  { %7781 = vmatpush2.bf16.msra.mxu0 %v8966_v47  ;;  %v942_v47 = vld [vmem:[#allocation7 + $0xc98] sm:$0xff] }
 0x59f   :  { %v7497_v0 = vpop.f32.mrf.mxu1  ;;  %7742 = vmatmul.mubr.bf16.vlgmr.msra.gmra.mxu1 %v10372_v18  ;;  %7832 = vmatprep.subr.bf16.mxu0 %v9215_v51  ;;  %v9206_v18 = vcombine.low %v974_v29, %v978_v58  ;;  %v9182_v51 = vcombine.low %v950_v32, %v954_v45  ;;  %v810_v29 = vld [vmem:[#allocation7 + $0x878] sm:$0xff]  ;;  %v9175_v58 = vcombine.high %v942_v47, %v946_v52 }
 0x5a0   :  { %v7498_v31 = vadd.f32 %v7497_v0, %v10535_v55  ;;  %7792 = vmatpush1.bf16.msra.mxu1 %v9086_v54  ;;  %7823 = vmatprep.mubr.bf16.mxu1 %v10386_v34  ;;  %v830_v55 = vld [vmem:[#allocation7 + $0x918] sm:$0xff]  ;;  %v9174_v0 = vcombine.low %v942_v47, %v946_v52  ;;  %v9142_v32 = vcombine.low %v910_v19, %v914_v20 }
 0x5a1   :  { %v7499_v6 = vpop.f32.mrf.mxu1  ;;  %v7538_v8 = vpop.f32.mrf.mxu0  ;;  %7783 = vmatmul.mubr.bf16.vlgmr.msra.gmra.mxu0 %v10388_v36  ;;  %7793 = vmatprep.subr.bf16.mxu1 %v9079_v60  ;;  %v9070_v36 = vcombine.low %v838_v42, %v842_v62  ;;  %v9063_v26 = vcombine.high %v830_v55, %v834_v3  ;;  %v9062_v37 = vcombine.low %v830_v55, %v834_v3  ;;  %v806_v54 = vld [vmem:[#allocation7 + $0x858] sm:$0xff] }
 0x5a2   :  { %v7500_v11 = vadd.f32 %v7499_v6, %v10538_v7  ;;  %v10545_v12 = vadd.f32 %v7538_v8, %v7498_v31  ;;  %7833 = vmatpush1.bf16.msra.mxu0 %v9214_v39  ;;  %7864 = vmatprep.mubr.bf16.mxu0 %v10396_v43  ;;  %v822_v43 = vld [vmem:[#allocation7 + $0x8d8] sm:$0xff]  ;;  %v9046_v60 = vcombine.low %v814_v48, %v818_v49 }
 0x5a3   :  { %v7501_v34 = vpop.f32.mrf.mxu1  ;;  %v7540_v14 = vpop.f32.mrf.mxu0  ;;  %7834 = vmatprep.subr.bf16.mxu0 %v9207_v2  ;;  %v9055_v38 = vcombine.high %v822_v43, %v826_v30  ;;  %v9054_v25 = vcombine.low %v822_v43, %v826_v30  ;;  %v934_v39 = vld [vmem:[#allocation7 + $0xc58] sm:$0xff]  ;;  %v9039_v62 = vcombine.high %v806_v54, %v810_v29  ;;  %v9038_v4 = vcombine.low %v806_v54, %v810_v29 }
 0x5a4   :  { %v10548_v24 = vadd.f32 %v7540_v14, %v7500_v11  ;;  %7794 = vmatpush1.bf16.msra.mxu1 %v9078_v61  ;;  %v938_v42 = vld [vmem:[#allocation7 + $0xc78] sm:$0xff]  ;;  %v9143_v43 = vcombine.high %v910_v19, %v914_v20 }
 0x5a5   :  { %v7502_v21 = vpop.f32.mrf.mxu1  ;;  %v7542_v7 = vpop.f32.mrf.mxu0  ;;  %7795 = vmatprep.subr.bf16.mxu1 %v9071_v10  ;;  %v798_v2 = vld [vmem:[#allocation7 + $0x818] sm:$0xff]  ;;  %v9167_v61 = vcombine.high %v934_v39, %v938_v42  ;;  %v9166_v10 = vcombine.low %v934_v39, %v938_v42 }
 0x5a6   :  { %7835 = vmatpush1.bf16.msra.mxu0 %v9206_v18  ;;  %v802_v31 = vld [vmem:[#allocation7 + $0x838] sm:$0xff] }
 0x5a7   :  { %v7543_v13 = vpop.f32.mrf.mxu0  ;;  %7836 = vmatprep.subr.bf16.mxu0 %v9199_v16  ;;  %v930_v6 = vld [vmem:[#allocation7 + $0xc38] sm:$0xff]  ;;  %v9031_v8 = vcombine.high %v798_v2, %v802_v31  ;;  %v9030_v3 = vcombine.low %v798_v2, %v802_v31 }
 0x5a8   :  { %7796 = vmatpush1.bf16.msra.mxu1 %v9070_v36  ;;  %v918_v11 = vld [vmem:[#allocation7 + $0xbd8] sm:$0xff]  ;;  %v9159_v55 = vcombine.high %v926_v17, %v930_v6  ;;  %v9158_v36 = vcombine.low %v926_v17, %v930_v6 }
 0x5a9   :  { %7797 = vmatprep.subr.bf16.mxu1 %v9063_v26  ;;  %v922_v18 = vld [vmem:[#allocation7 + $0xbf8] sm:$0xff] }
 0x5aa   :  { %7837 = vmatpush1.bf16.msra.mxu0 %v9198_v28  ;;  %v1046_v34 = vld [vmem:[#allocation7 + $0xfd8] sm:$0xff]  ;;  %v9151_v16 = vcombine.high %v918_v11, %v922_v18  ;;  %v9150_v7 = vcombine.low %v918_v11, %v922_v18 }
 0x5ab   :  { %7838 = vmatprep.subr.bf16.mxu0 %v9191_v9  ;;  %v1050_v14 = vld [vmem:[#allocation7 + $0xff8] sm:$0xff] }
 0x5ac   :  { %7798 = vmatpush1.bf16.msra.mxu1 %v9062_v37  ;;  %v9279_v21 = vcombine.high %v1046_v34, %v1050_v14  ;;  %v1038_v26 = vld [vmem:[#allocation7 + $0xf98] sm:$0xff]  ;;  %v9278_v30 = vcombine.low %v1046_v34, %v1050_v14 }
 0x5ad   :  { %7799 = vmatprep.subr.bf16.mxu1 %v9055_v38  ;;  %v1042_v28 = vld [vmem:[#allocation7 + $0xfb8] sm:$0xff] }
 0x5ae   :  { %7839 = vmatpush1.bf16.msra.mxu0 %v9190_v46  ;;  %v902_v13 = vld [vmem:[#allocation7 + $0xb58] sm:$0xff]  ;;  %v9271_v37 = vcombine.high %v1038_v26, %v1042_v28  ;;  %v9270_v48 = vcombine.low %v1038_v26, %v1042_v28 }
 0x5af   :  { %7840 = vmatprep.subr.bf16.mxu0 %v9183_v23  ;;  %v906_v9 = vld [vmem:[#allocation7 + $0xb78] sm:$0xff] }
 0x5b0   :  { %7800 = vmatpush1.bf16.msra.mxu1 %v9054_v25  ;;  %v1030_v45 = vld [vmem:[#allocation7 + $0xf58] sm:$0xff]  ;;  %v9135_v46 = vcombine.high %v902_v13, %v906_v9  ;;  %v9134_v47 = vcombine.low %v902_v13, %v906_v9 }
 0x5b1   :  { %7801 = vmatprep.subr.bf16.mxu1 %v9047_v53  ;;  %v1034_v38 = vld [vmem:[#allocation7 + $0xf78] sm:$0xff] }
 0x5b2   :  { %7841 = vmatpush1.bf16.msra.mxu0 %v9182_v51  ;;  %v894_v49 = vld [vmem:[#allocation7 + $0xb18] sm:$0xff]  ;;  %v9263_v25 = vcombine.high %v1030_v45, %v1034_v38  ;;  %v9262_v54 = vcombine.low %v1030_v45, %v1034_v38 }
 0x5b3   :  { %7842 = vmatprep.subr.bf16.mxu0 %v9175_v58  ;;  %v898_v23 = vld [vmem:[#allocation7 + $0xb38] sm:$0xff] }
 0x5b4   :  { %7802 = vmatpush1.bf16.msra.mxu1 %v9046_v60  ;;  %v1022_v52 = vld [vmem:[#allocation7 + $0xf18] sm:$0xff]  ;;  %v9127_v51 = vcombine.high %v894_v49, %v898_v23  ;;  %v9126_v39 = vcombine.low %v894_v49, %v898_v23 }
 0x5b5   :  { %7803 = vmatprep.subr.bf16.mxu1 %v9039_v62  ;;  %v1026_v53 = vld [vmem:[#allocation7 + $0xf38] sm:$0xff] }
 0x5b6   :  { %7843 = vmatpush1.bf16.msra.mxu0 %v9174_v0  ;;  %v886_v29 = vld [vmem:[#allocation7 + $0xad8] sm:$0xff]  ;;  %v9255_v60 = vcombine.high %v1022_v52, %v1026_v53  ;;  %v9254_v2 = vcombine.low %v1022_v52, %v1026_v53 }
 0x5b7   :  { %7844 = vmatprep.subr.bf16.mxu0 %v9167_v61  ;;  %v890_v58 = vld [vmem:[#allocation7 + $0xaf8] sm:$0xff] }
 0x5b8   :  { %7804 = vmatpush1.bf16.msra.mxu1 %v9038_v4  ;;  %v1014_v42 = vld [vmem:[#allocation7 + $0xed8] sm:$0xff]  ;;  %v9119_v0 = vcombine.high %v886_v29, %v890_v58  ;;  %v9118_v17 = vcombine.low %v886_v29, %v890_v58 }
 0x5b9   :  { %7805 = vmatprep.subr.bf16.mxu1 %v9031_v8  ;;  %v1018_v62 = vld [vmem:[#allocation7 + $0xef8] sm:$0xff] }
 0x5ba   :  { %7845 = vmatpush1.bf16.msra.mxu0 %v9166_v10  ;;  %v878_v31 = vld [vmem:[#allocation7 + $0xa98] sm:$0xff]  ;;  %v9247_v4 = vcombine.high %v1014_v42, %v1018_v62  ;;  %v9246_v11 = vcombine.low %v1014_v42, %v1018_v62 }
 0x5bb   :  { %7846 = vmatprep.subr.bf16.mxu0 %v9159_v55  ;;  %v882_v61 = vld [vmem:[#allocation7 + $0xab8] sm:$0xff] }
 0x5bc   :  { %7806 = vmatpush1.bf16.msra.mxu1 %v9030_v3  ;;  %v1006_v6 = vld [vmem:[#allocation7 + $0xe98] sm:$0xff]  ;;  %v9111_v10 = vcombine.high %v878_v31, %v882_v61  ;;  %v9110_v34 = vcombine.low %v878_v31, %v882_v61 }
 0x5bd   :  { %7807 = vmatprep.subr.bf16.mxu1 %v9151_v16  ;;  %v1010_v8 = vld [vmem:[#allocation7 + $0xeb8] sm:$0xff] }
 0x5be   :  { %7847 = vmatpush1.bf16.msra.mxu0 %v9158_v36  ;;  %v870_v18 = vld [vmem:[#allocation7 + $0xa58] sm:$0xff]  ;;  %v9239_v3 = vcombine.high %v1006_v6, %v1010_v8  ;;  %v9238_v19 = vcombine.low %v1006_v6, %v1010_v8 }
 0x5bf   :  { %7848 = vmatprep.subr.bf16.mxu0 %v9279_v21  ;;  %v874_v55 = vld [vmem:[#allocation7 + $0xa78] sm:$0xff] }
 0x5c0   :  { %7808 = vmatpush2.bf16.msra.mxu1 %v9150_v7  ;;  %v998_v14 = vld [vmem:[#allocation7 + $0xe58] sm:$0xff]  ;;  %v9103_v36 = vcombine.high %v870_v18, %v874_v55  ;;  %v9102_v26 = vcombine.low %v870_v18, %v874_v55 }
 0x5c1   :  { %7809 = vmatprep.subr.bf16.mxu1 %v9143_v43  ;;  %v1002_v16 = vld [vmem:[#allocation7 + $0xe78] sm:$0xff] }
 0x5c2   :  { %7849 = vmatpush2.bf16.msra.mxu0 %v9278_v30  ;;  %v862_v20 = vld [vmem:[#allocation7 + $0xa18] sm:$0xff]  ;;  %v9231_v7 = vcombine.high %v998_v14, %v1002_v16  ;;  %v9230_v13 = vcombine.low %v998_v14, %v1002_v16 }
 0x5c3   :  { %7850 = vmatprep.subr.bf16.mxu0 %v9271_v37  ;;  %v866_v21 = vld [vmem:[#allocation7 + $0xa38] sm:$0xff] }
 0x5c4   :  { %7810 = vmatpush2.bf16.msra.mxu1 %v9142_v32  ;;  %v990_v28 = vld [vmem:[#allocation7 + $0xe18] sm:$0xff]  ;;  %v9095_v30 = vcombine.high %v862_v20, %v866_v21  ;;  %v9094_v45 = vcombine.low %v862_v20, %v866_v21 }
 0x5c5   :  { %7811 = vmatprep.subr.bf16.mxu1 %v9135_v46  ;;  %v994_v43 = vld [vmem:[#allocation7 + $0xe38] sm:$0xff] }
 0x5c6   :  { %7851 = vmatpush2.bf16.msra.mxu0 %v9270_v48  ;;  %v1110_v9 = vld [vmem:[#allocation7 + $0x11d8] sm:$0xff]  ;;  %v9223_v32 = vcombine.high %v990_v28, %v994_v43  ;;  %v9222_v49 = vcombine.low %v990_v28, %v994_v43 }
 0x5c7   :  { %7852 = vmatprep.subr.bf16.mxu0 %v9263_v25  ;;  %v1114_v37 = vld [vmem:[#allocation7 + $0x11f8] sm:$0xff] }
 0x5c8   :  { %7812 = vmatpush2.bf16.msra.mxu1 %v9134_v47  ;;  %v1238_v38 = vld [vmem:[#allocation7 + $0x15d8] sm:$0xff]  ;;  %v9343_v48 = vcombine.high %v1110_v9, %v1114_v37  ;;  %v9342_v52 = vcombine.low %v1110_v9, %v1114_v37 }
 0x5c9   :  { %7813 = vmatprep.subr.bf16.mxu1 %v9127_v51  ;;  %v1242_v46 = vld [vmem:[#allocation7 + $0x15f8] sm:$0xff] }
 0x5ca   :  { %7853 = vmatpush2.bf16.msra.mxu0 %v9262_v54  ;;  %v1102_v23 = vld [vmem:[#allocation7 + $0x1198] sm:$0xff]  ;;  %v9471_v47 = vcombine.high %v1238_v38, %v1242_v46  ;;  %v9470_v29 = vcombine.low %v1238_v38, %v1242_v46 }
 0x5cb   :  { %7854 = vmatprep.subr.bf16.mxu0 %v9255_v60  ;;  %v1106_v25 = vld [vmem:[#allocation7 + $0x11b8] sm:$0xff] }
 0x5cc   :  { %7814 = vmatpush2.bf16.msra.mxu1 %v9126_v39  ;;  %v1230_v53 = vld [vmem:[#allocation7 + $0x1598] sm:$0xff]  ;;  %v9335_v54 = vcombine.high %v1102_v23, %v1106_v25 }
 0x5cd   :  { %7815 = vmatprep.subr.bf16.mxu1 %v9119_v0  ;;  %v1234_v51 = vld [vmem:[#allocation7 + $0x15b8] sm:$0xff]  ;;  %v9334_v0 = vcombine.low %v1102_v23, %v1106_v25 }
 0x5ce   :  { %7855 = vmatpush2.bf16.msra.mxu0 %v9254_v2  ;;  %v1094_v58 = vld [vmem:[#allocation7 + $0x1158] sm:$0xff]  ;;  %v9463_v42 = vcombine.high %v1230_v53, %v1234_v51 }
 0x5cf   :  { %7856 = vmatprep.subr.bf16.mxu0 %v9247_v4  ;;  %v1098_v60 = vld [vmem:[#allocation7 + $0x1178] sm:$0xff] }
 0x5d0   :  { %7816 = vmatpush2.bf16.msra.mxu1 %v9118_v17  ;;  %v1222_v2 = vld [vmem:[#allocation7 + $0x1558] sm:$0xff]  ;;  %v9327_v17 = vcombine.high %v1094_v58, %v1098_v60 }
 0x5d1   :  { %7817 = vmatprep.subr.bf16.mxu1 %v9111_v10  ;;  %v1226_v31 = vld [vmem:[#allocation7 + $0x1578] sm:$0xff] }
 0x5d2   :  { %7857 = vmatpush2.bf16.msra.mxu0 %v9246_v11  ;;  %v1090_v10 = vld [vmem:[#allocation7 + $0x1138] sm:$0xff]  ;;  %v9455_v18 = vcombine.high %v1222_v2, %v1226_v31 }
 0x5d3   :  { %7858 = vmatprep.subr.bf16.mxu0 %v9239_v3  ;;  %v1214_v3 = vld [vmem:[#allocation7 + $0x1518] sm:$0xff] }
 0x5d4   :  { %7818 = vmatpush2.bf16.msra.mxu1 %v9110_v34  ;;  %v1218_v34 = vld [vmem:[#allocation7 + $0x1538] sm:$0xff] }
 0x5d5   :  { %7819 = vmatprep.subr.bf16.mxu1 %v9103_v36  ;;  %v9454_v36 = vcombine.low %v1222_v2, %v1226_v31  ;;  %v9447_v21 = vcombine.high %v1214_v3, %v1218_v34  ;;  %v1210_v28 = vld [vmem:[#allocation7 + $0x14f8] sm:$0xff] }
 0x5d6   :  { %7859 = vmatpush2.bf16.msra.mxu0 %v9238_v19  ;;  %v1082_v19 = vld [vmem:[#allocation7 + $0x10f8] sm:$0xff] }
 0x5d7   :  { %7860 = vmatprep.subr.bf16.mxu0 %v9231_v7  ;;  %v1074_v9 = vld [vmem:[#allocation7 + $0x10b8] sm:$0xff] }
 0x5d8   :  { %7820 = vmatpush2.bf16.msra.mxu1 %v9102_v26  ;;  %v1206_v26 = vld [vmem:[#allocation7 + $0x14d8] sm:$0xff] }
 0x5d9   :  { %7821 = vmatprep.subr.bf16.mxu1 %v9095_v30  ;;  %v9446_v30 = vcombine.low %v1214_v3, %v1218_v34  ;;  %v9439_v37 = vcombine.high %v1206_v26, %v1210_v28  ;;  %v1202_v38 = vld [vmem:[#allocation7 + $0x14b8] sm:$0xff] }
 0x5da   :  { %7861 = vmatpush2.bf16.msra.mxu0 %v9230_v13  ;;  %v1070_v13 = vld [vmem:[#allocation7 + $0x1098] sm:$0xff] }
 0x5db   :  { %7862 = vmatprep.subr.bf16.mxu0 %v9223_v32  ;;  %v9303_v46 = vcombine.high %v1070_v13, %v1074_v9  ;;  %v1066_v23 = vld [vmem:[#allocation7 + $0x1078] sm:$0xff] }
 0x5dc   :  { %7822 = vmatpush2.bf16.msra.mxu1 %v9094_v45  ;;  %v1198_v45 = vld [vmem:[#allocation7 + $0x1498] sm:$0xff] }
 0x5dd   :  { %7873 = vmatprep.subr.bf16.mxu1 %v9343_v48  ;;  %v9438_v48 = vcombine.low %v1206_v26, %v1210_v28  ;;  %v9431_v25 = vcombine.high %v1198_v45, %v1202_v38  ;;  %v1174_v31 = vld [vmem:[#allocation7 + $0x13d8] sm:$0xff] }
 0x5de   :  { %7863 = vmatpush2.bf16.msra.mxu0 %v9222_v49  ;;  %v1062_v49 = vld [vmem:[#allocation7 + $0x1058] sm:$0xff] }
 0x5df   :  { %v7579_v39 = vpop.f32.mrf.mxu1  ;;  %7824 = vmatmul.mubr.bf16.vlgmr.msra.gmra.mxu1 %v10408_v57  ;;  %7914 = vmatprep.subr.bf16.mxu0 %v9471_v47  ;;  %v9462_v57 = vcombine.low %v1230_v53, %v1234_v51  ;;  %v9302_v47 = vcombine.low %v1070_v13, %v1074_v9  ;;  %v1194_v53 = vld [vmem:[#allocation7 + $0x1478] sm:$0xff]  ;;  %v9295_v51 = vcombine.high %v1062_v49, %v1066_v23 }
 0x5e0   :  { %v7580_v62 = vadd.f32 %v7579_v39, %v10545_v12  ;;  %7874 = vmatpush1.bf16.msra.mxu1 %v9342_v52  ;;  %7905 = vmatprep.mubr.bf16.mxu1 %v10412_v59  ;;  %v1086_v12 = vld [vmem:[#allocation7 + $0x1118] sm:$0xff]  ;;  %v9294_v39 = vcombine.low %v1062_v49, %v1066_v23 }
 0x5e1   :  { %v7581_v61 = vpop.f32.mrf.mxu1  ;;  %v7620_v4 = vpop.f32.mrf.mxu0  ;;  %7865 = vmatmul.mubr.bf16.vlgmr.msra.gmra.mxu0 %v10415_v63  ;;  %7875 = vmatprep.subr.bf16.mxu1 %v9335_v54  ;;  %v9326_v63 = vcombine.low %v1094_v58, %v1098_v60  ;;  %v9319_v16 = vcombine.high %v1086_v12, %v1090_v10  ;;  %v9318_v7 = vcombine.low %v1086_v12, %v1090_v10  ;;  %v1190_v52 = vld [vmem:[#allocation7 + $0x1458] sm:$0xff] }
 0x5e2   :  { %v7582_v6 = vadd.f32 %v7581_v61, %v10548_v24  ;;  %v10555_v8 = vadd.f32 %v7620_v4, %v7580_v62  ;;  %7915 = vmatpush1.bf16.msra.mxu0 %v9470_v29  ;;  %7946 = vmatprep.mubr.bf16.mxu0 %v10418_v5  ;;  %v1078_v5 = vld [vmem:[#allocation7 + $0x10d8] sm:$0xff]  ;;  %v9430_v54 = vcombine.low %v1198_v45, %v1202_v38 }
 0x5e3   :  { %v7583_v59 = vpop.f32.mrf.mxu1  ;;  %v7622_v11 = vpop.f32.mrf.mxu0  ;;  %7916 = vmatprep.subr.bf16.mxu0 %v9463_v42  ;;  %v9311_v43 = vcombine.high %v1078_v5, %v1082_v19  ;;  %v9310_v32 = vcombine.low %v1078_v5, %v1082_v19  ;;  %v1054_v29 = vld [vmem:[#allocation7 + $0x1018] sm:$0xff]  ;;  %v9423_v60 = vcombine.high %v1190_v52, %v1194_v53  ;;  %v9422_v2 = vcombine.low %v1190_v52, %v1194_v53 }
 0x5e4   :  { %v10558_v55 = vadd.f32 %v7622_v11, %v7582_v6  ;;  %7876 = vmatpush1.bf16.msra.mxu1 %v9334_v0  ;;  %v1058_v58 = vld [vmem:[#allocation7 + $0x1038] sm:$0xff] }
 0x5e5   :  { %v7584_v14 = vpop.f32.mrf.mxu1  ;;  %v7624_v24 = vpop.f32.mrf.mxu0  ;;  %7877 = vmatprep.subr.bf16.mxu1 %v9327_v17  ;;  %v1182_v42 = vld [vmem:[#allocation7 + $0x1418] sm:$0xff]  ;;  %v9287_v0 = vcombine.high %v1054_v29, %v1058_v58  ;;  %v9286_v17 = vcombine.low %v1054_v29, %v1058_v58 }
 0x5e6   :  { %7917 = vmatpush1.bf16.msra.mxu0 %v9462_v57  ;;  %v1186_v62 = vld [vmem:[#allocation7 + $0x1438] sm:$0xff] }
 0x5e7   :  { %v7625_v20 = vpop.f32.mrf.mxu0  ;;  %7918 = vmatprep.subr.bf16.mxu0 %v9455_v18  ;;  %v1178_v61 = vld [vmem:[#allocation7 + $0x13f8] sm:$0xff]  ;;  %v9415_v4 = vcombine.high %v1182_v42, %v1186_v62  ;;  %v9414_v10 = vcombine.low %v1182_v42, %v1186_v62 }
 0x5e8   :  { %7878 = vmatpush1.bf16.msra.mxu1 %v9326_v63  ;;  %v1302_v6 = vld [vmem:[#allocation7 + $0x17d8] sm:$0xff]  ;;  %v9407_v12 = vcombine.high %v1174_v31, %v1178_v61  ;;  %v9406_v63 = vcombine.low %v1174_v31, %v1178_v61 }
 0x5e9   :  { %7879 = vmatprep.subr.bf16.mxu1 %v9319_v16  ;;  %v1306_v57 = vld [vmem:[#allocation7 + $0x17f8] sm:$0xff] }
 0x5ea   :  { %7919 = vmatpush1.bf16.msra.mxu0 %v9454_v36  ;;  %v1166_v59 = vld [vmem:[#allocation7 + $0x1398] sm:$0xff]  ;;  %v9535_v18 = vcombine.high %v1302_v6, %v1306_v57  ;;  %v9534_v24 = vcombine.low %v1302_v6, %v1306_v57 }
 0x5eb   :  { %7920 = vmatprep.subr.bf16.mxu0 %v9447_v21  ;;  %v1170_v11 = vld [vmem:[#allocation7 + $0x13b8] sm:$0xff] }
 0x5ec   :  { %7880 = vmatpush1.bf16.msra.mxu1 %v9318_v7  ;;  %v1294_v3 = vld [vmem:[#allocation7 + $0x1798] sm:$0xff]  ;;  %v9399_v14 = vcombine.high %v1166_v59, %v1170_v11  ;;  %v9398_v19 = vcombine.low %v1166_v59, %v1170_v11 }
 0x5ed   :  { %7881 = vmatprep.subr.bf16.mxu1 %v9311_v43  ;;  %v1298_v34 = vld [vmem:[#allocation7 + $0x17b8] sm:$0xff] }
 0x5ee   :  { %7921 = vmatpush1.bf16.msra.mxu0 %v9446_v30  ;;  %v1158_v16 = vld [vmem:[#allocation7 + $0x1358] sm:$0xff]  ;;  %v9527_v5 = vcombine.high %v1294_v3, %v1298_v34  ;;  %v9526_v26 = vcombine.low %v1294_v3, %v1298_v34 }
 0x5ef   :  { %7922 = vmatprep.subr.bf16.mxu0 %v9439_v37  ;;  %v1162_v36 = vld [vmem:[#allocation7 + $0x1378] sm:$0xff] }
 0x5f0   :  { %7882 = vmatpush1.bf16.msra.mxu1 %v9310_v32  ;;  %v1286_v20 = vld [vmem:[#allocation7 + $0x1758] sm:$0xff]  ;;  %v9391_v7 = vcombine.high %v1158_v16, %v1162_v36  ;;  %v9390_v13 = vcombine.low %v1158_v16, %v1162_v36 }
 0x5f1   :  { %7883 = vmatprep.subr.bf16.mxu1 %v9303_v46  ;;  %v1290_v21 = vld [vmem:[#allocation7 + $0x1778] sm:$0xff] }
 0x5f2   :  { %7923 = vmatpush1.bf16.msra.mxu0 %v9438_v48  ;;  %v1150_v28 = vld [vmem:[#allocation7 + $0x1318] sm:$0xff]  ;;  %v9519_v30 = vcombine.high %v1286_v20, %v1290_v21  ;;  %v9518_v45 = vcombine.low %v1286_v20, %v1290_v21 }
 0x5f3   :  { %7924 = vmatprep.subr.bf16.mxu0 %v9431_v25  ;;  %v1154_v43 = vld [vmem:[#allocation7 + $0x1338] sm:$0xff] }
 0x5f4   :  { %7884 = vmatpush1.bf16.msra.mxu1 %v9302_v47  ;;  %v1278_v9 = vld [vmem:[#allocation7 + $0x1718] sm:$0xff]  ;;  %v9383_v32 = vcombine.high %v1150_v28, %v1154_v43  ;;  %v9382_v49 = vcombine.low %v1150_v28, %v1154_v43 }
 0x5f5   :  { %7885 = vmatprep.subr.bf16.mxu1 %v9295_v51  ;;  %v1282_v37 = vld [vmem:[#allocation7 + $0x1738] sm:$0xff] }
 0x5f6   :  { %7925 = vmatpush1.bf16.msra.mxu0 %v9430_v54  ;;  %v1142_v38 = vld [vmem:[#allocation7 + $0x12d8] sm:$0xff]  ;;  %v9511_v48 = vcombine.high %v1278_v9, %v1282_v37  ;;  %v9510_v52 = vcombine.low %v1278_v9, %v1282_v37 }
 0x5f7   :  { %7926 = vmatprep.subr.bf16.mxu0 %v9423_v60  ;;  %v1146_v46 = vld [vmem:[#allocation7 + $0x12f8] sm:$0xff] }
 0x5f8   :  { %7886 = vmatpush1.bf16.msra.mxu1 %v9294_v39  ;;  %v1270_v23 = vld [vmem:[#allocation7 + $0x16d8] sm:$0xff]  ;;  %v9375_v47 = vcombine.high %v1142_v38, %v1146_v46  ;;  %v9374_v29 = vcombine.low %v1142_v38, %v1146_v46 }
 0x5f9   :  { %7887 = vmatprep.subr.bf16.mxu1 %v9287_v0  ;;  %v1274_v25 = vld [vmem:[#allocation7 + $0x16f8] sm:$0xff] }
 0x5fa   :  { %7927 = vmatpush1.bf16.msra.mxu0 %v9422_v2  ;;  %v1134_v53 = vld [vmem:[#allocation7 + $0x1298] sm:$0xff]  ;;  %v9503_v54 = vcombine.high %v1270_v23, %v1274_v25  ;;  %v9502_v42 = vcombine.low %v1270_v23, %v1274_v25 }
 0x5fb   :  { %7928 = vmatprep.subr.bf16.mxu0 %v9415_v4  ;;  %v1138_v51 = vld [vmem:[#allocation7 + $0x12b8] sm:$0xff] }
 0x5fc   :  { %7888 = vmatpush1.bf16.msra.mxu1 %v9286_v17  ;;  %v1262_v58 = vld [vmem:[#allocation7 + $0x1698] sm:$0xff]  ;;  %v9367_v39 = vcombine.high %v1134_v53, %v1138_v51  ;;  %v9366_v31 = vcombine.low %v1134_v53, %v1138_v51 }
 0x5fd   :  { %7889 = vmatprep.subr.bf16.mxu1 %v9407_v12  ;;  %v1266_v60 = vld [vmem:[#allocation7 + $0x16b8] sm:$0xff] }
 0x5fe   :  { %7929 = vmatpush1.bf16.msra.mxu0 %v9414_v10  ;;  %v1126_v62 = vld [vmem:[#allocation7 + $0x1258] sm:$0xff]  ;;  %v9495_v2 = vcombine.high %v1262_v58, %v1266_v60  ;;  %v9494_v6 = vcombine.low %v1262_v58, %v1266_v60 }
 0x5ff   :  { %7930 = vmatprep.subr.bf16.mxu0 %v9535_v18  ;;  %v1130_v0 = vld [vmem:[#allocation7 + $0x1278] sm:$0xff] }
 0x600   :  { %7890 = vmatpush2.bf16.msra.mxu1 %v9406_v63  ;;  %v1254_v61 = vld [vmem:[#allocation7 + $0x1658] sm:$0xff]  ;;  %v9359_v17 = vcombine.high %v1126_v62, %v1130_v0  ;;  %v9358_v59 = vcombine.low %v1126_v62, %v1130_v0 }
 0x601   :  { %7891 = vmatprep.subr.bf16.mxu1 %v9399_v14  ;;  %v1258_v4 = vld [vmem:[#allocation7 + $0x1678] sm:$0xff] }
 0x602   :  { %7931 = vmatpush2.bf16.msra.mxu0 %v9534_v24  ;;  %v1118_v57 = vld [vmem:[#allocation7 + $0x1218] sm:$0xff]  ;;  %v9487_v10 = vcombine.high %v1254_v61, %v1258_v4  ;;  %v9486_v3 = vcombine.low %v1254_v61, %v1258_v4 }
 0x603   :  { %7932 = vmatprep.subr.bf16.mxu0 %v9527_v5  ;;  %v1122_v12 = vld [vmem:[#allocation7 + $0x1238] sm:$0xff] }
 0x604   :  { %7892 = vmatpush2.bf16.msra.mxu1 %v9398_v19  ;;  %v1246_v11 = vld [vmem:[#allocation7 + $0x1618] sm:$0xff]  ;;  %v9351_v63 = vcombine.high %v1118_v57, %v1122_v12  ;;  %v9350_v16 = vcombine.low %v1118_v57, %v1122_v12 }
 0x605   :  { %7893 = vmatprep.subr.bf16.mxu1 %v9391_v7  ;;  %v1250_v18 = vld [vmem:[#allocation7 + $0x1638] sm:$0xff] }
 0x606   :  { %7933 = vmatpush2.bf16.msra.mxu0 %v9526_v26  ;;  %v1366_v34 = vld [vmem:[#allocation7 + $0x19d8] sm:$0xff]  ;;  %v9479_v24 = vcombine.high %v1246_v11, %v1250_v18  ;;  %v9478_v20 = vcombine.low %v1246_v11, %v1250_v18 }
 0x607   :  { %7934 = vmatprep.subr.bf16.mxu0 %v9519_v30  ;;  %v1370_v14 = vld [vmem:[#allocation7 + $0x19f8] sm:$0xff] }
 0x608   :  { %7894 = vmatpush2.bf16.msra.mxu1 %v9390_v13  ;;  %v1494_v36 = vld [vmem:[#allocation7 + $0x1dd8] sm:$0xff]  ;;  %v9599_v19 = vcombine.high %v1366_v34, %v1370_v14  ;;  %v9598_v28 = vcombine.low %v1366_v34, %v1370_v14 }
 0x609   :  { %7895 = vmatprep.subr.bf16.mxu1 %v9383_v32  ;;  %v1498_v5 = vld [vmem:[#allocation7 + $0x1df8] sm:$0xff] }
 0x60a   :  { %7935 = vmatpush2.bf16.msra.mxu0 %v9518_v45  ;;  %v1358_v21 = vld [vmem:[#allocation7 + $0x1998] sm:$0xff]  ;;  %v9727_v26 = vcombine.high %v1494_v36, %v1498_v5  ;;  %v9726_v9 = vcombine.low %v1494_v36, %v1498_v5 }
 0x60b   :  { %7936 = vmatprep.subr.bf16.mxu0 %v9511_v48  ;;  %v1362_v7 = vld [vmem:[#allocation7 + $0x19b8] sm:$0xff] }
 0x60c   :  { %7896 = vmatpush2.bf16.msra.mxu1 %v9382_v49  ;;  %v1486_v43 = vld [vmem:[#allocation7 + $0x1d98] sm:$0xff]  ;;  %v9591_v13 = vcombine.high %v1358_v21, %v1362_v7  ;;  %v9590_v48 = vcombine.low %v1358_v21, %v1362_v7 }
 0x60d   :  { %7897 = vmatprep.subr.bf16.mxu1 %v9375_v47  ;;  %v1490_v30 = vld [vmem:[#allocation7 + $0x1db8] sm:$0xff] }
 0x60e   :  { %7937 = vmatpush2.bf16.msra.mxu0 %v9510_v52  ;;  %v1350_v37 = vld [vmem:[#allocation7 + $0x1958] sm:$0xff]  ;;  %v9719_v38 = vcombine.high %v1486_v43, %v1490_v30 }
 0x60f   :  { %7938 = vmatprep.subr.bf16.mxu0 %v9503_v54  ;;  %v1354_v32 = vld [vmem:[#allocation7 + $0x1978] sm:$0xff] }
 0x610   :  { %7898 = vmatpush2.bf16.msra.mxu1 %v9374_v29  ;;  %v1478_v49 = vld [vmem:[#allocation7 + $0x1d58] sm:$0xff]  ;;  %v9583_v52 = vcombine.high %v1350_v37, %v1354_v32  ;;  %v9582_v58 = vcombine.low %v1350_v37, %v1354_v32 }
 0x611   :  { %7899 = vmatprep.subr.bf16.mxu1 %v9367_v39  ;;  %v1482_v23 = vld [vmem:[#allocation7 + $0x1d78] sm:$0xff] }
 0x612   :  { %7939 = vmatpush2.bf16.msra.mxu0 %v9502_v42  ;;  %v1346_v51 = vld [vmem:[#allocation7 + $0x1938] sm:$0xff]  ;;  %v9711_v29 = vcombine.high %v1478_v49, %v1482_v23  ;;  %v9710_v0 = vcombine.low %v1478_v49, %v1482_v23 }
 0x613   :  { %7940 = vmatprep.subr.bf16.mxu0 %v9495_v2  ;;  %v1470_v60 = vld [vmem:[#allocation7 + $0x1d18] sm:$0xff] }
 0x614   :  { %7900 = vmatpush2.bf16.msra.mxu1 %v9366_v31  ;;  %v1474_v39 = vld [vmem:[#allocation7 + $0x1d38] sm:$0xff] }
 0x615   :  { %7901 = vmatprep.subr.bf16.mxu1 %v9359_v17  ;;  %v1334_v2 = vld [vmem:[#allocation7 + $0x18d8] sm:$0xff]  ;;  %v9703_v61 = vcombine.high %v1470_v60, %v1474_v39  ;;  %v9702_v12 = vcombine.low %v1470_v60, %v1474_v39 }
 0x616   :  { %7941 = vmatpush2.bf16.msra.mxu0 %v9494_v6  ;;  %v1462_v17 = vld [vmem:[#allocation7 + $0x1cd8] sm:$0xff] }
 0x617   :  { %7942 = vmatprep.subr.bf16.mxu0 %v9487_v10  ;;  %v1466_v6 = vld [vmem:[#allocation7 + $0x1cf8] sm:$0xff] }
 0x618   :  { %7902 = vmatpush2.bf16.msra.mxu1 %v9358_v59  ;;  %v1326_v10 = vld [vmem:[#allocation7 + $0x1898] sm:$0xff]  ;;  %v9695_v11 = vcombine.high %v1462_v17, %v1466_v6  ;;  %v9694_v14 = vcombine.low %v1462_v17, %v1466_v6 }
 0x619   :  { %7903 = vmatprep.subr.bf16.mxu1 %v9351_v63  ;;  %v1330_v59 = vld [vmem:[#allocation7 + $0x18b8] sm:$0xff] }
 0x61a   :  { %7943 = vmatpush2.bf16.msra.mxu0 %v9486_v3  ;;  %v1454_v63 = vld [vmem:[#allocation7 + $0x1c98] sm:$0xff]  ;;  %v9559_v34 = vcombine.high %v1326_v10, %v1330_v59  ;;  %v9558_v5 = vcombine.low %v1326_v10, %v1330_v59 }
 0x61b   :  { %7944 = vmatprep.subr.bf16.mxu0 %v9479_v24  ;;  %v1458_v3 = vld [vmem:[#allocation7 + $0x1cb8] sm:$0xff] }
 0x61c   :  { %7904 = vmatpush2.bf16.msra.mxu1 %v9350_v16  ;;  %v1318_v24 = vld [vmem:[#allocation7 + $0x1858] sm:$0xff]  ;;  %v9687_v36 = vcombine.high %v1454_v63, %v1458_v3  ;;  %v9686_v7 = vcombine.low %v1454_v63, %v1458_v3 }
 0x61d   :  { %7955 = vmatprep.subr.bf16.mxu1 %v9599_v19  ;;  %v1322_v16 = vld [vmem:[#allocation7 + $0x1878] sm:$0xff] }
 0x61e   :  { %7945 = vmatpush2.bf16.msra.mxu0 %v9478_v20  ;;  %v1446_v19 = vld [vmem:[#allocation7 + $0x1c58] sm:$0xff]  ;;  %v9551_v21 = vcombine.high %v1318_v24, %v1322_v16 }
 0x61f   :  { %v7661_v45 = vpop.f32.mrf.mxu1  ;;  %7906 = vmatmul.mubr.bf16.vlgmr.msra.gmra.mxu1 %v10428_v40  ;;  %7996 = vmatprep.subr.bf16.mxu0 %v9727_v26  ;;  %v9718_v40 = vcombine.low %v1486_v43, %v1490_v30  ;;  %v1450_v20 = vld [vmem:[#allocation7 + $0x1c78] sm:$0xff]  ;;  %v9550_v30 = vcombine.low %v1318_v24, %v1322_v16 }
 0x620   :  { %v7662_v46 = vadd.f32 %v7661_v45, %v10555_v8  ;;  %7956 = vmatpush1.bf16.msra.mxu1 %v9598_v28  ;;  %7987 = vmatprep.mubr.bf16.mxu1 %v10432_v44  ;;  %v1342_v8 = vld [vmem:[#allocation7 + $0x1918] sm:$0xff]  ;;  %v9679_v43 = vcombine.high %v1446_v19, %v1450_v20  ;;  %v9678_v32 = vcombine.low %v1446_v19, %v1450_v20 }
 0x621   :  { %v10563_v25 = vpop.f32.mrf.mxu1  ;;  %v7702_v47 = vpop.f32.mrf.mxu0  ;;  %7947 = vmatmul.mubr.bf16.vlgmr.msra.gmra.mxu0 %v10435_v41  ;;  %7957 = vmatprep.subr.bf16.mxu1 %v9591_v13  ;;  %v9575_v62 = vcombine.high %v1342_v8, %v1346_v51  ;;  %v9574_v4 = vcombine.low %v1342_v8, %v1346_v51  ;;  %v1310_v26 = vld [vmem:[#allocation7 + $0x1818] sm:$0xff] }
 0x622   :  { %v10566_v53 = vadd.f32 %v7702_v47, %v7662_v46  ;;  %7997 = vmatpush1.bf16.msra.mxu0 %v9726_v9  ;;  %8028 = vmatprep.mubr.bf16.mxu0 %v10438_v22  ;;  %v1338_v22 = vld [vmem:[#allocation7 + $0x18f8] sm:$0xff] }
 0x623   :  { %v7665_v54 = vpop.f32.mrf.mxu1  ;;  %v10569_v44 = vpop.f32.mrf.mxu0  ;;  %7998 = vmatprep.subr.bf16.mxu0 %v9719_v38  ;;  %v9567_v57 = vcombine.high %v1334_v2, %v1338_v22  ;;  %v9566_v18 = vcombine.low %v1334_v2, %v1338_v22  ;;  %v1314_v28 = vld [vmem:[#allocation7 + $0x1838] sm:$0xff] }
 0x624   :  { %7958 = vmatpush1.bf16.msra.mxu1 %v9590_v48  ;;  %v1438_v13 = vld [vmem:[#allocation7 + $0x1c18] sm:$0xff]  ;;  %v9543_v37 = vcombine.high %v1310_v26, %v1314_v28  ;;  %v9542_v48 = vcombine.low %v1310_v26, %v1314_v28 }
 0x625   :  { %v7666_v41 = vpop.f32.mrf.mxu1  ;;  %v7706_v42 = vpop.f32.mrf.mxu0  ;;  %7959 = vmatprep.subr.bf16.mxu1 %v9583_v52  ;;  %v1442_v9 = vld [vmem:[#allocation7 + $0x1c38] sm:$0xff] }
 0x626   :  { %7999 = vmatpush1.bf16.msra.mxu0 %v9718_v40  ;;  %v1430_v45 = vld [vmem:[#allocation7 + $0x1bd8] sm:$0xff]  ;;  %v9671_v46 = vcombine.high %v1438_v13, %v1442_v9  ;;  %v9670_v52 = vcombine.low %v1438_v13, %v1442_v9 }
 0x627   :  { %v7707_v31 = vpop.f32.mrf.mxu0  ;;  %8000 = vmatprep.subr.bf16.mxu0 %v9711_v29  ;;  %v1434_v38 = vld [vmem:[#allocation7 + $0x1bf8] sm:$0xff] }
 0x628   :  { %7960 = vmatpush1.bf16.msra.mxu1 %v9582_v58  ;;  %v1558_v49 = vld [vmem:[#allocation7 + $0x1fd8] sm:$0xff]  ;;  %v9663_v47 = vcombine.high %v1430_v45, %v1434_v38  ;;  %v9662_v54 = vcombine.low %v1430_v45, %v1434_v38 }
 0x629   :  { %7961 = vmatprep.subr.bf16.mxu1 %v9575_v62  ;;  %v1562_v23 = vld [vmem:[#allocation7 + $0x1ff8] sm:$0xff] }
 0x62a   :  { %8001 = vmatpush1.bf16.msra.mxu0 %v9710_v0  ;;  %v1422_v40 = vld [vmem:[#allocation7 + $0x1b98] sm:$0xff]  ;;  %v9791_v51 = vcombine.high %v1558_v49, %v1562_v23  ;;  %v9790_v39 = vcombine.low %v1558_v49, %v1562_v23 }
 0x62b   :  { %8002 = vmatprep.subr.bf16.mxu0 %v9703_v61  ;;  %v1426_v8 = vld [vmem:[#allocation7 + $0x1bb8] sm:$0xff] }
 0x62c   :  { %7962 = vmatpush1.bf16.msra.mxu1 %v9574_v4  ;;  %v1550_v29 = vld [vmem:[#allocation7 + $0x1f98] sm:$0xff]  ;;  %v9655_v60 = vcombine.high %v1422_v40, %v1426_v8  ;;  %v9654_v0 = vcombine.low %v1422_v40, %v1426_v8 }
 0x62d   :  { %7963 = vmatprep.subr.bf16.mxu1 %v9567_v57  ;;  %v1554_v58 = vld [vmem:[#allocation7 + $0x1fb8] sm:$0xff] }
 0x62e   :  { %8003 = vmatpush1.bf16.msra.mxu0 %v9702_v12  ;;  %v1414_v41 = vld [vmem:[#allocation7 + $0x1b58] sm:$0xff]  ;;  %v9783_v62 = vcombine.high %v1550_v29, %v1554_v58  ;;  %v9782_v61 = vcombine.low %v1550_v29, %v1554_v58 }
 0x62f   :  { %8004 = vmatprep.subr.bf16.mxu0 %v9695_v11  ;;  %v1418_v42 = vld [vmem:[#allocation7 + $0x1b78] sm:$0xff] }
 0x630   :  { %7964 = vmatpush1.bf16.msra.mxu1 %v9566_v18  ;;  %v1542_v2 = vld [vmem:[#allocation7 + $0x1f58] sm:$0xff]  ;;  %v9647_v31 = vcombine.high %v1414_v41, %v1418_v42  ;;  %v9646_v57 = vcombine.low %v1414_v41, %v1418_v42  ;;  %v9997_v41 = vld [vmem:[#allocation10 + $0x78] sm:$0xff]   ;;  %v1595_v42 = vsub.s32 7, %v10365_v50 }
 0x631   :  { %7965 = vmatprep.subr.bf16.mxu1 %v9559_v34  ;;  %v1546_v22 = vld [vmem:[#allocation7 + $0x1f78] sm:$0xff] }
 0x632   :  { %8005 = vmatpush1.bf16.msra.mxu0 %v9694_v14  ;;  %v1406_v4 = vld [vmem:[#allocation7 + $0x1b18] sm:$0xff]  ;;  %v9775_v6 = vcombine.high %v1542_v2, %v1546_v22  ;;  %v9774_v11 = vcombine.low %v1542_v2, %v1546_v22  ;;  %v10063_v2 = vld [vmem:[#allocation8] sm:$0xff] }
 0x633   :  { %8006 = vmatprep.subr.bf16.mxu0 %v9687_v36  ;;  %v1410_v17 = vld [vmem:[#allocation7 + $0x1b38] sm:$0xff] }
 0x634   :  { %7966 = vmatpush1.bf16.msra.mxu1 %v9558_v5  ;;  %v1534_v12 = vld [vmem:[#allocation7 + $0x1f18] sm:$0xff]  ;;  %v9639_v59 = vcombine.high %v1406_v4, %v1410_v17  ;;  %v9638_v34 = vcombine.low %v1406_v4, %v1410_v17  ;;  %v1596_v4 = vrot.slane %v10063_v2, %v1595_v42  ;;  %v10000_v17 = vld [vmem:[#allocation10 + $0x138] sm:$0xff]   ;;  %v10036_v42 = vld [vmem:[#allocation10 + $0xa0] sm:$0xff]  }
 0x635   :  { %7967 = vmatprep.subr.bf16.mxu1 %v9551_v21  ;;  %v1538_v10 = vld [vmem:[#allocation7 + $0x1f38] sm:$0xff] }
 0x636   :  { %8007 = vmatpush1.bf16.msra.mxu0 %v9686_v7  ;;  %v1398_v18 = vld [vmem:[#allocation7 + $0x1ad8] sm:$0xff]  ;;  %v9767_v3 = vcombine.high %v1534_v12, %v1538_v10  ;;  %v9766_v36 = vcombine.low %v1534_v12, %v1538_v10 }
 0x637   :  { %8008 = vmatprep.subr.bf16.mxu0 %v9679_v43  ;;  %v1402_v63 = vld [vmem:[#allocation7 + $0x1af8] sm:$0xff] }
 0x638   :  { %7968 = vmatpush1.bf16.msra.mxu1 %v9550_v30  ;;  %v1526_v14 = vld [vmem:[#allocation7 + $0x1ed8] sm:$0xff]  ;;  %v9631_v16 = vcombine.high %v1398_v18, %v1402_v63  ;;  %v9630_v21 = vcombine.low %v1398_v18, %v1402_v63 }
 0x639   :  { %7969 = vmatprep.subr.bf16.mxu1 %v9543_v37  ;;  %v1530_v24 = vld [vmem:[#allocation7 + $0x1ef8] sm:$0xff] }
 0x63a   :  { %8009 = vmatpush1.bf16.msra.mxu0 %v9678_v32  ;;  %v1390_v5 = vld [vmem:[#allocation7 + $0x1a98] sm:$0xff]  ;;  %v9759_v20 = vcombine.high %v1526_v14, %v1530_v24  ;;  %v9758_v43 = vcombine.low %v1526_v14, %v1530_v24  ;;  %v10007_v14 = vld [vmem:[#allocation10 + $0x168] sm:$0xff]  }
 0x63b   :  { %8010 = vmatprep.subr.bf16.mxu0 %v9671_v46  ;;  %v1394_v19 = vld [vmem:[#allocation7 + $0x1ab8] sm:$0xff] }
 0x63c   :  { %7970 = vmatpush1.bf16.msra.mxu1 %v9542_v48  ;;  %v1518_v7 = vld [vmem:[#allocation7 + $0x1e98] sm:$0xff]  ;;  %v9623_v28 = vcombine.high %v1390_v5, %v1394_v19  ;;  %v9622_v37 = vcombine.low %v1390_v5, %v1394_v19  ;;  %v10008_v19 = vld [vmem:[#allocation10 + $0x128] sm:$0xff]  }
 0x63d   :  { %7971 = vmatprep.subr.bf16.mxu1 %v9663_v47  ;;  %v1522_v26 = vld [vmem:[#allocation7 + $0x1eb8] sm:$0xff]  ;;  %v7664_v47 = vadd.f32 %v10563_v25, %v10558_v55  ;;  %v8038_v55 = vmax.f32 %v10488_v1, 0.0 }
 0x63e   :  { %8011 = vmatpush1.bf16.msra.mxu0 %v9670_v52  ;;  %v1382_v30 = vld [vmem:[#allocation7 + $0x1a58] sm:$0xff]  ;;  %v9751_v9 = vcombine.high %v1518_v7, %v1522_v26  ;;  %v9750_v46 = vcombine.low %v1518_v7, %v1522_v26  ;;  %v10010_v7 = vld [vmem:[#allocation10 + $0x20] sm:$0xff]   ;;  %v10013_v26 = vld [vmem:[#allocation10 + $0x58] sm:$0xff]  }
 0x63f   :  { %8012 = vmatprep.subr.bf16.mxu0 %v9791_v51  ;;  %v1386_v13 = vld [vmem:[#allocation7 + $0x1a78] sm:$0xff]  ;;  %v7705_v58 = vadd.f32 %v10569_v44, %v7664_v47  ;;  %v10027_v47 = vld [vmem:[#allocation10 + $0x140] sm:$0xff]  }
 0x640   :  { %7972 = vmatpush2.bf16.msra.mxu1 %v9662_v54  ;;  %v1510_v32 = vld [vmem:[#allocation7 + $0x1e58] sm:$0xff]  ;;  %v9615_v38 = vcombine.high %v1382_v30, %v1386_v13  ;;  %v9614_v52 = vcombine.low %v1382_v30, %v1386_v13  ;;  %v10014_v30 = vld [vmem:[#allocation10 + $0x18] sm:$0xff]  }
 0x641   :  { %7973 = vmatprep.subr.bf16.mxu1 %v9655_v60  ;;  %v1514_v45 = vld [vmem:[#allocation7 + $0x1e78] sm:$0xff] }
 0x642   :  { %8013 = vmatpush2.bf16.msra.mxu0 %v9790_v39  ;;  %v1374_v48 = vld [vmem:[#allocation7 + $0x1a18] sm:$0xff]  ;;  %v9743_v23 = vcombine.high %v1510_v32, %v1514_v45  ;;  %v9742_v54 = vcombine.low %v1510_v32, %v1514_v45  ;;  %v1591_v39 = vsub.s32 6, %v10365_v50  ;;  %v10021_v45 = vld [vmem:[#allocation10 + $0x48] sm:$0xff]  }
 0x643   :  { %8014 = vmatprep.subr.bf16.mxu0 %v9783_v62  ;;  %v1378_v49 = vld [vmem:[#allocation7 + $0x1a38] sm:$0xff]  ;;  %v9999_v62 = vld [vmem:[#allocation10 + $0x178] sm:$0xff]  }
 0x644   :  { %7974 = vmatpush2.bf16.msra.mxu1 %v9654_v0  ;;  %v1502_v40 = vld [vmem:[#allocation7 + $0x1e18] sm:$0xff]  ;;  %v9607_v51 = vcombine.high %v1374_v48, %v1378_v49  ;;  %v9606_v60 = vcombine.low %v1374_v48, %v1378_v49  ;;  %v8042_v0 = vmax.f32 %v7705_v58, 0.0  ;;  %v1592_v22 = vrot.slane %v10063_v2, %v1591_v39  ;;  %v10022_v48 = vld [vmem:[#allocation10 + $0x8] sm:$0xff]   ;;  %v10025_v49 = vld [vmem:[#allocation10 + $0x40] sm:$0xff]  }
 0x645   :  { %7975 = vmatprep.subr.bf16.mxu1 %v9647_v31  ;;  %v1506_v8 = vld [vmem:[#allocation7 + $0x1e38] sm:$0xff]  ;;  %v9998_v31 = vld [vmem:[#allocation10 + $0x38] sm:$0xff]  }
 0x646   :  { %8015 = vmatpush2.bf16.msra.mxu0 %v9782_v61  ;;  %v9735_v29 = vcombine.high %v1502_v40, %v1506_v8  ;;  %v9734_v25 = vcombine.low %v1502_v40, %v1506_v8  ;;  %v10001_v44 = vld [vmem:[#allocation10 + $0x70] sm:$0xff]   ;;  %v8046_v61 = vpack.c.bf16 %v8038_v55, %v8038_v55  ;;  %v8037_v40 = vmax.f32 %v10485_v56, 0.0  ;;  %v10029_v8 = vld [vmem:[#allocation10 + $0xf8] sm:$0xff]  }
 0x647   :  { %8016 = vmatprep.subr.bf16.mxu0 %v9775_v6  ;;  %v10003_v1 = vld [vmem:[#allocation10 + $0x170] sm:$0xff]   ;;  %v10030_v58 = vld [vmem:[#allocation10 + $0xb8] sm:$0xff]  }
 0x648   :  { %7976 = vmatpush2.bf16.msra.mxu1 %v9646_v57  ;;  %v8050_v57 = vpack.c.bf16 %v8042_v0, %v8042_v0  ;;  %v10002_v12 = vld [vmem:[#allocation10 + $0x30] sm:$0xff]   ;;  %v10038_v0 = vld [vmem:[#allocation10 + $0x98] sm:$0xff]  }
 0x649   :  { %7977 = vmatprep.subr.bf16.mxu1 %v9639_v59  ;;  %v10017_v13 = vld [vmem:[#allocation10 + $0x50] sm:$0xff]  }
 0x64a   :  { %8017 = vmatpush2.bf16.msra.mxu0 %v9774_v11  ;;  %v10005_v11 = vld [vmem:[#allocation10 + $0x68] sm:$0xff]   ;;  %v10018_v32 = vld [vmem:[#allocation10 + $0x10] sm:$0xff]  }
 0x64b   :  { %8018 = vmatprep.subr.bf16.mxu0 %v9767_v3  ;;  %v10004_v3 = vld [vmem:[#allocation10 + $0x130] sm:$0xff]  }
 0x64c   :  { %7978 = vmatpush2.bf16.msra.mxu1 %v9638_v34  ;;  %v10031_v39 = vld [vmem:[#allocation10 + $0xf0] sm:$0xff]  }
 0x64d   :  { %7979 = vmatprep.subr.bf16.mxu1 %v9631_v16  ;;  %v10006_v16 = vld [vmem:[#allocation10 + $0x28] sm:$0xff]   ;;  %v10032_v56 = vld [vmem:[#allocation10 + $0xb0] sm:$0xff]  }
 0x64e   :  { %8019 = vmatpush2.bf16.msra.mxu0 %v9766_v36  ;;  %v10039_v2 = vld [vmem:[#allocation10 + $0xd0] sm:$0xff]  }
 0x64f   :  { %8020 = vmatprep.subr.bf16.mxu0 %v9759_v20 }
 0x650   :  { %7980 = vmatpush2.bf16.msra.mxu1 %v9630_v21  ;;  %v10011_v21 = vld [vmem:[#allocation10 + $0x160] sm:$0xff]  }
 0x651   :  { %7981 = vmatprep.subr.bf16.mxu1 %v9623_v28  ;;  %v10012_v28 = vld [vmem:[#allocation10 + $0x120] sm:$0xff]  }
 0x652   :  { %8021 = vmatpush2.bf16.msra.mxu0 %v9758_v43  ;;  %v10015_v43 = vld [vmem:[#allocation10 + $0x158] sm:$0xff]  }
 0x653   :  { %8022 = vmatprep.subr.bf16.mxu0 %v9751_v9  ;;  %v10016_v9 = vld [vmem:[#allocation10 + $0x118] sm:$0xff]  }
 0x654   :  { %7982 = vmatpush2.bf16.msra.mxu1 %v9622_v37  ;;  %v10019_v37 = vld [vmem:[#allocation10 + $0x150] sm:$0xff]  }
 0x655   :  { %7983 = vmatprep.subr.bf16.mxu1 %v9615_v38  ;;  %v10020_v38 = vld [vmem:[#allocation10 + $0x110] sm:$0xff]  }
 0x656   :  { %8023 = vmatpush2.bf16.msra.mxu0 %v9750_v46  ;;  %v10023_v46 = vld [vmem:[#allocation10 + $0x148] sm:$0xff]  }
 0x657   :  { %8024 = vmatprep.subr.bf16.mxu0 %v9743_v23  ;;  %v10024_v23 = vld [vmem:[#allocation10 + $0x108] sm:$0xff]  }
 0x658   :  { %7984 = vmatpush2.bf16.msra.mxu1 %v9614_v52  ;;  %v10026_v52 = vld [vmem:[#allocation10] sm:$0xff]  }
 0x659   :  { %7985 = vmatprep.subr.bf16.mxu1 %v9607_v51  ;;  %v8040_v51 = vmax.f32 %v10528_v35, 0.0  ;;  %v10033_v35 = vld [vmem:[#allocation10 + $0xe8] sm:$0xff]  }
 0x65a   :  { %8025 = vmatpush2.bf16.msra.mxu0 %v9742_v54  ;;  %v10028_v54 = vld [vmem:[#allocation10 + $0x100] sm:$0xff]  }
 0x65b   :  { %8026 = vmatprep.subr.bf16.mxu0 %v9735_v29  ;;  %v8041_v29 = vmax.f32 %v10566_v53, 0.0  ;;  %v10035_v53 = vld [vmem:[#allocation10 + $0xe0] sm:$0xff]  }
 0x65c   :  { %7986 = vmatpush2.bf16.msra.mxu1 %v9606_v60  ;;  %v8045_v60 = vpack.c.bf16 %v8037_v40, %v8037_v40 }
 0x65d   :  { %9860 = vmatprep.subr.bf16.mxu1 %v9997_v41  ;;  %v8048_v41 = vpack.c.bf16 %v8040_v51, %v8040_v51  ;;  %v8049_v55 = vpack.c.bf16 %v8041_v29, %v8041_v29 }
 0x65e   :  { %8027 = vmatpush2.bf16.msra.mxu0 %v9734_v25  ;;  %v10034_v25 = vld [vmem:[#allocation10 + $0xa8] sm:$0xff]  }
 0x65f   :  { %v7743_v6 = vpop.f32.mrf.mxu1  ;;  %7988 = vmatmul.mubr.bf16.vlgmr.msra.gmra.mxu1 %v10448_v15  ;;  %9904 = vmatprep.subr.bf16.mxu0 %v9999_v62  ;;  %v10037_v62 = vld [vmem:[#allocation10 + $0xd8] sm:$0xff]  }
 0x660   :  { %v7744_v50 = vadd.f32 %v7743_v6, %v1592_v22  ;;  %9861 = vmatpush3.bf16.msra.mxu1 %v9998_v31  ;;  %8604 = vmatprep.mubr.bf16.mxu1 %v8046_v61  ;;  %v10040_v22 = vld [vmem:[#allocation10 + $0x90] sm:$0xff]   ;;  %v10041_v31 = vld [vmem:[#allocation10 + $0xc8] sm:$0xff]   ;;  %v10043_v61 = vld [vmem:[#allocation10 + $0xc0] sm:$0xff]  }
 0x661   :  { %v7745_v10 = vpop.f32.mrf.mxu1  ;;  %v7784_v59 = vpop.f32.mrf.mxu0  ;;  %8029 = vmatmul.mubr.bf16.vlgmr.msra.gmra.mxu0 %v10451_v27  ;;  %9862 = vmatprep.subr.bf16.mxu1 %v10001_v44  ;;  %v10009_v27 = vld [vmem:[#allocation10 + $0x60] sm:$0xff]   ;;  %v10042_v44 = vld [vmem:[#allocation10 + $0x88] sm:$0xff]   ;;  %v10045_v6 = vld [vmem:[#allocation10 + $0x1f8] sm:$0xff]  }
 0x662   :  { %v7746_v18 = vadd.f32 %v7745_v10, %v1596_v4  ;;  %v10579_v63 = vadd.f32 %v7784_v59, %v7744_v50  ;;  %9905 = vmatpush3.bf16.msra.mxu0 %v10000_v17  ;;  %8684 = vmatprep.mubr.bf16.mxu0 %v8050_v57  ;;  %v10044_v4 = vld [vmem:[#allocation10 + $0x80] sm:$0xff]   ;;  %v8039_v17 = vmax.f32 %v10525_v33, 0.0  ;;  %v10047_v50 = vld [vmem:[#allocation10 + $0x1f0] sm:$0xff]  }
 0x663   :  { %v7747_v15 = vpop.f32.mrf.mxu1  ;;  %v7786_v34 = vpop.f32.mrf.mxu0  ;;  %9906 = vmatprep.subr.bf16.mxu0 %v10003_v1  ;;  %v10046_v1 = vld [vmem:[#allocation10 + $0x1b8] sm:$0xff]   ;;  %v10048_v59 = vld [vmem:[#allocation10 + $0x1b0] sm:$0xff]  }
 0x664   :  { %v10581_v24 = vadd.f32 %v7786_v34, %v7746_v18  ;;  %9863 = vmatpush3.bf16.msra.mxu1 %v10002_v12  ;;  %v8047_v57 = vpack.c.bf16 %v8039_v17, %v8039_v17 }
 0x665   :  { %v7748_v36 = vpop.f32.mrf.mxu1  ;;  %v7788_v5 = vpop.f32.mrf.mxu0  ;;  %9864 = vmatprep.subr.bf16.mxu1 %v10005_v11 }
 0x666   :  { %9907 = vmatpush3.bf16.msra.mxu0 %v10004_v3  ;;  %v10049_v3 = vld [vmem:[#allocation10 + $0x1e8] sm:$0xff]  }
 0x667   :  { %v7789_v20 = vpop.f32.mrf.mxu0  ;;  %9908 = vmatprep.subr.bf16.mxu0 %v10007_v14  ;;  %v10050_v36 = vld [vmem:[#allocation10 + $0x1a8] sm:$0xff]  }
 0x668   :  { %9865 = vmatpush3.bf16.msra.mxu1 %v10006_v16 }
 0x669   :  { %9866 = vmatprep.subr.bf16.mxu1 %v10009_v27 }
 0x66a   :  { %9909 = vmatpush3.bf16.msra.mxu0 %v10008_v19  ;;  %v10051_v19 = vld [vmem:[#allocation10 + $0x1e0] sm:$0xff]  }
 0x66b   :  { %9910 = vmatprep.subr.bf16.mxu0 %v10011_v21  ;;  %v10053_v21 = vld [vmem:[#allocation10 + $0x1d8] sm:$0xff]  }
 0x66c   :  { %9867 = vmatpush3.bf16.msra.mxu1 %v10010_v7  ;;  %v10054_v7 = vld [vmem:[#allocation10 + $0x198] sm:$0xff]  }
 0x66d   :  { %9868 = vmatprep.subr.bf16.mxu1 %v10013_v26  ;;  %v10055_v26 = vld [vmem:[#allocation10 + $0x1d0] sm:$0xff]  }
 0x66e   :  { %9911 = vmatpush3.bf16.msra.mxu0 %v10012_v28  ;;  %v10057_v28 = vld [vmem:[#allocation10 + $0x1c8] sm:$0xff]  }
 0x66f   :  { %9912 = vmatprep.subr.bf16.mxu0 %v10015_v43  ;;  %v10058_v43 = vld [vmem:[#allocation10 + $0x188] sm:$0xff]  }
 0x670   :  { %9869 = vmatpush3.bf16.msra.mxu1 %v10014_v30  ;;  %v10059_v30 = vld [vmem:[#allocation10 + $0x1c0] sm:$0xff]  }
 0x671   :  { %9870 = vmatprep.subr.bf16.mxu1 %v10017_v13  ;;  %v10060_v13 = vld [vmem:[#allocation10 + $0x180] sm:$0xff]  }
 0x672   :  { %9913 = vmatpush3.bf16.msra.mxu0 %v10016_v9 }
 0x673   :  { %9914 = vmatprep.subr.bf16.mxu0 %v10019_v37 }
 0x674   :  { %9871 = vmatpush3.bf16.msra.mxu1 %v10018_v32 }
 0x675   :  { %9872 = vmatprep.subr.bf16.mxu1 %v10021_v45 }
 0x676   :  { %9915 = vmatpush3.bf16.msra.mxu0 %v10020_v38 }
 0x677   :  { %9916 = vmatprep.subr.bf16.mxu0 %v10023_v46 }
 0x678   :  { %9873 = vmatpush3.bf16.msra.mxu1 %v10022_v48 }
 0x679   :  { %9874 = vmatprep.subr.bf16.mxu1 %v10025_v49 }
 0x67a   :  { %9917 = vmatpush3.bf16.msra.mxu0 %v10024_v23 }
 0x67b   :  { %9918 = vmatprep.subr.bf16.mxu0 %v10027_v47 }
 0x67c   :  { %9875 = vmatpush3.bf16.msra.mxu1 %v10026_v52 }
 0x67d   :  { %9882 = vmatprep.subr.bf16.mxu1 %v10029_v8 }
 0x67e   :  { %9919 = vmatpush3.bf16.msra.mxu0 %v10028_v54 }
 0x67f   :  { %8605 = vmatmul.mubr.bf16.vlgmr.msra.gmra.mxu1 %v8045_v60 }
 0x680   :  { %9883 = vmatpush3.bf16.msra.mxu1 %v10030_v58  ;;  %8644 = vmatprep.mubr.bf16.mxu1 %v8048_v41 }
 0x681   :  { %8685 = vmatmul.mubr.bf16.vlgmr.msra.gmra.mxu0 %v8049_v55  ;;  %9884 = vmatprep.subr.bf16.mxu1 %v10031_v39 }
 0x684   :  { %9885 = vmatpush3.bf16.msra.mxu1 %v10032_v56 }
 0x685   :  { %9886 = vmatprep.subr.bf16.mxu1 %v10033_v35 }
 0x688   :  { %9887 = vmatpush3.bf16.msra.mxu1 %v10034_v25 }
 0x689   :  { %9888 = vmatprep.subr.bf16.mxu1 %v10035_v53 }
 0x68c   :  { %9889 = vmatpush3.bf16.msra.mxu1 %v10036_v42 }
 0x68d   :  { %9890 = vmatprep.subr.bf16.mxu1 %v10037_v62 }
 0x690   :  { %9891 = vmatpush3.bf16.msra.mxu1 %v10038_v0 }
 0x691   :  { %9892 = vmatprep.subr.bf16.mxu1 %v10039_v2 }
 0x694   :  { %9893 = vmatpush3.bf16.msra.mxu1 %v10040_v22 }
 0x695   :  { %9894 = vmatprep.subr.bf16.mxu1 %v10041_v31 }
 0x698   :  { %9895 = vmatpush3.bf16.msra.mxu1 %v10042_v44 }
 0x699   :  { %9896 = vmatprep.subr.bf16.mxu1 %v10043_v61 }
 0x69c   :  { %9897 = vmatpush3.bf16.msra.mxu1 %v10044_v4 }
 0x69d   :  { %9926 = vmatprep.subr.bf16.mxu1 %v10045_v6 }
 0x69f   :  { %v7825_v12 = vpop.f32.mrf.mxu1  ;;  %8645 = vmatmul.mubr.bf16.vlgmr.msra.gmra.mxu1 %v8047_v57 }
 0x6a0   :  { %v7826_v10 = vadd.f32 %v7825_v12, %v10579_v63  ;;  %9927 = vmatpush3.bf16.msra.mxu1 %v10046_v1  ;;  %v10052_v63 = vld [vmem:[#allocation10 + $0x1a0] sm:$0xff]  }
 0x6a1   :  { %v7827_v11 = vpop.f32.mrf.mxu1  ;;  %v7866_v18 = vpop.f32.mrf.mxu0  ;;  %9928 = vmatprep.subr.bf16.mxu1 %v10047_v50  ;;  %v9792_v50 = vld [vmem:[#allocation11] ss:$0 sm:$0xff] }
 0x6a2   :  { %v7828_v15 = vadd.f32 %v7827_v11, %v10581_v24  ;;  %v7867_v33 = vadd.f32 %v7866_v18, %v7826_v10  ;;  %v10056_v24 = vld [vmem:[#allocation10 + $0x190] sm:$0xff]  }
 0x6a3   :  { %v7829_v34 = vpop.f32.mrf.mxu1  ;;  %v7868_v14 = vpop.f32.mrf.mxu0 }
 0x6a4   :  { %v7869_v16 = vadd.f32 %v7868_v14, %v7828_v15  ;;  %9929 = vmatpush3.bf16.msra.mxu1 %v10048_v59 }
 0x6a5   :  { %v7830_v5 = vpop.f32.mrf.mxu1  ;;  %v7870_v27 = vpop.f32.mrf.mxu0  ;;  %9930 = vmatprep.subr.bf16.mxu1 %v10049_v3 }
 0x6a7   :  { %v7871_v20 = vpop.f32.mrf.mxu0 }
 0x6a8   :  { %9931 = vmatpush3.bf16.msra.mxu1 %v10050_v36 }
 0x6a9   :  { %9932 = vmatprep.subr.bf16.mxu1 %v10051_v19 }
 0x6ac   :  { %9933 = vmatpush3.bf16.msra.mxu1 %v10052_v63 }
 0x6ad   :  { %9934 = vmatprep.subr.bf16.mxu1 %v10053_v21 }
 0x6b0   :  { %9935 = vmatpush3.bf16.msra.mxu1 %v10054_v7 }
 0x6b1   :  { %9936 = vmatprep.subr.bf16.mxu1 %v10055_v26 }
 0x6b4   :  { %9937 = vmatpush3.bf16.msra.mxu1 %v10056_v24 }
 0x6b5   :  { %9938 = vmatprep.subr.bf16.mxu1 %v10057_v28 }
 0x6b8   :  { %9939 = vmatpush3.bf16.msra.mxu1 %v10058_v43 }
 0x6b9   :  { %9940 = vmatprep.subr.bf16.mxu1 %v10059_v30 }
 0x6bc   :  { %9941 = vmatpush3.bf16.msra.mxu1 %v10060_v13 }
 0x6df   :  { %v7907_v9 = vpop.f32.mrf.mxu1 }
 0x6e0   :  { %v7908_v23 = vadd.f32 %v7907_v9, %v7867_v33 }
 0x6e1   :  { %v7909_v37 = vpop.f32.mrf.mxu1  ;;  %v7948_v32 = vpop.f32.mrf.mxu0 }
 0x6e2   :  { %v7910_v47 = vadd.f32 %v7909_v37, %v7869_v16  ;;  %v7949_v52 = vadd.f32 %v7948_v32, %v7908_v23 }
 0x6e3   :  { %v7911_v45 = vpop.f32.mrf.mxu1  ;;  %v7950_v38 = vpop.f32.mrf.mxu0 }
 0x6e4   :  { %v7951_v8 = vadd.f32 %v7950_v38, %v7910_v47 }
 0x6e5   :  { %v7912_v46 = vpop.f32.mrf.mxu1  ;;  %v7952_v48 = vpop.f32.mrf.mxu0 }
 0x6e7   :  { %v7953_v49 = vpop.f32.mrf.mxu0 }
 0x71f   :  { %v7989_v40 = vpop.f32.mrf.mxu1 }
 0x720   :  { %v7990_v51 = vadd.f32 %v7989_v40, %v7949_v52 }
 0x721   :  { %v7991_v54 = vpop.f32.mrf.mxu1  ;;  %v8030_v29 = vpop.f32.mrf.mxu0 }
 0x722   :  { %v7992_v58 = vadd.f32 %v7991_v54, %v7951_v8  ;;  %v8031_v60 = vadd.f32 %v8030_v29, %v7990_v51 }
 0x723   :  { %v7993_v39 = vpop.f32.mrf.mxu1  ;;  %v8032_v41 = vpop.f32.mrf.mxu0 }
 0x724   :  { %v8033_v55 = vadd.f32 %v8032_v41, %v7992_v58  ;;  %v8043_v56 = vmax.f32 %v8031_v60, 0.0 }
 0x725   :  { %v7994_v35 = vpop.f32.mrf.mxu1  ;;  %v8034_v25 = vpop.f32.mrf.mxu0 }
 0x726   :  { %v8044_v53 = vmax.f32 %v8033_v55, 0.0  ;;  %v8051_v0 = vpack.c.bf16 %v8043_v56, %v8043_v56 }
 0x727   :  { %v8035_v42 = vpop.f32.mrf.mxu0 }
 0x728   :  { %v8052_v62 = vpack.c.bf16 %v8044_v53, %v8044_v53 }
 0x72a   :  { %8724 = vmatprep.mubr.bf16.mxu1 %v8052_v62 }
 0x72b   :  { %8725 = vmatmul.mubr.bf16.vlgmr.msra.gmra.mxu1 %v8051_v0 }
 0x73f   :  { %v9876_v2 = vpop.f32.mrf.mxu1 }
 0x741   :  { %v9877_v22 = vpop.f32.mrf.mxu1  ;;  %v9920_v31 = vpop.f32.mrf.mxu0 }
 0x742   :  { %v9878_v44 = vadd.f32 %v9877_v22, %v9876_v2 }
 0x743   :  { %v9879_v61 = vpop.f32.mrf.mxu1  ;;  %v9921_v4 = vpop.f32.mrf.mxu0 }
 0x744   :  { %v9922_v17 = vadd.f32 %v9921_v4, %v9920_v31  ;;  %v8607_v59 = vadd.f32 %v9878_v44, %v9792_v50 }
 0x745   :  { %v9880_v6 = vpop.f32.mrf.mxu1  ;;  %v9923_v1 = vpop.f32.mrf.mxu0 }
 0x747   :  { %v9924_v57 = vpop.f32.mrf.mxu0 }
 0x75f   :  { %v9898_v12 = vpop.f32.mrf.mxu1 }
 0x761   :  { %v9899_v10 = vpop.f32.mrf.mxu1 }
 0x762   :  { %v9900_v11 = vadd.f32 %v9899_v10, %v9898_v12 }
 0x763   :  { %v9901_v18 = vpop.f32.mrf.mxu1 }
 0x764   :  { %v8647_v3 = vadd.f32 %v9900_v11, %v8607_v59 }
 0x765   :  { %v9902_v15 = vpop.f32.mrf.mxu1 }
 0x766   :  { %v8687_v33 = vadd.f32 %v9922_v17, %v8647_v3 }
 0x7eb   :  { %v9942_v34 = vpop.f32.mrf.mxu1 }
 0x7ed   :  { %v9943_v14 = vpop.f32.mrf.mxu1 }
 0x7ee   :  { %v9944_v16 = vadd.f32 %v9943_v14, %v9942_v34 }
 0x7ef   :  { %v9945_v36 = vpop.f32.mrf.mxu1 }
 0x7f0   :  { %v8727_v5 = vadd.f32 %v9944_v16, %v8687_v33 }
 0x7f1   :  { %v9946_v27 = vpop.f32.mrf.mxu1 }
 0x7f2   :  { %8732 = vst [vmem:[#allocation13] sm:$0x3] %v8727_v5 }
 0x7f3   :  { %10195 = shalt.err (!%p10192_p6)
}
 0x7f4   :  { %8742 = dma.vmem_to_hbm [thread:$0]  %s8740_s1, 32, %s10600_s8, [#allocation4]  }
 0x7f5   :  { %10212 = dma.done.wait [#allocation4], 32  }
 0x7f6   :  { %10213 = vsyncadd [#allocation4], 4294967264 }
 0x7f7   :  { %8746 = vsyncpa [#allocation3], 1 }
 0x7f8   :  { %8747 = vsyncpa [#allocation6], 1 }
 0x7f9   :  { %8748 = vsyncpa [#allocation9], 1 }
 0x7fa   :  { %8749 = vsyncpa [#allocation12], 1 }
 0x7fb   :  { %8750 = vsyncpa [#allocation4], 1 }

</bundles_post_ra>
